<compile_context>
chip_gen: v7x
topology: tpu7x:2x2x1
jax: 0.10.0
libtpu: 0.0.40
codegen_flags: <defaults>
</compile_context>

<pallas_src>
import functools

import jax
import jax.numpy as jnp
from jax.experimental import pallas as pl
from jax.experimental.pallas import tpu as pltpu


# ---------------------------------------------------------------------------
# Pallas kernel 1: one conv layer on a flat padded frame (im2col fused).
# All T taps folded into a single MXU matmul:
#   out[q, :] = act( concat_t a[q + off_t, :]  @  w_flat  + bias )
# bf16 operands / f32 accumulation / f32 bias + LeakyReLU epilogue / bf16 out.
# ---------------------------------------------------------------------------
def _conv_taps_kernel(a_ref, w_ref, b_ref, o_ref, *, offsets, m, slope):
    lhs = jnp.concatenate([a_ref[off:off + m, :] for off in offsets], axis=-1)
    acc = jnp.dot(lhs, w_ref[...], preferred_element_type=jnp.float32)
    acc = acc + b_ref[...]                                        # (1, Cout)
    if slope is not None:
        acc = jnp.maximum(acc, slope * acc)       # LeakyReLU, slope in (0, 1)
    o_ref[...] = acc.astype(o_ref.dtype)


def _conv_taps_call(a_flat, w_flat, bias, offsets, m, slope):
    """a_flat: (B, P, Cin) flat frame; w_flat: (T*Cin, Cout); bias: (Cout,)."""
    B, P, Cin = a_flat.shape
    K, Cout = w_flat.shape
    kern = functools.partial(
        _conv_taps_kernel, offsets=tuple(int(o) for o in offsets), m=int(m),
        slope=slope)
    return pl.pallas_call(
        kern,
        out_shape=jax.ShapeDtypeStruct((B, m, Cout), jnp.bfloat16),
        grid_spec=pltpu.PrefetchScalarGridSpec(
            num_scalar_prefetch=0,
            grid=(B,),
            in_specs=[
                pl.BlockSpec((None, P, Cin), lambda b: (b, 0, 0)),
                pl.BlockSpec((K, Cout), lambda b: (0, 0)),
                pl.BlockSpec((1, Cout), lambda b: (0, 0)),
            ],
            out_specs=pl.BlockSpec((None, m, Cout), lambda b: (b, 0, 0)),
        ),
        compiler_params=pltpu.CompilerParams(dimension_semantics=("parallel",)),
    )(a_flat.astype(jnp.bfloat16),
      w_flat.astype(jnp.bfloat16),
      bias.reshape(1, Cout).astype(jnp.float32))


# ---------------------------------------------------------------------------
# Pallas kernel 2: fused [8 x (3x3 conv + LeakyReLU)] + residual + lastconv
# (ConvTranspose2d phase-decomposed to an equivalent 3x3 conv, 12 channels).
# The bf16 activation frame stays resident in VMEM scratch for all 9 layers;
# each layer is one K=9*C MXU matmul; residual is fused into layer 8's f32
# epilogue; lastconv has no activation.
# ---------------------------------------------------------------------------
def _block_lastconv_kernel(x_ref, wcb_ref, bcb_ref, wlast_ref, blast_ref,
                           o_ref, cur_ref, *, pitch, m, q0, n_layers, slope):
    offs = [(a + 1) * pitch + (b - 1) for a in range(3) for b in range(3)]
    c = cur_ref.shape[-1]

    # resident bf16 activation frame (guard rows / pad cols arrive zeroed)
    cur_ref[...] = x_ref[...]

    # interior-column mask (hoisted, full width): keeps the frame's left/right
    # padding columns zero so they keep acting as conv zero-padding.
    col = jax.lax.broadcasted_iota(jnp.int32, (m, c), 0) % pitch
    colmask = jnp.logical_and(col >= 1, col <= pitch - 2).astype(jnp.float32)

    def taps_lhs():
        return jnp.concatenate([cur_ref[off:off + m, :] for off in offs],
                               axis=-1)                           # (m, 9*c)

    for layer in range(n_layers):
        acc = jnp.dot(taps_lhs(), wcb_ref[layer],
                      preferred_element_type=jnp.float32)         # one MXU pass
        acc = acc + bcb_ref[layer]
        acc = jnp.maximum(acc, slope * acc)                       # LeakyReLU
        acc = acc * colmask
        if layer == n_layers - 1:
            # residual convblock(x) + x fused into the f32 epilogue
            # (x pad columns are already zero, so the mask stays valid)
            acc = acc + x_ref[q0:q0 + m, :].astype(jnp.float32)
        cur_ref[q0:q0 + m, :] = acc.astype(cur_ref.dtype)

    # lastconv: ConvTranspose2d(c, 3, 4, 2, 1) as an equivalent 3x3 conv with
    # 4*3 = 12 phase-stacked output channels (no activation)
    acc = jnp.dot(taps_lhs(), wlast_ref[...], preferred_element_type=jnp.float32)
    o_ref[...] = (acc + blast_ref[...]).astype(o_ref.dtype)


def _block_lastconv_call(x_frame, w_cb, b_cb, w_last12, b_last12, H, W, slope=0.1):
    B, P, C = x_frame.shape
    L, K, _ = w_cb.shape                                          # K = 9*C
    C12 = w_last12.shape[-1]
    pitch = W + 2
    m = H * pitch
    q0 = 2 * pitch
    kern = functools.partial(_block_lastconv_kernel, pitch=pitch, m=m, q0=q0,
                             n_layers=L, slope=slope)
    return pl.pallas_call(
        kern,
        out_shape=jax.ShapeDtypeStruct((B, m, C12), jnp.float32),
        grid_spec=pltpu.PrefetchScalarGridSpec(
            num_scalar_prefetch=0,
            grid=(B,),
            in_specs=[
                pl.BlockSpec((None, P, C), lambda b: (b, 0, 0)),
                pl.BlockSpec((L, K, C), lambda b: (0, 0, 0)),
                pl.BlockSpec((L, 1, C), lambda b: (0, 0, 0)),
                pl.BlockSpec((K, C12), lambda b: (0, 0)),
                pl.BlockSpec((1, C12), lambda b: (0, 0)),
            ],
            out_specs=pl.BlockSpec((None, m, C12), lambda b: (b, 0, 0)),
            scratch_shapes=[pltpu.VMEM((P, C), jnp.bfloat16)],
        ),
        compiler_params=pltpu.CompilerParams(dimension_semantics=("parallel",)),
    )(x_frame.astype(jnp.bfloat16),
      w_cb.astype(jnp.bfloat16),
      b_cb.reshape(L, 1, C).astype(jnp.float32),
      w_last12.astype(jnp.bfloat16),
      b_last12.reshape(1, C12).astype(jnp.float32))


# ---------------------------------------------------------------------------
# Plain-JAX glue: phase splits, equivalent-weight builders, frame builders
# ---------------------------------------------------------------------------
def _pad_phase_split(x_nhwc):
    """Zero-pad by 1, pad to even dims, space-to-depth split of the 4 stride-2
    phases onto channels: out[u, v, (r*2+s)*C + c] = xpad[2u+r, 2v+s, c]."""
    B, H, W, C = x_nhwc.shape
    hp, wp = H + 2, W + 2
    he, we = hp + (hp % 2), wp + (wp % 2)
    xp = jnp.pad(x_nhwc, ((0, 0), (1, 1 + he - hp), (1, 1 + we - wp), (0, 0)))
    x6 = xp.reshape(B, he // 2, 2, we // 2, 2, C)
    x6 = jnp.transpose(x6, (0, 1, 3, 2, 4, 5))
    return x6.reshape(B, he // 2, we // 2, 4 * C)


def _stride2_eq_weight(w_oihw):
    """3x3/stride-2/pad-1 Conv2d weight -> equivalent 2x2 stride-1 'valid' conv
    over the 4-phase split input, flattened tap-major: (4*(4*ic), oc)."""
    oc, ic, _, _ = w_oihw.shape
    w2 = jnp.zeros((2, 2, 4 * ic, oc), w_oihw.dtype)
    for a in range(2):
        for b in range(2):
            for r in range(2):
                for s in range(2):
                    di, dj = 2 * a + r, 2 * b + s
                    if di < 3 and dj < 3:
                        blk = jnp.transpose(w_oihw[:, :, di, dj])   # (ic, oc)
                        p = (r * 2 + s) * ic
                        w2 = w2.at[a, b, p:p + ic, :].set(blk)
    return w2.reshape(16 * ic, oc)


def _conv3x3_flat_weight(w_oihw):
    """3x3 stride-1 Conv2d weight (oc, ic, 3, 3) -> (9*ic, oc), tap-major to
    match the lane-concatenated lhs."""
    oc, ic, _, _ = w_oihw.shape
    return jnp.transpose(w_oihw, (2, 3, 1, 0)).reshape(9 * ic, oc)


def _deconv_eq_weight(w_iohw):
    """ConvTranspose2d(c, oc, 4, stride=2, pad=1) weight -> equivalent 3x3
    stride-1 pad-1 conv producing 4*oc phase-stacked outputs (sub-pixel
    decomposition, no zero-inserted activations).  Returns (9*ic, 4*oc)."""
    ic, oc, _, _ = w_iohw.shape
    k_map = {0: {0: 3, 1: 1}, 1: {1: 2, 2: 0}}   # phase -> {tap offset: k index}
    w3 = jnp.zeros((3, 3, ic, 4 * oc), w_iohw.dtype)
    for py in range(2):
        for px in range(2):
            p = py * 2 + px
            for a, kh in k_map[py].items():
                for b, kw in k_map[px].items():
                    w3 = w3.at[a, b, :, p * oc:(p + 1) * oc].set(w_iohw[:, :, kh, kw])
    return w3.reshape(9 * ic, 4 * oc)


def _conv0_layer(x_nhwc, w_oihw, bias, slope=0.1):
    """3x3 / stride-2 / pad-1 conv + LeakyReLU via phase split + fused kernel."""
    oc = w_oihw.shape[0]
    ph = _pad_phase_split(x_nhwc)                         # (B, Ho+1, Wo+1, 4*ic)
    B, hpr, wpr, c4 = ph.shape
    ho, wo = hpr - 1, wpr - 1
    frame = jnp.pad(ph, ((0, 0), (0, 1), (0, 0), (0, 0)))  # bottom guard row
    frame = frame.reshape(B, (hpr + 1) * wpr, c4)
    w2 = _stride2_eq_weight(w_oihw)                        # (4*c4, oc)
    # NOTE: the '+1' tap at the last interior column reads wrapped data from
    # the next flat row; it is only correct because that column is discarded
    # by the [:, :, :wo, :] slice below.  Do NOT row-tile this frame as-is.
    offsets = (0, 1, wpr, wpr + 1)
    out = _conv_taps_call(frame, w2, bias, offsets, ho * wpr, slope)
    return out.reshape(B, ho, wpr, oc)[:, :, :wo, :]


def _build_frame3(x_nhwc):
    """(B,H,W,C) -> flat (B,(H+4)*(W+2),C): zero pad ring + one guard row each side."""
    B, H, W, C = x_nhwc.shape
    xp = jnp.pad(x_nhwc, ((0, 0), (2, 2), (1, 1), (0, 0)))
    return xp.reshape(B, (H + 4) * (W + 2), C)


def _depth_to_space2(x_phase):
    """(B,H,W,4*oc) phase-stacked -> (B,2H,2W,oc)."""
    B, H, W, c4 = x_phase.shape
    oc = c4 // 4
    x = x_phase.reshape(B, H, W, 2, 2, oc)
    x = jnp.transpose(x, (0, 1, 3, 2, 4, 5))
    return x.reshape(B, 2 * H, 2 * W, oc)


def _resize_hw(x_nchw, new_h, new_w):
    # TODO(synk): bilinear F.interpolate stays in plain JAX (gather-heavy).
    n, ch, _, _ = x_nchw.shape
    return jax.image.resize(x_nchw, (n, ch, new_h, new_w), "bilinear",
                            antialias=False)


def init_params(in_planes, c, key):
    keys = iter(jax.random.split(key, 32))
    w = lambda shape: jax.random.normal(next(keys), shape, jnp.float32) * 0.1
    p = {}
    p["conv0_w0"], p["conv0_b0"] = w((c // 2, in_planes, 3, 3)), w((c // 2,))
    p["conv0_w1"], p["conv0_b1"] = w((c, c // 2, 3, 3)), w((c,))
    for k in range(8):
        p[f"cb_w{k}"], p[f"cb_b{k}"] = w((c, c, 3, 3)), w((c,))
    p["last_w"], p["last_b"] = w((c, 3, 4, 4)), w((3,))          # ConvTranspose2d
    return p


# ---------------------------------------------------------------------------
# IDepthBlock.forward (Pallas path)
# ---------------------------------------------------------------------------
def idepth_block_forward(params, x_nchw, disp_nchw, scale):
    x = x_nchw
    if scale != 1:
        _, _, h, w = x.shape
        x = _resize_hw(x, h // scale, w // scale)
    if disp_nchw is not None:
        _, _, hd, wd = disp_nchw.shape
        d = _resize_hw(disp_nchw, hd // scale, wd // scale) * (1.0 / scale)
        x = jnp.concatenate([x, d], axis=1)

    x = jnp.transpose(x, (0, 2, 3, 1))                            # NCHW -> NHWC

    # conv0: two stride-2 3x3 convs + LeakyReLU(0.1), one fused kernel each
    x = _conv0_layer(x, params["conv0_w0"], params["conv0_b0"])
    x = _conv0_layer(x, params["conv0_w1"], params["conv0_b1"])

    B, H4, W4, _ = x.shape
    # single fused kernel: 8 x (3x3 conv + LReLU) + residual + lastconv
    w_cb = jnp.stack([_conv3x3_flat_weight(params[f"cb_w{k}"]) for k in range(8)])
    b_cb = jnp.stack([params[f"cb_b{k}"] for k in range(8)])
    w_last12 = _deconv_eq_weight(params["last_w"])
    b_last12 = jnp.tile(params["last_b"], 4)
    frame = _build_frame3(x)
    out = _block_lastconv_call(frame, w_cb, b_cb, w_last12, b_last12, H4, W4)

    out = out.reshape(B, H4, W4 + 2, 12)[:, :, 1:W4 + 1, :]       # drop pad cols
    tmp = _depth_to_space2(out)                                   # (B, 2H4, 2W4, 3)
    tmp = jnp.transpose(tmp, (0, 3, 1, 2))                        # NHWC -> NCHW

    _, _, h2, w2 = tmp.shape
    tmp = _resize_hw(tmp, h2 * scale * 2, w2 * scale * 2)
    disp_out = tmp[:, :2] * (scale * 2)
    mask = tmp[:, 2:3]
    return disp_out, mask


# ---------------------------------------------------------------------------
# Pure-JAX f32 reference (lax convs) for a tolerance check
# ---------------------------------------------------------------------------
def _leaky(x, slope=0.1):
    return jnp.maximum(x, slope * x)


def _conv2d_ref(x, w_oihw, b, stride=1):
    out = jax.lax.conv_general_dilated(
        x, w_oihw, window_strides=(stride, stride), padding=((1, 1), (1, 1)),
        dimension_numbers=("NCHW", "OIHW", "NCHW"))
    return out + b.reshape(1, -1, 1, 1)


def _deconv_ref(x, w_iohw, b):
    w = jnp.transpose(w_iohw, (1, 0, 2, 3))[:, :, ::-1, ::-1]     # OIHW, flipped
    out = jax.lax.conv_general_dilated(
        x, w, window_strides=(1, 1), padding=((2, 2), (2, 2)),
        lhs_dilation=(2, 2), dimension_numbers=("NCHW", "OIHW", "NCHW"))
    return out + b.reshape(1, -1, 1, 1)


def idepth_block_forward_ref(params, x_nchw, disp_nchw, scale):
    x = x_nchw
    if scale != 1:
        _, _, h, w = x.shape
        x = _resize_hw(x, h // scale, w // scale)
    if disp_nchw is not None:
        _, _, hd, wd = disp_nchw.shape
        d = _resize_hw(disp_nchw, hd // scale, wd // scale) * (1.0 / scale)
        x = jnp.concatenate([x, d], axis=1)
    x = _leaky(_conv2d_ref(x, params["conv0_w0"], params["conv0_b0"], stride=2))
    x = _leaky(_conv2d_ref(x, params["conv0_w1"], params["conv0_b1"], stride=2))
    y = x
    for k in range(8):
        y = _leaky(_conv2d_ref(y, params[f"cb_w{k}"], params[f"cb_b{k}"]))
    y = y + x
    tmp = _deconv_ref(y, params["last_w"], params["last_b"])
    _, _, h2, w2 = tmp.shape
    tmp = _resize_hw(tmp, h2 * scale * 2, w2 * scale * 2)
    return tmp[:, :2] * (scale * 2), tmp[:, 2:3]


# ---------------------------------------------------------------------------
if __name__ == "__main__":
    key = jax.random.PRNGKey(0)
    k_x, k_d, k_p = jax.random.split(key, 3)

    B, CX, CD, H, W = 2, 4, 1, 16, 16
    C_HIDDEN = 16
    scale = 1

    x = jax.random.normal(k_x, (B, CX, H, W), jnp.float32)
    disp = jax.random.normal(k_d, (B, CD, H, W), jnp.float32)
    params = init_params(CX + CD, C_HIDDEN, k_p)

    fwd = jax.jit(idepth_block_forward, static_argnames=("scale",))
    disp_out, mask = fwd(params, x, disp, scale=scale)
    jax.block_until_ready((disp_out, mask))

    hq, wq = H // scale, W // scale
    out_h, out_w = (hq // 4) * 2 * scale * 2, (wq // 4) * 2 * scale * 2
    assert disp_out.shape == (B, 2, out_h, out_w), disp_out.shape
    assert mask.shape == (B, 1, out_h, out_w), mask.shape
    assert bool(jnp.isfinite(disp_out).all()) and bool(jnp.isfinite(mask).all())

    # numeric check vs. f32 lax-conv reference (loose tolerance: kernel path
    # uses bf16 MXU operands with f32 accumulation across 11 layers)
    disp_ref, mask_ref = jax.jit(
        idepth_block_forward_ref, static_argnames=("scale",))(params, x, disp,
                                                              scale=scale)
    for name, got, ref in (("disp", disp_out, disp_ref), ("mask", mask, mask_ref)):
        ref_scale = float(jnp.max(jnp.abs(ref)))
        err = float(jnp.max(jnp.abs(got.astype(jnp.float32) - ref)))
        tol = 0.1 * max(ref_scale, 1e-3) + 0.02
        assert err <= tol, (name, err, ref_scale, tol)

    print("KERNEL_OK")
</pallas_src>

<mosaic_0001>
module attributes {stable_mosaic.version = 11 : i64} {
  func.func @_conv_taps_kernel(%arg0: i32, %arg1: memref<1x90x20xbf16, #tpu.memory_space<vmem>>, %arg2: memref<80x8xbf16, #tpu.memory_space<vmem>>, %arg3: memref<1x8xf32, #tpu.memory_space<vmem>>, %arg4: memref<1x72x8xbf16, #tpu.memory_space<vmem>>) attributes {dimension_semantics = [#tpu.dimension_semantics<parallel>], iteration_bounds = array<i64: 2>, scalar_prefetch = 0 : i64, scratch_operands = 0 : i64, tpu.core_type = #tpu.core_type<tc>, window_params = [{transform_indices = @transform_0, window_bounds = array<i64: 1, 90, 20>}, {pipeline_mode = #tpu.pipeline_mode<synchronous>, transform_indices = @transform_1, window_bounds = array<i64: 80, 8>}, {pipeline_mode = #tpu.pipeline_mode<synchronous>, transform_indices = @transform_2, window_bounds = array<i64: 1, 8>}, {transform_indices = @transform_3, window_bounds = array<i64: 1, 72, 8>}]} {
    %c0 = arith.constant 0 : index
    %c0_0 = arith.constant 0 : index
    %c0_1 = arith.constant 0 : index
    %0 = vector.load %arg1[%c0, %c0_0, %c0_1] : memref<1x90x20xbf16, #tpu.memory_space<vmem>>, vector<1x72x20xbf16>
    %1 = vector.shape_cast %0 : vector<1x72x20xbf16> to vector<72x20xbf16>
    %c0_2 = arith.constant 0 : index
    %c1 = arith.constant 1 : index
    %c0_3 = arith.constant 0 : index
    %2 = vector.load %arg1[%c0_2, %c1, %c0_3] : memref<1x90x20xbf16, #tpu.memory_space<vmem>>, vector<1x72x20xbf16>
    %3 = vector.shape_cast %2 : vector<1x72x20xbf16> to vector<72x20xbf16>
    %c0_4 = arith.constant 0 : index
    %c9 = arith.constant 9 : index
    %c0_5 = arith.constant 0 : index
    %4 = vector.load %arg1[%c0_4, %c9, %c0_5] : memref<1x90x20xbf16, #tpu.memory_space<vmem>>, vector<1x72x20xbf16>
    %5 = vector.shape_cast %4 : vector<1x72x20xbf16> to vector<72x20xbf16>
    %c0_6 = arith.constant 0 : index
    %c10 = arith.constant 10 : index
    %c0_7 = arith.constant 0 : index
    %6 = vector.load %arg1[%c0_6, %c10, %c0_7] : memref<1x90x20xbf16, #tpu.memory_space<vmem>>, vector<1x72x20xbf16>
    %7 = vector.shape_cast %6 : vector<1x72x20xbf16> to vector<72x20xbf16>
    %8 = tpu.concatenate %1, %3, %5, %7 in 1 : vector<72x20xbf16>, vector<72x20xbf16>, vector<72x20xbf16>, vector<72x20xbf16> -> vector<72x80xbf16>
    %c0_8 = arith.constant 0 : index
    %c0_9 = arith.constant 0 : index
    %9 = vector.load %arg2[%c0_8, %c0_9] : memref<80x8xbf16, #tpu.memory_space<vmem>>, vector<80x8xbf16>
    %cst = arith.constant dense<0.000000e+00> : vector<72x8xf32>
    %10 = tpu.matmul %8, %9, %cst {dimension_numbers = #tpu.dot_dimension_numbers<[1], [0], [0], [1], [0, 0, 1, 1], [], []>} : vector<72x80xbf16>, vector<80x8xbf16>, vector<72x8xf32> -> vector<72x8xf32>
    %c0_10 = arith.constant 0 : index
    %c0_11 = arith.constant 0 : index
    %11 = vector.load %arg3[%c0_10, %c0_11] : memref<1x8xf32, #tpu.memory_space<vmem>>, vector<1x8xf32>
    %12 = vector.broadcast %11 : vector<1x8xf32> to vector<72x8xf32>
    %13 = arith.addf %10, %12 : vector<72x8xf32>
    %cst_12 = arith.constant 1.000000e-01 : f32
    %14 = vector.broadcast %cst_12 : f32 to vector<72x8xf32>
    %15 = arith.mulf %14, %13 : vector<72x8xf32>
    %16 = arith.maximumf %13, %15 : vector<72x8xf32>
    %17 = arith.truncf %16 : vector<72x8xf32> to vector<72x8xbf16>
    %c0_13 = arith.constant 0 : index
    %c0_14 = arith.constant 0 : index
    %c0_15 = arith.constant 0 : index
    %18 = vector.load %arg4[%c0_13, %c0_14, %c0_15] : memref<1x72x8xbf16, #tpu.memory_space<vmem>>, vector<1x72x8xbf16>
    %19 = vector.shape_cast %18 : vector<1x72x8xbf16> to vector<72x8xbf16>
    %20 = vector.shape_cast %17 : vector<72x8xbf16> to vector<1x72x8xbf16>
    tpu.vector_store %arg4[%c0_13, %c0_14, %c0_15], %20 {strides = array<i32>} : memref<1x72x8xbf16, #tpu.memory_space<vmem>>, vector<1x72x8xbf16>,
    return
  }
  func.func @transform_0(%arg0: i32) -> (i32, i32, i32) {
    %c0_i32 = arith.constant 0 : i32
    %c0_i32_0 = arith.constant 0 : i32
    %c0_i32_1 = arith.constant 0 : i32
    return %arg0, %c0_i32, %c0_i32_0 : i32, i32, i32
  }
  func.func @transform_1(%arg0: i32) -> (i32, i32) {
    %c0_i32 = arith.constant 0 : i32
    %c0_i32_0 = arith.constant 0 : i32
    %c0_i32_1 = arith.constant 0 : i32
    return %c0_i32, %c0_i32_0 : i32, i32
  }
  func.func @transform_2(%arg0: i32) -> (i32, i32) {
    %c0_i32 = arith.constant 0 : i32
    %c0_i32_0 = arith.constant 0 : i32
    %c0_i32_1 = arith.constant 0 : i32
    return %c0_i32, %c0_i32_0 : i32, i32
  }
  func.func @transform_3(%arg0: i32) -> (i32, i32, i32) {
    %c0_i32 = arith.constant 0 : i32
    %c0_i32_0 = arith.constant 0 : i32
    %c0_i32_1 = arith.constant 0 : i32
    return %arg0, %c0_i32, %c0_i32_0 : i32, i32, i32
  }
}

module attributes {stable_mosaic.version = 11 : i64} {
  func.func @_conv_taps_kernel(%arg0: i32, %arg1: memref<1x30x32xbf16, #tpu.memory_space<vmem>>, %arg2: memref<128x16xbf16, #tpu.memory_space<vmem>>, %arg3: memref<1x16xf32, #tpu.memory_space<vmem>>, %arg4: memref<1x20x16xbf16, #tpu.memory_space<vmem>>) attributes {dimension_semantics = [#tpu.dimension_semantics<parallel>], iteration_bounds = array<i64: 2>, scalar_prefetch = 0 : i64, scratch_operands = 0 : i64, tpu.core_type = #tpu.core_type<tc>, window_params = [{transform_indices = @transform_0, window_bounds = array<i64: 1, 30, 32>}, {pipeline_mode = #tpu.pipeline_mode<synchronous>, transform_indices = @transform_1, window_bounds = array<i64: 128, 16>}, {pipeline_mode = #tpu.pipeline_mode<synchronous>, transform_indices = @transform_2, window_bounds = array<i64: 1, 16>}, {transform_indices = @transform_3, window_bounds = array<i64: 1, 20, 16>}]} {
    %c0 = arith.constant 0 : index
    %c0_0 = arith.constant 0 : index
    %c0_1 = arith.constant 0 : index
    %0 = vector.load %arg1[%c0, %c0_0, %c0_1] : memref<1x30x32xbf16, #tpu.memory_space<vmem>>, vector<1x20x32xbf16>
    %1 = vector.shape_cast %0 : vector<1x20x32xbf16> to vector<20x32xbf16>
    %c0_2 = arith.constant 0 : index
    %c1 = arith.constant 1 : index
    %c0_3 = arith.constant 0 : index
    %2 = vector.load %arg1[%c0_2, %c1, %c0_3] : memref<1x30x32xbf16, #tpu.memory_space<vmem>>, vector<1x20x32xbf16>
    %3 = vector.shape_cast %2 : vector<1x20x32xbf16> to vector<20x32xbf16>
    %c0_4 = arith.constant 0 : index
    %c5 = arith.constant 5 : index
    %c0_5 = arith.constant 0 : index
    %4 = vector.load %arg1[%c0_4, %c5, %c0_5] : memref<1x30x32xbf16, #tpu.memory_space<vmem>>, vector<1x20x32xbf16>
    %5 = vector.shape_cast %4 : vector<1x20x32xbf16> to vector<20x32xbf16>
    %c0_6 = arith.constant 0 : index
    %c6 = arith.constant 6 : index
    %c0_7 = arith.constant 0 : index
    %6 = vector.load %arg1[%c0_6, %c6, %c0_7] : memref<1x30x32xbf16, #tpu.memory_space<vmem>>, vector<1x20x32xbf16>
    %7 = vector.shape_cast %6 : vector<1x20x32xbf16> to vector<20x32xbf16>
    %8 = tpu.concatenate %1, %3, %5, %7 in 1 : vector<20x32xbf16>, vector<20x32xbf16>, vector<20x32xbf16>, vector<20x32xbf16> -> vector<20x128xbf16>
    %c0_8 = arith.constant 0 : index
    %c0_9 = arith.constant 0 : index
    %9 = vector.load %arg2[%c0_8, %c0_9] : memref<128x16xbf16, #tpu.memory_space<vmem>>, vector<128x16xbf16>
    %cst = arith.constant dense<0.000000e+00> : vector<20x16xf32>
    %10 = tpu.matmul %8, %9, %cst {dimension_numbers = #tpu.dot_dimension_numbers<[1], [0], [0], [1], [0, 0, 1, 1], [], []>} : vector<20x128xbf16>, vector<128x16xbf16>, vector<20x16xf32> -> vector<20x16xf32>
    %c0_10 = arith.constant 0 : index
    %c0_11 = arith.constant 0 : index
    %11 = vector.load %arg3[%c0_10, %c0_11] : memref<1x16xf32, #tpu.memory_space<vmem>>, vector<1x16xf32>
    %12 = vector.broadcast %11 : vector<1x16xf32> to vector<20x16xf32>
    %13 = arith.addf %10, %12 : vector<20x16xf32>
    %cst_12 = arith.constant 1.000000e-01 : f32
    %14 = vector.broadcast %cst_12 : f32 to vector<20x16xf32>
    %15 = arith.mulf %14, %13 : vector<20x16xf32>
    %16 = arith.maximumf %13, %15 : vector<20x16xf32>
    %17 = arith.truncf %16 : vector<20x16xf32> to vector<20x16xbf16>
    %c0_13 = arith.constant 0 : index
    %c0_14 = arith.constant 0 : index
    %c0_15 = arith.constant 0 : index
    %18 = vector.load %arg4[%c0_13, %c0_14, %c0_15] : memref<1x20x16xbf16, #tpu.memory_space<vmem>>, vector<1x20x16xbf16>
    %19 = vector.shape_cast %18 : vector<1x20x16xbf16> to vector<20x16xbf16>
    %20 = vector.shape_cast %17 : vector<20x16xbf16> to vector<1x20x16xbf16>
    tpu.vector_store %arg4[%c0_13, %c0_14, %c0_15], %20 {strides = array<i32>} : memref<1x20x16xbf16, #tpu.memory_space<vmem>>, vector<1x20x16xbf16>,
    return
  }
  func.func @transform_0(%arg0: i32) -> (i32, i32, i32) {
    %c0_i32 = arith.constant 0 : i32
    %c0_i32_0 = arith.constant 0 : i32
    %c0_i32_1 = arith.constant 0 : i32
    return %arg0, %c0_i32, %c0_i32_0 : i32, i32, i32
  }
  func.func @transform_1(%arg0: i32) -> (i32, i32) {
    %c0_i32 = arith.constant 0 : i32
    %c0_i32_0 = arith.constant 0 : i32
    %c0_i32_1 = arith.constant 0 : i32
    return %c0_i32, %c0_i32_0 : i32, i32
  }
  func.func @transform_2(%arg0: i32) -> (i32, i32) {
    %c0_i32 = arith.constant 0 : i32
    %c0_i32_0 = arith.constant 0 : i32
    %c0_i32_1 = arith.constant 0 : i32
    return %c0_i32, %c0_i32_0 : i32, i32
  }
  func.func @transform_3(%arg0: i32) -> (i32, i32, i32) {
    %c0_i32 = arith.constant 0 : i32
    %c0_i32_0 = arith.constant 0 : i32
    %c0_i32_1 = arith.constant 0 : i32
    return %arg0, %c0_i32, %c0_i32_0 : i32, i32, i32
  }
}

module attributes {stable_mosaic.version = 11 : i64} {
  func.func @_block_lastconv_kernel(%arg0: i32, %arg1: memref<1x48x16xbf16, #tpu.memory_space<vmem>>, %arg2: memref<8x144x16xbf16, #tpu.memory_space<vmem>>, %arg3: memref<8x1x16xf32, #tpu.memory_space<vmem>>, %arg4: memref<144x12xbf16, #tpu.memory_space<vmem>>, %arg5: memref<1x12xf32, #tpu.memory_space<vmem>>, %arg6: memref<1x24x12xf32, #tpu.memory_space<vmem>>, %arg7: memref<48x16xbf16, #tpu.memory_space<vmem>>) attributes {dimension_semantics = [#tpu.dimension_semantics<parallel>], iteration_bounds = array<i64: 2>, scalar_prefetch = 0 : i64, scratch_operands = 1 : i64, tpu.core_type = #tpu.core_type<tc>, window_params = [{transform_indices = @transform_0, window_bounds = array<i64: 1, 48, 16>}, {pipeline_mode = #tpu.pipeline_mode<synchronous>, transform_indices = @transform_1, window_bounds = array<i64: 8, 144, 16>}, {pipeline_mode = #tpu.pipeline_mode<synchronous>, transform_indices = @transform_2, window_bounds = array<i64: 8, 1, 16>}, {pipeline_mode = #tpu.pipeline_mode<synchronous>, transform_indices = @transform_3, window_bounds = array<i64: 144, 12>}, {pipeline_mode = #tpu.pipeline_mode<synchronous>, transform_indices = @transform_4, window_bounds = array<i64: 1, 12>}, {transform_indices = @transform_5, window_bounds = array<i64: 1, 24, 12>}]} {
    %c0 = arith.constant 0 : index
    %c0_0 = arith.constant 0 : index
    %c0_1 = arith.constant 0 : index
    %0 = vector.load %arg1[%c0, %c0_0, %c0_1] : memref<1x48x16xbf16, #tpu.memory_space<vmem>>, vector<1x48x16xbf16>
    %1 = vector.shape_cast %0 : vector<1x48x16xbf16> to vector<48x16xbf16>
    %c0_2 = arith.constant 0 : index
    %c0_3 = arith.constant 0 : index
    %2 = vector.load %arg7[%c0_2, %c0_3] : memref<48x16xbf16, #tpu.memory_space<vmem>>, vector<48x16xbf16>
    tpu.vector_store %arg7[%c0_2, %c0_3], %1 {strides = array<i32>} : memref<48x16xbf16, #tpu.memory_space<vmem>>, vector<48x16xbf16>,
    %3 = tpu.iota {dimensions = array<i32: 0>} : vector<24x16xi32>
    %c6_i32 = arith.constant 6 : i32
    %c0_i32 = arith.constant 0 : i32
    %4 = arith.cmpi eq, %c6_i32, %c0_i32 : i32
    %c1_i32 = arith.constant 1 : i32
    %5 = arith.select %4, %c1_i32, %c6_i32 : i32
    %6 = vector.broadcast %5 : i32 to vector<24x16xi32>
    %7 = arith.remsi %3, %6 : vector<24x16xi32>
    %c0_i32_4 = arith.constant 0 : i32
    %8 = vector.broadcast %c0_i32_4 : i32 to vector<24x16xi32>
    %9 = arith.cmpi ne, %7, %8 : vector<24x16xi32>
    %c0_i32_5 = arith.constant 0 : i32
    %10 = vector.broadcast %c0_i32_5 : i32 to vector<24x16xi32>
    %11 = arith.cmpi slt, %7, %10 : vector<24x16xi32>
    %c0_i32_6 = arith.constant 0 : i32
    %12 = arith.cmpi slt, %5, %c0_i32_6 : i32
    %13 = vector.broadcast %12 : i1 to vector<24x16xi1>
    %14 = vector.broadcast %13 : vector<24x16xi1> to vector<24x16xi1>
    %15 = arith.xori %11, %14 : vector<24x16xi1>
    %16 = arith.andi %15, %9 : vector<24x16xi1>
    %17 = vector.broadcast %5 : i32 to vector<24x16xi32>
    %18 = arith.addi %7, %17 : vector<24x16xi32>
    %19 = arith.select %16, %18, %7 : vector<24x16xi1>, vector<24x16xi32>
    %c1_i32_7 = arith.constant 1 : i32
    %20 = vector.broadcast %c1_i32_7 : i32 to vector<24x16xi32>
    %21 = arith.cmpi sge, %19, %20 : vector<24x16xi32>
    %c4_i32 = arith.constant 4 : i32
    %22 = vector.broadcast %c4_i32 : i32 to vector<24x16xi32>
    %23 = arith.cmpi sle, %19, %22 : vector<24x16xi32>
    %24 = arith.andi %21, %23 : vector<24x16xi1>
    %25 = arith.extui %24 : vector<24x16xi1> to vector<24x16xi32>
    %26 = arith.sitofp %25 : vector<24x16xi32> to vector<24x16xf32>
    %c5 = arith.constant 5 : index
    %c0_8 = arith.constant 0 : index
    %27 = vector.load %arg7[%c5, %c0_8] : memref<48x16xbf16, #tpu.memory_space<vmem>>, vector<24x16xbf16>
    %c6 = arith.constant 6 : index
    %c0_9 = arith.constant 0 : index
    %28 = vector.load %arg7[%c6, %c0_9] : memref<48x16xbf16, #tpu.memory_space<vmem>>, vector<24x16xbf16>
    %c7 = arith.constant 7 : index
    %c0_10 = arith.constant 0 : index
    %29 = vector.load %arg7[%c7, %c0_10] : memref<48x16xbf16, #tpu.memory_space<vmem>>, vector<24x16xbf16>
    %c11 = arith.constant 11 : index
    %c0_11 = arith.constant 0 : index
    %30 = vector.load %arg7[%c11, %c0_11] : memref<48x16xbf16, #tpu.memory_space<vmem>>, vector<24x16xbf16>
    %c12 = arith.constant 12 : index
    %c0_12 = arith.constant 0 : index
    %31 = vector.load %arg7[%c12, %c0_12] : memref<48x16xbf16, #tpu.memory_space<vmem>>, vector<24x16xbf16>
    %c13 = arith.constant 13 : index
    %c0_13 = arith.constant 0 : index
    %32 = vector.load %arg7[%c13, %c0_13] : memref<48x16xbf16, #tpu.memory_space<vmem>>, vector<24x16xbf16>
    %c17 = arith.constant 17 : index
    %c0_14 = arith.constant 0 : index
    %33 = vector.load %arg7[%c17, %c0_14] : memref<48x16xbf16, #tpu.memory_space<vmem>>, vector<24x16xbf16>
    %c18 = arith.constant 18 : index
    %c0_15 = arith.constant 0 : index
    %34 = vector.load %arg7[%c18, %c0_15] : memref<48x16xbf16, #tpu.memory_space<vmem>>, vector<24x16xbf16>
    %c19 = arith.constant 19 : index
    %c0_16 = arith.constant 0 : index
    %35 = vector.load %arg7[%c19, %c0_16] : memref<48x16xbf16, #tpu.memory_space<vmem>>, vector<24x16xbf16>
    %36 = tpu.concatenate %27, %28, %29, %30, %31, %32, %33, %34, %35 in 1 : vector<24x16xbf16>, vector<24x16xbf16>, vector<24x16xbf16>, vector<24x16xbf16>, vector<24x16xbf16>, vector<24x16xbf16>, vector<24x16xbf16>, vector<24x16xbf16>, vector<24x16xbf16> -> vector<24x144xbf16>
    %c0_17 = arith.constant 0 : index
    %c0_18 = arith.constant 0 : index
    %c0_19 = arith.constant 0 : index
    %37 = vector.load %arg2[%c0_17, %c0_18, %c0_19] : memref<8x144x16xbf16, #tpu.memory_space<vmem>>, vector<1x144x16xbf16>
    %38 = vector.shape_cast %37 : vector<1x144x16xbf16> to vector<144x16xbf16>
    %cst = arith.constant dense<0.000000e+00> : vector<24x16xf32>
    %39 = tpu.matmul %36, %38, %cst {dimension_numbers = #tpu.dot_dimension_numbers<[1], [0], [0], [1], [0, 0, 1, 1], [], []>} : vector<24x144xbf16>, vector<144x16xbf16>, vector<24x16xf32> -> vector<24x16xf32>
    %c0_20 = arith.constant 0 : index
    %c0_21 = arith.constant 0 : index
    %c0_22 = arith.constant 0 : index
    %40 = vector.load %arg3[%c0_20, %c0_21, %c0_22] : memref<8x1x16xf32, #tpu.memory_space<vmem>>, vector<1x1x16xf32>
    %41 = vector.shape_cast %40 : vector<1x1x16xf32> to vector<1x16xf32>
    %42 = vector.broadcast %41 : vector<1x16xf32> to vector<24x16xf32>
    %43 = arith.addf %39, %42 : vector<24x16xf32>
    %cst_23 = arith.constant 1.000000e-01 : f32
    %44 = vector.broadcast %cst_23 : f32 to vector<24x16xf32>
    %45 = arith.mulf %44, %43 : vector<24x16xf32>
    %46 = arith.maximumf %43, %45 : vector<24x16xf32>
    %47 = arith.mulf %46, %26 : vector<24x16xf32>
    %48 = arith.truncf %47 : vector<24x16xf32> to vector<24x16xbf16>
    %c12_24 = arith.constant 12 : index
    %c0_25 = arith.constant 0 : index
    %49 = vector.load %arg7[%c12_24, %c0_25] : memref<48x16xbf16, #tpu.memory_space<vmem>>, vector<24x16xbf16>
    tpu.vector_store %arg7[%c12_24, %c0_25], %48 {strides = array<i32>} : memref<48x16xbf16, #tpu.memory_space<vmem>>, vector<24x16xbf16>,
    %c5_26 = arith.constant 5 : index
    %c0_27 = arith.constant 0 : index
    %50 = vector.load %arg7[%c5_26, %c0_27] : memref<48x16xbf16, #tpu.memory_space<vmem>>, vector<24x16xbf16>
    %c6_28 = arith.constant 6 : index
    %c0_29 = arith.constant 0 : index
    %51 = vector.load %arg7[%c6_28, %c0_29] : memref<48x16xbf16, #tpu.memory_space<vmem>>, vector<24x16xbf16>
    %c7_30 = arith.constant 7 : index
    %c0_31 = arith.constant 0 : index
    %52 = vector.load %arg7[%c7_30, %c0_31] : memref<48x16xbf16, #tpu.memory_space<vmem>>, vector<24x16xbf16>
    %c11_32 = arith.constant 11 : index
    %c0_33 = arith.constant 0 : index
    %53 = vector.load %arg7[%c11_32, %c0_33] : memref<48x16xbf16, #tpu.memory_space<vmem>>, vector<24x16xbf16>
    %c12_34 = arith.constant 12 : index
    %c0_35 = arith.constant 0 : index
    %54 = vector.load %arg7[%c12_34, %c0_35] : memref<48x16xbf16, #tpu.memory_space<vmem>>, vector<24x16xbf16>
    %c13_36 = arith.constant 13 : index
    %c0_37 = arith.constant 0 : index
    %55 = vector.load %arg7[%c13_36, %c0_37] : memref<48x16xbf16, #tpu.memory_space<vmem>>, vector<24x16xbf16>
    %c17_38 = arith.constant 17 : index
    %c0_39 = arith.constant 0 : index
    %56 = vector.load %arg7[%c17_38, %c0_39] : memref<48x16xbf16, #tpu.memory_space<vmem>>, vector<24x16xbf16>
    %c18_40 = arith.constant 18 : index
    %c0_41 = arith.constant 0 : index
    %57 = vector.load %arg7[%c18_40, %c0_41] : memref<48x16xbf16, #tpu.memory_space<vmem>>, vector<24x16xbf16>
    %c19_42 = arith.constant 19 : index
    %c0_43 = arith.constant 0 : index
    %58 = vector.load %arg7[%c19_42, %c0_43] : memref<48x16xbf16, #tpu.memory_space<vmem>>, vector<24x16xbf16>
    %59 = tpu.concatenate %50, %51, %52, %53, %54, %55, %56, %57, %58 in 1 : vector<24x16xbf16>, vector<24x16xbf16>, vector<24x16xbf16>, vector<24x16xbf16>, vector<24x16xbf16>, vector<24x16xbf16>, vector<24x16xbf16>, vector<24x16xbf16>, vector<24x16xbf16> -> vector<24x144xbf16>
    %c1 = arith.constant 1 : index
    %c0_44 = arith.constant 0 : index
    %c0_45 = arith.constant 0 : index
    %60 = vector.load %arg2[%c1, %c0_44, %c0_45] : memref<8x144x16xbf16, #tpu.memory_space<vmem>>, vector<1x144x16xbf16>
    %61 = vector.shape_cast %60 : vector<1x144x16xbf16> to vector<144x16xbf16>
    %cst_46 = arith.constant dense<0.000000e+00> : vector<24x16xf32>
    %62 = tpu.matmul %59, %61, %cst_46 {dimension_numbers = #tpu.dot_dimension_numbers<[1], [0], [0], [1], [0, 0, 1, 1], [], []>} : vector<24x144xbf16>, vector<144x16xbf16>, vector<24x16xf32> -> vector<24x16xf32>
    %c1_47 = arith.constant 1 : index
    %c0_48 = arith.constant 0 : index
    %c0_49 = arith.constant 0 : index
    %63 = vector.load %arg3[%c1_47, %c0_48, %c0_49] : memref<8x1x16xf32, #tpu.memory_space<vmem>>, vector<1x1x16xf32>
    %64 = vector.shape_cast %63 : vector<1x1x16xf32> to vector<1x16xf32>
    %65 = vector.broadcast %64 : vector<1x16xf32> to vector<24x16xf32>
    %66 = arith.addf %62, %65 : vector<24x16xf32>
    %cst_50 = arith.constant 1.000000e-01 : f32
    %67 = vector.broadcast %cst_50 : f32 to vector<24x16xf32>
    %68 = arith.mulf %67, %66 : vector<24x16xf32>
    %69 = arith.maximumf %66, %68 : vector<24x16xf32>
    %70 = arith.mulf %69, %26 : vector<24x16xf32>
    %71 = arith.truncf %70 : vector<24x16xf32> to vector<24x16xbf16>
    %c12_51 = arith.constant 12 : index
    %c0_52 = arith.constant 0 : index
    %72 = vector.load %arg7[%c12_51, %c0_52] : memref<48x16xbf16, #tpu.memory_space<vmem>>, vector<24x16xbf16>
    tpu.vector_store %arg7[%c12_51, %c0_52], %71 {strides = array<i32>} : memref<48x16xbf16, #tpu.memory_space<vmem>>, vector<24x16xbf16>,
    %c5_53 = arith.constant 5 : index
    %c0_54 = arith.constant 0 : index
    %73 = vector.load %arg7[%c5_53, %c0_54] : memref<48x16xbf16, #tpu.memory_space<vmem>>, vector<24x16xbf16>
    %c6_55 = arith.constant 6 : index
    %c0_56 = arith.constant 0 : index
    %74 = vector.load %arg7[%c6_55, %c0_56] : memref<48x16xbf16, #tpu.memory_space<vmem>>, vector<24x16xbf16>
    %c7_57 = arith.constant 7 : index
    %c0_58 = arith.constant 0 : index
    %75 = vector.load %arg7[%c7_57, %c0_58] : memref<48x16xbf16, #tpu.memory_space<vmem>>, vector<24x16xbf16>
    %c11_59 = arith.constant 11 : index
    %c0_60 = arith.constant 0 : index
    %76 = vector.load %arg7[%c11_59, %c0_60] : memref<48x16xbf16, #tpu.memory_space<vmem>>, vector<24x16xbf16>
    %c12_61 = arith.constant 12 : index
    %c0_62 = arith.constant 0 : index
    %77 = vector.load %arg7[%c12_61, %c0_62] : memref<48x16xbf16, #tpu.memory_space<vmem>>, vector<24x16xbf16>
    %c13_63 = arith.constant 13 : index
    %c0_64 = arith.constant 0 : index
    %78 = vector.load %arg7[%c13_63, %c0_64] : memref<48x16xbf16, #tpu.memory_space<vmem>>, vector<24x16xbf16>
    %c17_65 = arith.constant 17 : index
    %c0_66 = arith.constant 0 : index
    %79 = vector.load %arg7[%c17_65, %c0_66] : memref<48x16xbf16, #tpu.memory_space<vmem>>, vector<24x16xbf16>
    %c18_67 = arith.constant 18 : index
    %c0_68 = arith.constant 0 : index
    %80 = vector.load %arg7[%c18_67, %c0_68] : memref<48x16xbf16, #tpu.memory_space<vmem>>, vector<24x16xbf16>
    %c19_69 = arith.constant 19 : index
    %c0_70 = arith.constant 0 : index
    %81 = vector.load %arg7[%c19_69, %c0_70] : memref<48x16xbf16, #tpu.memory_space<vmem>>, vector<24x16xbf16>
    %82 = tpu.concatenate %73, %74, %75, %76, %77, %78, %79, %80, %81 in 1 : vector<24x16xbf16>, vector<24x16xbf16>, vector<24x16xbf16>, vector<24x16xbf16>, vector<24x16xbf16>, vector<24x16xbf16>, vector<24x16xbf16>, vector<24x16xbf16>, vector<24x16xbf16> -> vector<24x144xbf16>
    %c2 = arith.constant 2 : index
    %c0_71 = arith.constant 0 : index
    %c0_72 = arith.constant 0 : index
    %83 = vector.load %arg2[%c2, %c0_71, %c0_72] : memref<8x144x16xbf16, #tpu.memory_space<vmem>>, vector<1x144x16xbf16>
    %84 = vector.shape_cast %83 : vector<1x144x16xbf16> to vector<144x16xbf16>
    %cst_73 = arith.constant dense<0.000000e+00> : vector<24x16xf32>
    %85 = tpu.matmul %82, %84, %cst_73 {dimension_numbers = #tpu.dot_dimension_numbers<[1], [0], [0], [1], [0, 0, 1, 1], [], []>} : vector<24x144xbf16>, vector<144x16xbf16>, vector<24x16xf32> -> vector<24x16xf32>
    %c2_74 = arith.constant 2 : index
    %c0_75 = arith.constant 0 : index
    %c0_76 = arith.constant 0 : index
    %86 = vector.load %arg3[%c2_74, %c0_75, %c0_76] : memref<8x1x16xf32, #tpu.memory_space<vmem>>, vector<1x1x16xf32>
    %87 = vector.shape_cast %86 : vector<1x1x16xf32> to vector<1x16xf32>
    %88 = vector.broadcast %87 : vector<1x16xf32> to vector<24x16xf32>
    %89 = arith.addf %85, %88 : vector<24x16xf32>
    %cst_77 = arith.constant 1.000000e-01 : f32
    %90 = vector.broadcast %cst_77 : f32 to vector<24x16xf32>
    %91 = arith.mulf %90, %89 : vector<24x16xf32>
    %92 = arith.maximumf %89, %91 : vector<24x16xf32>
    %93 = arith.mulf %92, %26 : vector<24x16xf32>
    %94 = arith.truncf %93 : vector<24x16xf32> to vector<24x16xbf16>
    %c12_78 = arith.constant 12 : index
    %c0_79 = arith.constant 0 : index
    %95 = vector.load %arg7[%c12_78, %c0_79] : memref<48x16xbf16, #tpu.memory_space<vmem>>, vector<24x16xbf16>
    tpu.vector_store %arg7[%c12_78, %c0_79], %94 {strides = array<i32>} : memref<48x16xbf16, #tpu.memory_space<vmem>>, vector<24x16xbf16>,
    %c5_80 = arith.constant 5 : index
    %c0_81 = arith.constant 0 : index
    %96 = vector.load %arg7[%c5_80, %c0_81] : memref<48x16xbf16, #tpu.memory_space<vmem>>, vector<24x16xbf16>
    %c6_82 = arith.constant 6 : index
    %c0_83 = arith.constant 0 : index
    %97 = vector.load %arg7[%c6_82, %c0_83] : memref<48x16xbf16, #tpu.memory_space<vmem>>, vector<24x16xbf16>
    %c7_84 = arith.constant 7 : index
    %c0_85 = arith.constant 0 : index
    %98 = vector.load %arg7[%c7_84, %c0_85] : memref<48x16xbf16, #tpu.memory_space<vmem>>, vector<24x16xbf16>
    %c11_86 = arith.constant 11 : index
    %c0_87 = arith.constant 0 : index
    %99 = vector.load %arg7[%c11_86, %c0_87] : memref<48x16xbf16, #tpu.memory_space<vmem>>, vector<24x16xbf16>
    %c12_88 = arith.constant 12 : index
    %c0_89 = arith.constant 0 : index
    %100 = vector.load %arg7[%c12_88, %c0_89] : memref<48x16xbf16, #tpu.memory_space<vmem>>, vector<24x16xbf16>
    %c13_90 = arith.constant 13 : index
    %c0_91 = arith.constant 0 : index
    %101 = vector.load %arg7[%c13_90, %c0_91] : memref<48x16xbf16, #tpu.memory_space<vmem>>, vector<24x16xbf16>
    %c17_92 = arith.constant 17 : index
    %c0_93 = arith.constant 0 : index
    %102 = vector.load %arg7[%c17_92, %c0_93] : memref<48x16xbf16, #tpu.memory_space<vmem>>, vector<24x16xbf16>
    %c18_94 = arith.constant 18 : index
    %c0_95 = arith.constant 0 : index
    %103 = vector.load %arg7[%c18_94, %c0_95] : memref<48x16xbf16, #tpu.memory_space<vmem>>, vector<24x16xbf16>
    %c19_96 = arith.constant 19 : index
    %c0_97 = arith.constant 0 : index
    %104 = vector.load %arg7[%c19_96, %c0_97] : memref<48x16xbf16, #tpu.memory_space<vmem>>, vector<24x16xbf16>
    %105 = tpu.concatenate %96, %97, %98, %99, %100, %101, %102, %103, %104 in 1 : vector<24x16xbf16>, vector<24x16xbf16>, vector<24x16xbf16>, vector<24x16xbf16>, vector<24x16xbf16>, vector<24x16xbf16>, vector<24x16xbf16>, vector<24x16xbf16>, vector<24x16xbf16> -> vector<24x144xbf16>
    %c3 = arith.constant 3 : index
    %c0_98 = arith.constant 0 : index
    %c0_99 = arith.constant 0 : index
    %106 = vector.load %arg2[%c3, %c0_98, %c0_99] : memref<8x144x16xbf16, #tpu.memory_space<vmem>>, vector<1x144x16xbf16>
    %107 = vector.shape_cast %106 : vector<1x144x16xbf16> to vector<144x16xbf16>
    %cst_100 = arith.constant dense<0.000000e+00> : vector<24x16xf32>
    %108 = tpu.matmul %105, %107, %cst_100 {dimension_numbers = #tpu.dot_dimension_numbers<[1], [0], [0], [1], [0, 0, 1, 1], [], []>} : vector<24x144xbf16>, vector<144x16xbf16>, vector<24x16xf32> -> vector<24x16xf32>
    %c3_101 = arith.constant 3 : index
    %c0_102 = arith.constant 0 : index
    %c0_103 = arith.constant 0 : index
    %109 = vector.load %arg3[%c3_101, %c0_102, %c0_103] : memref<8x1x16xf32, #tpu.memory_space<vmem>>, vector<1x1x16xf32>
    %110 = vector.shape_cast %109 : vector<1x1x16xf32> to vector<1x16xf32>
    %111 = vector.broadcast %110 : vector<1x16xf32> to vector<24x16xf32>
    %112 = arith.addf %108, %111 : vector<24x16xf32>
    %cst_104 = arith.constant 1.000000e-01 : f32
    %113 = vector.broadcast %cst_104 : f32 to vector<24x16xf32>
    %114 = arith.mulf %113, %112 : vector<24x16xf32>
    %115 = arith.maximumf %112, %114 : vector<24x16xf32>
    %116 = arith.mulf %115, %26 : vector<24x16xf32>
    %117 = arith.truncf %116 : vector<24x16xf32> to vector<24x16xbf16>
    %c12_105 = arith.constant 12 : index
    %c0_106 = arith.constant 0 : index
    %118 = vector.load %arg7[%c12_105, %c0_106] : memref<48x16xbf16, #tpu.memory_space<vmem>>, vector<24x16xbf16>
    tpu.vector_store %arg7[%c12_105, %c0_106], %117 {strides = array<i32>} : memref<48x16xbf16, #tpu.memory_space<vmem>>, vector<24x16xbf16>,
    %c5_107 = arith.constant 5 : index
    %c0_108 = arith.constant 0 : index
    %119 = vector.load %arg7[%c5_107, %c0_108] : memref<48x16xbf16, #tpu.memory_space<vmem>>, vector<24x16xbf16>
    %c6_109 = arith.constant 6 : index
    %c0_110 = arith.constant 0 : index
    %120 = vector.load %arg7[%c6_109, %c0_110] : memref<48x16xbf16, #tpu.memory_space<vmem>>, vector<24x16xbf16>
    %c7_111 = arith.constant 7 : index
    %c0_112 = arith.constant 0 : index
    %121 = vector.load %arg7[%c7_111, %c0_112] : memref<48x16xbf16, #tpu.memory_space<vmem>>, vector<24x16xbf16>
    %c11_113 = arith.constant 11 : index
    %c0_114 = arith.constant 0 : index
    %122 = vector.load %arg7[%c11_113, %c0_114] : memref<48x16xbf16, #tpu.memory_space<vmem>>, vector<24x16xbf16>
    %c12_115 = arith.constant 12 : index
    %c0_116 = arith.constant 0 : index
    %123 = vector.load %arg7[%c12_115, %c0_116] : memref<48x16xbf16, #tpu.memory_space<vmem>>, vector<24x16xbf16>
    %c13_117 = arith.constant 13 : index
    %c0_118 = arith.constant 0 : index
    %124 = vector.load %arg7[%c13_117, %c0_118] : memref<48x16xbf16, #tpu.memory_space<vmem>>, vector<24x16xbf16>
    %c17_119 = arith.constant 17 : index
    %c0_120 = arith.constant 0 : index
    %125 = vector.load %arg7[%c17_119, %c0_120] : memref<48x16xbf16, #tpu.memory_space<vmem>>, vector<24x16xbf16>
    %c18_121 = arith.constant 18 : index
    %c0_122 = arith.constant 0 : index
    %126 = vector.load %arg7[%c18_121, %c0_122] : memref<48x16xbf16, #tpu.memory_space<vmem>>, vector<24x16xbf16>
    %c19_123 = arith.constant 19 : index
    %c0_124 = arith.constant 0 : index
    %127 = vector.load %arg7[%c19_123, %c0_124] : memref<48x16xbf16, #tpu.memory_space<vmem>>, vector<24x16xbf16>
    %128 = tpu.concatenate %119, %120, %121, %122, %123, %124, %125, %126, %127 in 1 : vector<24x16xbf16>, vector<24x16xbf16>, vector<24x16xbf16>, vector<24x16xbf16>, vector<24x16xbf16>, vector<24x16xbf16>, vector<24x16xbf16>, vector<24x16xbf16>, vector<24x16xbf16> -> vector<24x144xbf16>
    %c4 = arith.constant 4 : index
    %c0_125 = arith.constant 0 : index
    %c0_126 = arith.constant 0 : index
    %129 = vector.load %arg2[%c4, %c0_125, %c0_126] : memref<8x144x16xbf16, #tpu.memory_space<vmem>>, vector<1x144x16xbf16>
    %130 = vector.shape_cast %129 : vector<1x144x16xbf16> to vector<144x16xbf16>
    %cst_127 = arith.constant dense<0.000000e+00> : vector<24x16xf32>
    %131 = tpu.matmul %128, %130, %cst_127 {dimension_numbers = #tpu.dot_dimension_numbers<[1], [0], [0], [1], [0, 0, 1, 1], [], []>} : vector<24x144xbf16>, vector<144x16xbf16>, vector<24x16xf32> -> vector<24x16xf32>
    %c4_128 = arith.constant 4 : index
    %c0_129 = arith.constant 0 : index
    %c0_130 = arith.constant 0 : index
    %132 = vector.load %arg3[%c4_128, %c0_129, %c0_130] : memref<8x1x16xf32, #tpu.memory_space<vmem>>, vector<1x1x16xf32>
    %133 = vector.shape_cast %132 : vector<1x1x16xf32> to vector<1x16xf32>
    %134 = vector.broadcast %133 : vector<1x16xf32> to vector<24x16xf32>
    %135 = arith.addf %131, %134 : vector<24x16xf32>
    %cst_131 = arith.constant 1.000000e-01 : f32
    %136 = vector.broadcast %cst_131 : f32 to vector<24x16xf32>
    %137 = arith.mulf %136, %135 : vector<24x16xf32>
    %138 = arith.maximumf %135, %137 : vector<24x16xf32>
    %139 = arith.mulf %138, %26 : vector<24x16xf32>
    %140 = arith.truncf %139 : vector<24x16xf32> to vector<24x16xbf16>
    %c12_132 = arith.constant 12 : index
    %c0_133 = arith.constant 0 : index
    %141 = vector.load %arg7[%c12_132, %c0_133] : memref<48x16xbf16, #tpu.memory_space<vmem>>, vector<24x16xbf16>
    tpu.vector_store %arg7[%c12_132, %c0_133], %140 {strides = array<i32>} : memref<48x16xbf16, #tpu.memory_space<vmem>>, vector<24x16xbf16>,
    %c5_134 = arith.constant 5 : index
    %c0_135 = arith.constant 0 : index
    %142 = vector.load %arg7[%c5_134, %c0_135] : memref<48x16xbf16, #tpu.memory_space<vmem>>, vector<24x16xbf16>
    %c6_136 = arith.constant 6 : index
    %c0_137 = arith.constant 0 : index
    %143 = vector.load %arg7[%c6_136, %c0_137] : memref<48x16xbf16, #tpu.memory_space<vmem>>, vector<24x16xbf16>
    %c7_138 = arith.constant 7 : index
    %c0_139 = arith.constant 0 : index
    %144 = vector.load %arg7[%c7_138, %c0_139] : memref<48x16xbf16, #tpu.memory_space<vmem>>, vector<24x16xbf16>
    %c11_140 = arith.constant 11 : index
    %c0_141 = arith.constant 0 : index
    %145 = vector.load %arg7[%c11_140, %c0_141] : memref<48x16xbf16, #tpu.memory_space<vmem>>, vector<24x16xbf16>
    %c12_142 = arith.constant 12 : index
    %c0_143 = arith.constant 0 : index
    %146 = vector.load %arg7[%c12_142, %c0_143] : memref<48x16xbf16, #tpu.memory_space<vmem>>, vector<24x16xbf16>
    %c13_144 = arith.constant 13 : index
    %c0_145 = arith.constant 0 : index
    %147 = vector.load %arg7[%c13_144, %c0_145] : memref<48x16xbf16, #tpu.memory_space<vmem>>, vector<24x16xbf16>
    %c17_146 = arith.constant 17 : index
    %c0_147 = arith.constant 0 : index
    %148 = vector.load %arg7[%c17_146, %c0_147] : memref<48x16xbf16, #tpu.memory_space<vmem>>, vector<24x16xbf16>
    %c18_148 = arith.constant 18 : index
    %c0_149 = arith.constant 0 : index
    %149 = vector.load %arg7[%c18_148, %c0_149] : memref<48x16xbf16, #tpu.memory_space<vmem>>, vector<24x16xbf16>
    %c19_150 = arith.constant 19 : index
    %c0_151 = arith.constant 0 : index
    %150 = vector.load %arg7[%c19_150, %c0_151] : memref<48x16xbf16, #tpu.memory_space<vmem>>, vector<24x16xbf16>
    %151 = tpu.concatenate %142, %143, %144, %145, %146, %147, %148, %149, %150 in 1 : vector<24x16xbf16>, vector<24x16xbf16>, vector<24x16xbf16>, vector<24x16xbf16>, vector<24x16xbf16>, vector<24x16xbf16>, vector<24x16xbf16>, vector<24x16xbf16>, vector<24x16xbf16> -> vector<24x144xbf16>
    %c5_152 = arith.constant 5 : index
    %c0_153 = arith.constant 0 : index
    %c0_154 = arith.constant 0 : index
    %152 = vector.load %arg2[%c5_152, %c0_153, %c0_154] : memref<8x144x16xbf16, #tpu.memory_space<vmem>>, vector<1x144x16xbf16>
    %153 = vector.shape_cast %152 : vector<1x144x16xbf16> to vector<144x16xbf16>
    %cst_155 = arith.constant dense<0.000000e+00> : vector<24x16xf32>
    %154 = tpu.matmul %151, %153, %cst_155 {dimension_numbers = #tpu.dot_dimension_numbers<[1], [0], [0], [1], [0, 0, 1, 1], [], []>} : vector<24x144xbf16>, vector<144x16xbf16>, vector<24x16xf32> -> vector<24x16xf32>
    %c5_156 = arith.constant 5 : index
    %c0_157 = arith.constant 0 : index
    %c0_158 = arith.constant 0 : index
    %155 = vector.load %arg3[%c5_156, %c0_157, %c0_158] : memref<8x1x16xf32, #tpu.memory_space<vmem>>, vector<1x1x16xf32>
    %156 = vector.shape_cast %155 : vector<1x1x16xf32> to vector<1x16xf32>
    %157 = vector.broadcast %156 : vector<1x16xf32> to vector<24x16xf32>
    %158 = arith.addf %154, %157 : vector<24x16xf32>
    %cst_159 = arith.constant 1.000000e-01 : f32
    %159 = vector.broadcast %cst_159 : f32 to vector<24x16xf32>
    %160 = arith.mulf %159, %158 : vector<24x16xf32>
    %161 = arith.maximumf %158, %160 : vector<24x16xf32>
    %162 = arith.mulf %161, %26 : vector<24x16xf32>
    %163 = arith.truncf %162 : vector<24x16xf32> to vector<24x16xbf16>
    %c12_160 = arith.constant 12 : index
    %c0_161 = arith.constant 0 : index
    %164 = vector.load %arg7[%c12_160, %c0_161] : memref<48x16xbf16, #tpu.memory_space<vmem>>, vector<24x16xbf16>
    tpu.vector_store %arg7[%c12_160, %c0_161], %163 {strides = array<i32>} : memref<48x16xbf16, #tpu.memory_space<vmem>>, vector<24x16xbf16>,
    %c5_162 = arith.constant 5 : index
    %c0_163 = arith.constant 0 : index
    %165 = vector.load %arg7[%c5_162, %c0_163] : memref<48x16xbf16, #tpu.memory_space<vmem>>, vector<24x16xbf16>
    %c6_164 = arith.constant 6 : index
    %c0_165 = arith.constant 0 : index
    %166 = vector.load %arg7[%c6_164, %c0_165] : memref<48x16xbf16, #tpu.memory_space<vmem>>, vector<24x16xbf16>
    %c7_166 = arith.constant 7 : index
    %c0_167 = arith.constant 0 : index
    %167 = vector.load %arg7[%c7_166, %c0_167] : memref<48x16xbf16, #tpu.memory_space<vmem>>, vector<24x16xbf16>
    %c11_168 = arith.constant 11 : index
    %c0_169 = arith.constant 0 : index
    %168 = vector.load %arg7[%c11_168, %c0_169] : memref<48x16xbf16, #tpu.memory_space<vmem>>, vector<24x16xbf16>
    %c12_170 = arith.constant 12 : index
    %c0_171 = arith.constant 0 : index
    %169 = vector.load %arg7[%c12_170, %c0_171] : memref<48x16xbf16, #tpu.memory_space<vmem>>, vector<24x16xbf16>
    %c13_172 = arith.constant 13 : index
    %c0_173 = arith.constant 0 : index
    %170 = vector.load %arg7[%c13_172, %c0_173] : memref<48x16xbf16, #tpu.memory_space<vmem>>, vector<24x16xbf16>
    %c17_174 = arith.constant 17 : index
    %c0_175 = arith.constant 0 : index
    %171 = vector.load %arg7[%c17_174, %c0_175] : memref<48x16xbf16, #tpu.memory_space<vmem>>, vector<24x16xbf16>
    %c18_176 = arith.constant 18 : index
    %c0_177 = arith.constant 0 : index
    %172 = vector.load %arg7[%c18_176, %c0_177] : memref<48x16xbf16, #tpu.memory_space<vmem>>, vector<24x16xbf16>
    %c19_178 = arith.constant 19 : index
    %c0_179 = arith.constant 0 : index
    %173 = vector.load %arg7[%c19_178, %c0_179] : memref<48x16xbf16, #tpu.memory_space<vmem>>, vector<24x16xbf16>
    %174 = tpu.concatenate %165, %166, %167, %168, %169, %170, %171, %172, %173 in 1 : vector<24x16xbf16>, vector<24x16xbf16>, vector<24x16xbf16>, vector<24x16xbf16>, vector<24x16xbf16>, vector<24x16xbf16>, vector<24x16xbf16>, vector<24x16xbf16>, vector<24x16xbf16> -> vector<24x144xbf16>
    %c6_180 = arith.constant 6 : index
    %c0_181 = arith.constant 0 : index
    %c0_182 = arith.constant 0 : index
    %175 = vector.load %arg2[%c6_180, %c0_181, %c0_182] : memref<8x144x16xbf16, #tpu.memory_space<vmem>>, vector<1x144x16xbf16>
    %176 = vector.shape_cast %175 : vector<1x144x16xbf16> to vector<144x16xbf16>
    %cst_183 = arith.constant dense<0.000000e+00> : vector<24x16xf32>
    %177 = tpu.matmul %174, %176, %cst_183 {dimension_numbers = #tpu.dot_dimension_numbers<[1], [0], [0], [1], [0, 0, 1, 1], [], []>} : vector<24x144xbf16>, vector<144x16xbf16>, vector<24x16xf32> -> vector<24x16xf32>
    %c6_184 = arith.constant 6 : index
    %c0_185 = arith.constant 0 : index
    %c0_186 = arith.constant 0 : index
    %178 = vector.load %arg3[%c6_184, %c0_185, %c0_186] : memref<8x1x16xf32, #tpu.memory_space<vmem>>, vector<1x1x16xf32>
    %179 = vector.shape_cast %178 : vector<1x1x16xf32> to vector<1x16xf32>
    %180 = vector.broadcast %179 : vector<1x16xf32> to vector<24x16xf32>
    %181 = arith.addf %177, %180 : vector<24x16xf32>
    %cst_187 = arith.constant 1.000000e-01 : f32
    %182 = vector.broadcast %cst_187 : f32 to vector<24x16xf32>
    %183 = arith.mulf %182, %181 : vector<24x16xf32>
    %184 = arith.maximumf %181, %183 : vector<24x16xf32>
    %185 = arith.mulf %184, %26 : vector<24x16xf32>
    %186 = arith.truncf %185 : vector<24x16xf32> to vector<24x16xbf16>
    %c12_188 = arith.constant 12 : index
    %c0_189 = arith.constant 0 : index
    %187 = vector.load %arg7[%c12_188, %c0_189] : memref<48x16xbf16, #tpu.memory_space<vmem>>, vector<24x16xbf16>
    tpu.vector_store %arg7[%c12_188, %c0_189], %186 {strides = array<i32>} : memref<48x16xbf16, #tpu.memory_space<vmem>>, vector<24x16xbf16>,
    %c5_190 = arith.constant 5 : index
    %c0_191 = arith.constant 0 : index
    %188 = vector.load %arg7[%c5_190, %c0_191] : memref<48x16xbf16, #tpu.memory_space<vmem>>, vector<24x16xbf16>
    %c6_192 = arith.constant 6 : index
    %c0_193 = arith.constant 0 : index
    %189 = vector.load %arg7[%c6_192, %c0_193] : memref<48x16xbf16, #tpu.memory_space<vmem>>, vector<24x16xbf16>
    %c7_194 = arith.constant 7 : index
    %c0_195 = arith.constant 0 : index
    %190 = vector.load %arg7[%c7_194, %c0_195] : memref<48x16xbf16, #tpu.memory_space<vmem>>, vector<24x16xbf16>
    %c11_196 = arith.constant 11 : index
    %c0_197 = arith.constant 0 : index
    %191 = vector.load %arg7[%c11_196, %c0_197] : memref<48x16xbf16, #tpu.memory_space<vmem>>, vector<24x16xbf16>
    %c12_198 = arith.constant 12 : index
    %c0_199 = arith.constant 0 : index
    %192 = vector.load %arg7[%c12_198, %c0_199] : memref<48x16xbf16, #tpu.memory_space<vmem>>, vector<24x16xbf16>
    %c13_200 = arith.constant 13 : index
    %c0_201 = arith.constant 0 : index
    %193 = vector.load %arg7[%c13_200, %c0_201] : memref<48x16xbf16, #tpu.memory_space<vmem>>, vector<24x16xbf16>
    %c17_202 = arith.constant 17 : index
    %c0_203 = arith.constant 0 : index
    %194 = vector.load %arg7[%c17_202, %c0_203] : memref<48x16xbf16, #tpu.memory_space<vmem>>, vector<24x16xbf16>
    %c18_204 = arith.constant 18 : index
    %c0_205 = arith.constant 0 : index
    %195 = vector.load %arg7[%c18_204, %c0_205] : memref<48x16xbf16, #tpu.memory_space<vmem>>, vector<24x16xbf16>
    %c19_206 = arith.constant 19 : index
    %c0_207 = arith.constant 0 : index
    %196 = vector.load %arg7[%c19_206, %c0_207] : memref<48x16xbf16, #tpu.memory_space<vmem>>, vector<24x16xbf16>
    %197 = tpu.concatenate %188, %189, %190, %191, %192, %193, %194, %195, %196 in 1 : vector<24x16xbf16>, vector<24x16xbf16>, vector<24x16xbf16>, vector<24x16xbf16>, vector<24x16xbf16>, vector<24x16xbf16>, vector<24x16xbf16>, vector<24x16xbf16>, vector<24x16xbf16> -> vector<24x144xbf16>
    %c7_208 = arith.constant 7 : index
    %c0_209 = arith.constant 0 : index
    %c0_210 = arith.constant 0 : index
    %198 = vector.load %arg2[%c7_208, %c0_209, %c0_210] : memref<8x144x16xbf16, #tpu.memory_space<vmem>>, vector<1x144x16xbf16>
    %199 = vector.shape_cast %198 : vector<1x144x16xbf16> to vector<144x16xbf16>
    %cst_211 = arith.constant dense<0.000000e+00> : vector<24x16xf32>
    %200 = tpu.matmul %197, %199, %cst_211 {dimension_numbers = #tpu.dot_dimension_numbers<[1], [0], [0], [1], [0, 0, 1, 1], [], []>} : vector<24x144xbf16>, vector<144x16xbf16>, vector<24x16xf32> -> vector<24x16xf32>
    %c7_212 = arith.constant 7 : index
    %c0_213 = arith.constant 0 : index
    %c0_214 = arith.constant 0 : index
    %201 = vector.load %arg3[%c7_212, %c0_213, %c0_214] : memref<8x1x16xf32, #tpu.memory_space<vmem>>, vector<1x1x16xf32>
    %202 = vector.shape_cast %201 : vector<1x1x16xf32> to vector<1x16xf32>
    %203 = vector.broadcast %202 : vector<1x16xf32> to vector<24x16xf32>
    %204 = arith.addf %200, %203 : vector<24x16xf32>
    %cst_215 = arith.constant 1.000000e-01 : f32
    %205 = vector.broadcast %cst_215 : f32 to vector<24x16xf32>
    %206 = arith.mulf %205, %204 : vector<24x16xf32>
    %207 = arith.maximumf %204, %206 : vector<24x16xf32>
    %208 = arith.mulf %207, %26 : vector<24x16xf32>
    %c0_216 = arith.constant 0 : index
    %c12_217 = arith.constant 12 : index
    %c0_218 = arith.constant 0 : index
    %209 = vector.load %arg1[%c0_216, %c12_217, %c0_218] : memref<1x48x16xbf16, #tpu.memory_space<vmem>>, vector<1x24x16xbf16>
    %210 = vector.shape_cast %209 : vector<1x24x16xbf16> to vector<24x16xbf16>
    %211 = arith.extf %210 : vector<24x16xbf16> to vector<24x16xf32>
    %212 = arith.addf %208, %211 : vector<24x16xf32>
    %213 = arith.truncf %212 : vector<24x16xf32> to vector<24x16xbf16>
    %c12_219 = arith.constant 12 : index
    %c0_220 = arith.constant 0 : index
    %214 = vector.load %arg7[%c12_219, %c0_220] : memref<48x16xbf16, #tpu.memory_space<vmem>>, vector<24x16xbf16>
    tpu.vector_store %arg7[%c12_219, %c0_220], %213 {strides = array<i32>} : memref<48x16xbf16, #tpu.memory_space<vmem>>, vector<24x16xbf16>,
    %c5_221 = arith.constant 5 : index
    %c0_222 = arith.constant 0 : index
    %215 = vector.load %arg7[%c5_221, %c0_222] : memref<48x16xbf16, #tpu.memory_space<vmem>>, vector<24x16xbf16>
    %c6_223 = arith.constant 6 : index
    %c0_224 = arith.constant 0 : index
    %216 = vector.load %arg7[%c6_223, %c0_224] : memref<48x16xbf16, #tpu.memory_space<vmem>>, vector<24x16xbf16>
    %c7_225 = arith.constant 7 : index
    %c0_226 = arith.constant 0 : index
    %217 = vector.load %arg7[%c7_225, %c0_226] : memref<48x16xbf16, #tpu.memory_space<vmem>>, vector<24x16xbf16>
    %c11_227 = arith.constant 11 : index
    %c0_228 = arith.constant 0 : index
    %218 = vector.load %arg7[%c11_227, %c0_228] : memref<48x16xbf16, #tpu.memory_space<vmem>>, vector<24x16xbf16>
    %c12_229 = arith.constant 12 : index
    %c0_230 = arith.constant 0 : index
    %219 = vector.load %arg7[%c12_229, %c0_230] : memref<48x16xbf16, #tpu.memory_space<vmem>>, vector<24x16xbf16>
    %c13_231 = arith.constant 13 : index
    %c0_232 = arith.constant 0 : index
    %220 = vector.load %arg7[%c13_231, %c0_232] : memref<48x16xbf16, #tpu.memory_space<vmem>>, vector<24x16xbf16>
    %c17_233 = arith.constant 17 : index
    %c0_234 = arith.constant 0 : index
    %221 = vector.load %arg7[%c17_233, %c0_234] : memref<48x16xbf16, #tpu.memory_space<vmem>>, vector<24x16xbf16>
    %c18_235 = arith.constant 18 : index
    %c0_236 = arith.constant 0 : index
    %222 = vector.load %arg7[%c18_235, %c0_236] : memref<48x16xbf16, #tpu.memory_space<vmem>>, vector<24x16xbf16>
    %c19_237 = arith.constant 19 : index
    %c0_238 = arith.constant 0 : index
    %223 = vector.load %arg7[%c19_237, %c0_238] : memref<48x16xbf16, #tpu.memory_space<vmem>>, vector<24x16xbf16>
    %224 = tpu.concatenate %215, %216, %217, %218, %219, %220, %221, %222, %223 in 1 : vector<24x16xbf16>, vector<24x16xbf16>, vector<24x16xbf16>, vector<24x16xbf16>, vector<24x16xbf16>, vector<24x16xbf16>, vector<24x16xbf16>, vector<24x16xbf16>, vector<24x16xbf16> -> vector<24x144xbf16>
    %c0_239 = arith.constant 0 : index
    %c0_240 = arith.constant 0 : index
    %225 = vector.load %arg4[%c0_239, %c0_240] : memref<144x12xbf16, #tpu.memory_space<vmem>>, vector<144x12xbf16>
    %cst_241 = arith.constant dense<0.000000e+00> : vector<24x12xf32>
    %226 = tpu.matmul %224, %225, %cst_241 {dimension_numbers = #tpu.dot_dimension_numbers<[1], [0], [0], [1], [0, 0, 1, 1], [], []>} : vector<24x144xbf16>, vector<144x12xbf16>, vector<24x12xf32> -> vector<24x12xf32>
    %c0_242 = arith.constant 0 : index
    %c0_243 = arith.constant 0 : index
    %227 = vector.load %arg5[%c0_242, %c0_243] : memref<1x12xf32, #tpu.memory_space<vmem>>, vector<1x12xf32>
    %228 = vector.broadcast %227 : vector<1x12xf32> to vector<24x12xf32>
    %229 = arith.addf %226, %228 : vector<24x12xf32>
    %c0_244 = arith.constant 0 : index
    %c0_245 = arith.constant 0 : index
    %c0_246 = arith.constant 0 : index
    %230 = vector.load %arg6[%c0_244, %c0_245, %c0_246] : memref<1x24x12xf32, #tpu.memory_space<vmem>>, vector<1x24x12xf32>
    %231 = vector.shape_cast %230 : vector<1x24x12xf32> to vector<24x12xf32>
    %232 = vector.shape_cast %229 : vector<24x12xf32> to vector<1x24x12xf32>
    tpu.vector_store %arg6[%c0_244, %c0_245, %c0_246], %232 {strides = array<i32>} : memref<1x24x12xf32, #tpu.memory_space<vmem>>, vector<1x24x12xf32>,
    return
  }
  func.func @transform_0(%arg0: i32) -> (i32, i32, i32) {
    %c0_i32 = arith.constant 0 : i32
    %c0_i32_0 = arith.constant 0 : i32
    %c0_i32_1 = arith.constant 0 : i32
    return %arg0, %c0_i32, %c0_i32_0 : i32, i32, i32
  }
  func.func @transform_1(%arg0: i32) -> (i32, i32, i32) {
    %c0_i32 = arith.constant 0 : i32
    %c0_i32_0 = arith.constant 0 : i32
    %c0_i32_1 = arith.constant 0 : i32
    %c0_i32_2 = arith.constant 0 : i32
    return %c0_i32, %c0_i32_0, %c0_i32_1 : i32, i32, i32
  }
  func.func @transform_2(%arg0: i32) -> (i32, i32, i32) {
    %c0_i32 = arith.constant 0 : i32
    %c0_i32_0 = arith.constant 0 : i32
    %c0_i32_1 = arith.constant 0 : i32
    %c0_i32_2 = arith.constant 0 : i32
    return %c0_i32, %c0_i32_0, %c0_i32_1 : i32, i32, i32
  }
  func.func @transform_3(%arg0: i32) -> (i32, i32) {
    %c0_i32 = arith.constant 0 : i32
    %c0_i32_0 = arith.constant 0 : i32
    %c0_i32_1 = arith.constant 0 : i32
    return %c0_i32, %c0_i32_0 : i32, i32
  }
  func.func @transform_4(%arg0: i32) -> (i32, i32) {
    %c0_i32 = arith.constant 0 : i32
    %c0_i32_0 = arith.constant 0 : i32
    %c0_i32_1 = arith.constant 0 : i32
    return %c0_i32, %c0_i32_0 : i32, i32
  }
  func.func @transform_5(%arg0: i32) -> (i32, i32, i32) {
    %c0_i32 = arith.constant 0 : i32
    %c0_i32_0 = arith.constant 0 : i32
    %c0_i32_1 = arith.constant 0 : i32
    return %arg0, %c0_i32, %c0_i32_0 : i32, i32, i32
  }
}

</mosaic_0001>

<bundles_post_ra>
// kernel: idepth_block_forward.3
= control target key start
LH: loop header
LB: loop body
LE: loop exit
PB: predicated region body
PF: predicated region fallthrough
CT: control target
= control target key end

     0   :  { %s791_s12 = smov 0   ;;  %s975_s0 = inlined_call_operand.vmem [shape: bf16[2,90,20], index: 0, kind: input, shape index: {}]   ;;  %s976_s1 = inlined_call_operand.vmem [shape: bf16[80,8], index: 1, kind: input, shape index: {}]   ;;  %s977_s2 = inlined_call_operand.vmem [shape: f32[1,8], index: 2, kind: input, shape index: {}]   ;;  %s978_s3 = inlined_call_operand.vmem [shape: bf16[2,72,8], index: 3, kind: output, shape index: {}]  }
   0x1 LB: > { %s626_s13 = sadd.s32 4294967295, %s764_s12   ;;  %p630_p0 = scmp.ge.s32.totalorder %s764_s12, 1  ;;  %s764_s12 = sphi %s791_s12, %s13_s12  }
   0x2   : > { %p137_p1 = scmp.lt.s32.totalorder %s764_s12, 3 }
   0x4   : > { %p138_p2 = pnand %p630_p0, %p137_p1 }
   0x5   : > { %p161_p3 = scmp.lt.s32.totalorder (!%p138_p2), %s626_s13, 1  ;;  %v766_v0 = vmov (!%p138_p2), 0.0   ;;  %v752_v1 = vld [vmem:[%s976_s1] sm:$0xff] (!%p138_p2)   ;;  %v753_v2 = vld [vmem:[%s976_s1 + $0x8] sm:$0xff] (!%p138_p2)   ;;  %vm322_vm0 = vcmask (!%p138_p2), 1046528   ;;  %v754_v3 = vld [vmem:[%s976_s1 + $0x10] sm:$0xff] (!%p138_p2)  }
   0x6   : > { %141 = sbr.rel (%p138_p2) target bundleno = 391 (0x187), region = 32  ;;  %686 = vmatprep.subr.bf16.mxu0 (!%p138_p2), %v766_v0  ;;  %716 = vmatprep.subr.bf16.mxu1 (!%p138_p2), %v766_v0  ;;  %vm211_vm1 = vsmask.f32 (!%p138_p2), 7424  ;;  %v755_v32 = vld [vmem:[%s976_s1 + $0x18] sm:$0xff] (!%p138_p2)   ;;  %s767_s26 = smov (!%p138_p2), 60   ;;  %v756_v50 = vld [vmem:[%s976_s1 + $0x20] sm:$0xff] (!%p138_p2)  }
   0x7   : > { %687 = vmatpush3.bf16.msra.mxu0 (!%p138_p2), %v752_v1  ;;  %721 = vmatpush3.bf16.msra.mxu1 (!%p138_p2), %v752_v1  ;;  %s768_s29 = smov (!%p138_p2), 20   ;;  %s769_s30 = smov (!%p138_p2), 40   ;;  %vm770_vm2 = vmmov (!%p138_p2), 0   ;;  %vm342_vm3 = vcmask (!%p138_p2), 162816   ;;  %vm354_vm4 = vcmask (!%p138_p2), 326656   ;;  %vm365_vm5 = vcmask (!%p138_p2), 490496  }
   0x8   : > { %688 = vmatprep.subr.bf16.mxu0 (!%p138_p2), %v766_v0  ;;  %717 = vmatprep.subr.bf16.mxu1 (!%p138_p2), %v766_v0  ;;  %vm423_vm6 = vcmask (!%p138_p2), 654336   ;;  %vm561_vm7 = vcmask (!%p138_p2), 60416  }
   0x9   : > { %696 = vmatprep.mubr.msk.bf16.mxu0 (!%p138_p2), %vm770_vm2, %v766_v0  ;;  %708 = vmatprep.mubr.msk.bf16.mxu1 (!%p138_p2), %vm770_vm2, %v766_v0 }
   0xb   : > { %689 = vmatpush3.bf16.msra.mxu0 (!%p138_p2), %v753_v2  ;;  %722 = vmatpush3.bf16.msra.mxu1 (!%p138_p2), %v753_v2 }
   0xc   : > { %690 = vmatprep.subr.bf16.mxu0 (!%p138_p2), %v766_v0  ;;  %718 = vmatprep.subr.bf16.mxu1 (!%p138_p2), %v766_v0 }
   0xd   : > { %s980_s13 = smov (!%p161_p3, %s626_s13), 1 }
   0xe   : > { %s726_s16 = smul.u32 48, %s980_s13 }
   0xf   : > { %691 = vmatpush3.bf16.msra.mxu0 %v754_v3  ;;  %723 = vmatpush3.bf16.msra.mxu1 %v754_v3  ;;  %s727_s6 = smul.u32 36, %s980_s13 }
  0x10   : > { %s815_s21 = scalar_lea.vmem %s975_s0, %s726_s16  ;;  %692 = vmatprep.subr.bf16.mxu0 %v766_v0  ;;  %719 = vmatprep.subr.bf16.mxu1 %v766_v0 }
  0x11   : > { %v175_v4 = vld [vmem:[%s815_s21 + $0xc] sm:$0xf]  ;;  %v176_v5 = vld [vmem:[%s815_s21 + $0x10] sm:$0xf]  ;;  %v177_v6 = vld [vmem:[%s815_s21 + $0x14] sm:$0xf]  ;;  %s952_s9 = scalar_lea.vmem %s978_s3, %s727_s6 }
  0x12   : > { %v178_v7 = vld [vmem:[%s815_s21 + $0x18] sm:$0xf]  ;;  %v179_v8 = vld [vmem:[%s815_s21 + $0x1c] sm:$0xf]  ;;  %v825_v9 = vcombine.low %v175_v4, %v176_v5  ;;  %v174_v10 = vld [vmem:[%s815_s21 + $0x8] sm:$0xf]  ;;  %v828_v11 = vcombine.low %v176_v5, %v177_v6 }
  0x13   : > { %v830_v12 = vcombine.low %v178_v7, %v179_v8  ;;  %v832_v13 = vcombine.low %v177_v6, %v178_v7  ;;  %v184_v14 = vld [vmem:[%s815_s21 + $0x4] sm:$0xe]  ;;  %v172_v15 = vld [vmem:[%s815_s21] sm:$0xf]  ;;  %v837_v17 = vcombine.low %v174_v10, %v175_v4  ;;  %v181_v23 = vld [vmem:[%s815_s21 + $0x24] sm:$0x1]  ;;  %693 = vmatpush3.bf16.msra.mxu0 %v755_v32  ;;  %724 = vmatpush3.bf16.msra.mxu1 %v755_v32 }
  0x14   : > { %v173_v16 = vld [vmem:[%s815_s21 + $0x4] sm:$0xf]  ;;  %v324_v18 = vrot.slane %v825_v9, 1  ;;  %v644_v19 = vcombine.low %v184_v14, %v174_v10  ;;  %v845_v22 = vld [vmem:[%s815_s21 + $0x20] sm:$0xf]  ;;  %v228_v27 = vshll.u32 %v828_v11, 16  ;;  %694 = vmatprep.subr.bf16.mxu0 %v766_v0  ;;  %720 = vmatprep.subr.bf16.mxu1 %v766_v0 }
  0x15   : > { %v842_v20 = vcombine.low %v172_v15, %v173_v16  ;;  %v639_v21 = vcombine.low %v173_v16, %v174_v10  ;;  %v326_v24 = vrot.slane %v832_v13, 1  ;;  %v220_v25 = vshll.u32 %v837_v17, 16  ;;  %v865_v37 = vld [vmem:[%s815_s21 + $0x24] sm:$0x1f]  }
  0x16   : > { %v224_v26 = vshrl.u32 %v837_v17, 16  ;;  %v323_v28 = vrot.slane %v644_v19, 1  ;;  %v855_v31 = vcombine.low %v845_v22, %v181_v23  ;;  %v230_v35 = vrot.slane %v228_v27, 1 }
  0x17   : > { %v213_v29 = vshrl.u32 %v842_v20, 16  ;;  %v215_v30 = vshll.u32 %v842_v20, 16  ;;  %v327_v33 = vsel %vm322_vm0, %v324_v18, %v326_v24  ;;  %v222_v34 = vrot.slane %v220_v25, 1  ;;  %695 = vmatpush3.bf16.msra.mxu0 %v756_v50  ;;  %725 = vmatpush3.bf16.msra.mxu1 %v756_v50 }
  0x18   : > { %v236_v36 = vshll.u32 %v830_v12, 16  ;;  %334 = vrot.lane.b32.xlu0 %v327_v33, %s767_s26  ;;  %v325_v38 = vsel %vm322_vm0, %v323_v28, %v324_v18  ;;  %v240_v40 = vshrl.u32 %v830_v12, 16  ;;  %v244_v41 = vshll.u32 %v855_v31, 16 }
  0x19   : > { %v217_v39 = vrot.slane %v215_v30, 1  ;;  %332 = vrot.lane.b32.xlu1 %v325_v38, %s767_s26  ;;  %v226_v42 = vor.u32 %v224_v26, %v222_v34  ;;  %v271_v44 = vshrl.u32 %v639_v21, 16  ;;  %v273_v45 = vshll.u32 %v639_v21, 16 }
  0x1a   : > { %v238_v43 = vrot.slane %v236_v36, 1  ;;  %v246_v47 = vrot.slane %v244_v41, 1  ;;  %v278_v48 = vshll.u32 %v825_v9, 16  ;;  %v642_v49 = vcombine.low %v179_v8, %v845_v22 }
  0x1b   : > { %v218_v46 = vor.u32 %v217_v39, %v213_v29  ;;  %v231_v51 = vsel %vm211_vm1, %v226_v42, %v230_v35  ;;  %v275_v53 = vrot.slane %v273_v45, 1  ;;  %v302_v54 = vshll.u32 %v865_v37, 16 }
  0x1c   : > { %v242_v52 = vor.u32 %v240_v40, %v238_v43  ;;  %v280_v56 = vrot.slane %v278_v48, 1  ;;  %v294_v57 = vshll.u32 %v642_v49, 16  ;;  %v298_v58 = vshrl.u32 %v642_v49, 16 }
  0x1d   : > { %v223_v55 = vsel %vm211_vm1, %v218_v46, %v222_v34  ;;  %253 = vrot.lane.b32.xlu1 %v231_v51, %s768_s29  ;;  %v276_v60 = vor.u32 %v275_v53, %v271_v44  ;;  %v304_v61 = vrot.slane %v302_v54, 1  ;;  %v328_v62 = vrot.slane %v642_v49, 1 }
  0x1e   : > { %251 = vrot.lane.b32.xlu0 %v223_v55, %s768_s29  ;;  %v247_v59 = vsel %vm211_vm1, %v242_v52, %v246_v47  ;;  %v296_v63 = vrot.slane %v294_v57, 1  ;;  %v330_v1 = vrot.slane %v865_v37, 1  ;;  %v232_v2 = vshrl.u32 %v828_v11, 16 }
  0x1f   : > { %v282_v3 = vshrl.u32 %v825_v9, 16  ;;  %v281_v4 = vsel %vm211_vm1, %v276_v60, %v280_v56  ;;  %v286_v5 = vshll.u32 %v832_v13, 16  ;;  %v290_v10 = vshrl.u32 %v832_v13, 16 }
  0x20   : > { %v300_v6 = vor.u32 %v298_v58, %v296_v63  ;;  %v331_v7 = vsel %vm322_vm0, %v328_v62, %v330_v1  ;;  %v234_v8 = vor.u32 %v232_v2, %v230_v35  ;;  %v248_v16 = vshrl.u32 %v855_v31, 16 }
  0x21   : > { %257 = vrot.lane.b32.xlu1 %v247_v59, %s768_s29  ;;  %v284_v15 = vor.u32 %v282_v3, %v280_v56  ;;  %v288_v9 = vrot.slane %v286_v5, 1  ;;  %v306_v25 = vshrl.u32 %v865_v37, 16  ;;  %v329_v28 = vsel %vm322_vm0, %v326_v24, %v328_v62 }
  0x22   : > { %309 = vrot.lane.b32.xlu0 %v281_v4, %s769_s30  ;;  %v305_v14 = vsel %vm211_vm1, %v300_v6, %v304_v61  ;;  %v239_v18 = vsel %vm211_vm1, %v234_v8, %v238_v43  ;;  %v250_v23 = vor.u32 %v248_v16, %v246_v47 }
  0x23   : > { %v289_v19 = vsel %vm211_vm1, %v284_v15, %v288_v9  ;;  %v292_v21 = vor.u32 %v290_v10, %v288_v9  ;;  %v308_v27 = vor.u32 %v306_v25, %v304_v61 }
  0x25   : > { %315 = vrot.lane.b32.xlu1 %v305_v14, %s769_s30  ;;  %v297_v26 = vsel %vm211_vm1, %v292_v21, %v296_v63 }
  0x26   : > { %338 = vrot.lane.b32.xlu0 %v331_v7, %s767_s26 }
  0x29   : > { %255 = vrot.lane.b32.xlu1 %v239_v18, %s768_s29 }
  0x2a   : > { %311 = vrot.lane.b32.xlu0 %v289_v19, %s769_s30 }
  0x2d   : > { %259 = vrot.lane.b32.xlu1 %v250_v23, %s768_s29 }
  0x2e   : > { %313 = vrot.lane.b32.xlu0 %v297_v26, %s769_s30 }
  0x31   : > { %317 = vrot.lane.b32.xlu1 %v308_v27, %s769_s30 }
  0x32   : > { %336 = vrot.lane.b32.xlu0 %v329_v28, %s767_s26 }
  0x36   : > { %340 = vrot.lane.b32.xlu0 %v330_v1, %s767_s26 }
  0x8a   : > { %v335_v29 = vpop.permute.xlu0 %334 }
  0x8b   : > { %v333_v30 = vpop.permute.xlu1 %332 }
  0x8f   : > { %v254_v31 = vpop.permute.xlu1 %253 }
  0x90   : > { %v252_v32 = vpop.permute.xlu0 %251  ;;  %v346_v40 = vsel %vm342_vm3, %v837_v17, %v254_v31  ;;  %v637_v17 = vcombine.low %v845_v22, %v845_v22 }
  0x91   : > { %v344_v33 = vsel %vm342_vm3, %v842_v20, %v252_v32 }
  0x93   : > { %v258_v34 = vpop.permute.xlu1 %257 }
  0x94   : > { %v310_v35 = vpop.permute.xlu0 %309  ;;  %v350_v24 = vsel %vm342_vm3, %v830_v12, %v258_v34 }
  0x95   : > { %v356_v13 = vsel %vm354_vm4, %v344_v33, %v310_v35 }
  0x96   : > { %v367_v36 = vsel %vm365_vm5, %v356_v13, %v333_v30 }
  0x97   : > { %697 = vmatmul.mubr.msk.bf16.vlgmr.msra.gmra.mrb[0].mxu0 %vm423_vm6, %v367_v36  ;;  %v316_v37 = vpop.permute.xlu1 %315 }
  0x98   : > { %v339_v38 = vpop.permute.xlu0 %338  ;;  %700 = vmatprep.mubr.msk.bf16.mxu0 %vm770_vm2, %v766_v0  ;;  %v362_v39 = vsel %vm354_vm4, %v350_v24, %v316_v37 }
  0x99   : > { %v373_v20 = vsel %vm365_vm5, %v362_v39, %v339_v38 }
  0x9a   : > { %709 = vmatmul.mubr.msk.bf16.vlgmr.msra.gmra.mrb[0].mxu1 %vm423_vm6, %v373_v20 }
  0x9b   : > { %v256_v41 = vpop.permute.xlu1 %255  ;;  %712 = vmatprep.mubr.msk.bf16.mxu1 %vm770_vm2, %v766_v0 }
  0x9c   : > { %v312_v12 = vpop.permute.xlu0 %311  ;;  %v348_v46 = vsel %vm342_vm3, %v828_v11, %v256_v41  ;;  %v645_v11 = vld [vmem:[%s977_s2] ss:$0 sm:$0xff] }
  0x9d   : > { %v358_v42 = vsel %vm354_vm4, %v346_v40, %v312_v12 }
  0x9e   : > { %v369_v43 = vsel %vm365_vm5, %v358_v42, %v335_v29 }
  0x9f   : > { %701 = vmatmul.mubr.msk.bf16.gmra.mrb[4].mxu0 %vm423_vm6, %v369_v43  ;;  %v260_v44 = vpop.permute.xlu1 %259 }
  0xa0   : > { %v314_v45 = vpop.permute.xlu0 %313  ;;  %704 = vmatprep.mubr.msk.bf16.mxu0 %vm770_vm2, %v766_v0  ;;  %v353_v49 = vsel %vm342_vm3, %v637_v17, %v260_v44 }
  0xa1   : > { %v360_v47 = vsel %vm354_vm4, %v348_v46, %v314_v45 }
  0xa3   : > { %v318_v50 = vpop.permute.xlu1 %317 }
  0xa4   : > { %v337_v48 = vpop.permute.xlu0 %336  ;;  %v364_v52 = vsel %vm354_vm4, %v353_v49, %v318_v50 }
  0xa5   : > { %v371_v51 = vsel %vm365_vm5, %v360_v47, %v337_v48 }
  0xa7   : > { %705 = vmatmul.mubr.msk.bf16.gmra.mrb[8].mxu0 %vm423_vm6, %v371_v51 }
  0xa8   : > { %v341_v0 = vpop.permute.xlu0 %340 }
  0xa9   : > { %v375_v53 = vsel %vm365_vm5, %v364_v52, %v341_v0 }
  0xaa   : > { %713 = vmatmul.mubr.msk.bf16.gmra.mrb[4].mxu1 %vm423_vm6, %v375_v53 }
 0x16a   : > { %v468_v22 = vpop.f32.mrb[0].mxu0 }
 0x16b   : > { %v469_v54 = vadd.f32 %v645_v11, %v468_v22  ;;  %v698_v55 = vpop.f32.mrb[1].mxu0 }
 0x16c   : > { %v471_v56 = vpop.f32.mrb[2].mxu0 }
 0x16d   : > { %v506_v57 = vmul.f32 0.1, %v469_v54  ;;  %v472_v58 = vadd.f32 %v645_v11, %v471_v56  ;;  %v699_v59 = vpop.f32.mrb[3].mxu0  ;;  %v492_v60 = vpop.f32.mrb[0].mxu1 }
 0x16e   : > { %v493_v63 = vadd.f32 %v645_v11, %v492_v60  ;;  %v710_v1 = vpop.f32.mrb[1].mxu1 }
 0x16f   : > { %v515_v61 = vmax.f32 %v469_v54, %v506_v57  ;;  %v507_v62 = vmul.f32 0.1, %v472_v58  ;;  %v495_v2 = vpop.f32.mrb[2].mxu1 }
 0x170   : > { %v512_v5 = vmul.f32 0.1, %v493_v63  ;;  %v496_v6 = vadd.f32 %v645_v11, %v495_v2  ;;  %v711_v7 = vpop.f32.mrb[3].mxu1 }
 0x171   : > { %v667_v3 = vpack.c.bf16 %v515_v61, %v515_v61  ;;  %v516_v4 = vmax.f32 %v472_v58, %v507_v62 }
 0x172   : > { %v476_v8 = vpop.f32.mrb[4].mxu0  ;;  %v521_v14 = vmax.f32 %v493_v63, %v512_v5  ;;  %v513_v15 = vmul.f32 0.1, %v496_v6 }
 0x173   : > { %562 = vst.msk [vmem:[%s952_s9] sm:$0xf] %vm561_vm7, %v667_v3  ;;  %v668_v10 = vpack.c.bf16 %v516_v4, %v516_v4  ;;  %v477_v9 = vadd.f32 %v645_v11, %v476_v8  ;;  %v702_v16 = vpop.f32.mrb[5].mxu0 }
 0x174   : > { %v479_v18 = vpop.f32.mrb[6].mxu0  ;;  %v673_v19 = vpack.c.bf16 %v521_v14, %v521_v14  ;;  %v522_v21 = vmax.f32 %v496_v6, %v513_v15 }
 0x175   : > { %563 = vst.msk [vmem:[%s952_s9 + $0x4] sm:$0xf] %vm561_vm7, %v668_v10  ;;  %v508_v23 = vmul.f32 0.1, %v477_v9  ;;  %v480_v25 = vadd.f32 %v645_v11, %v479_v18  ;;  %v703_v26 = vpop.f32.mrb[7].mxu0 }
 0x176   : > { %568 = vst.msk [vmem:[%s952_s9 + $0x18] sm:$0xf] %vm561_vm7, %v673_v19  ;;  %v674_v27 = vpack.c.bf16 %v522_v21, %v522_v21 }
 0x177   : > { %v517_v28 = vmax.f32 %v477_v9, %v508_v23  ;;  %v509_v29 = vmul.f32 0.1, %v480_v25 }
 0x178   : > { %569 = vst.msk [vmem:[%s952_s9 + $0x1c] sm:$0xf] %vm561_vm7, %v674_v27 }
 0x179   : > { %v669_v30 = vpack.c.bf16 %v517_v28, %v517_v28  ;;  %v518_v31 = vmax.f32 %v480_v25, %v509_v29 }
 0x17a   : > { %v484_v32 = vpop.f32.mrb[8].mxu0 }
 0x17b   : > { %564 = vst.msk [vmem:[%s952_s9 + $0x8] sm:$0xf] %vm561_vm7, %v669_v30  ;;  %v670_v33 = vpack.c.bf16 %v518_v31, %v518_v31  ;;  %v485_v34 = vadd.f32 %v645_v11, %v484_v32  ;;  %v706_v35 = vpop.f32.mrb[9].mxu0 }
 0x17c   : > { %v487_v13 = vpop.f32.mrb[10].mxu0 }
 0x17d   : > { %565 = vst.msk [vmem:[%s952_s9 + $0xc] sm:$0xf] %vm561_vm7, %v670_v33  ;;  %v510_v24 = vmul.f32 0.1, %v485_v34  ;;  %v488_v36 = vadd.f32 %v645_v11, %v487_v13  ;;  %v707_v37 = vpop.f32.mrb[11].mxu0  ;;  %v500_v38 = vpop.f32.mrb[4].mxu1 }
 0x17e   : > { %v501_v39 = vadd.f32 %v645_v11, %v500_v38  ;;  %v714_v20 = vpop.f32.mrb[5].mxu1 }
 0x17f   : > { %v519_v40 = vmax.f32 %v485_v34, %v510_v24  ;;  %v511_v41 = vmul.f32 0.1, %v488_v36  ;;  %v503_v12 = vpop.f32.mrb[6].mxu1 }
 0x180   : > { %v514_v42 = vmul.f32 0.1, %v501_v39  ;;  %v715_v43 = vpop.f32.mrb[7].mxu1 }
 0x181   : > { %v671_v44 = vpack.c.bf16 %v519_v40, %v519_v40  ;;  %v520_v45 = vmax.f32 %v488_v36, %v511_v41 }
 0x182   : > { %v523_v46 = vmax.f32 %v501_v39, %v514_v42 }
 0x183   : > { %566 = vst.msk [vmem:[%s952_s9 + $0x10] sm:$0xf] %vm561_vm7, %v671_v44  ;;  %v672_v17 = vpack.c.bf16 %v520_v45, %v520_v45 }
 0x184   : > { %v675_v47 = vpack.c.bf16 %v523_v46, %v523_v46 }
 0x185   : > { %567 = vst.msk [vmem:[%s952_s9 + $0x14] sm:$0xf] %vm561_vm7, %v672_v17 }
 0x186   : > { %570 = vst.msk [vmem:[%s952_s9 + $0x20] sm:$0xf] %vm561_vm7, %v675_v47 }
 0x187 PF: > { %s13_s12 = sadd.s32 1, %s764_s12  }
 0x188   : > { %p10_p4 = scmp.ge.s32.totalorder %s13_s12, 4  }
 0x18a   :  { %12 = sbr.rel (!%p10_p4) target bundleno = 1 (0x1), region = 62 }

// kernel: idepth_block_forward.4
= control target key start
LH: loop header
LB: loop body
LE: loop exit
PB: predicated region body
PF: predicated region fallthrough
CT: control target
= control target key end

     0   :  { %s587_s12 = smov 0   ;;  %s645_s0 = inlined_call_operand.vmem [shape: bf16[2,30,32], index: 0, kind: input, shape index: {}]   ;;  %s646_s1 = inlined_call_operand.vmem [shape: bf16[128,16], index: 1, kind: input, shape index: {}]   ;;  %s647_s2 = inlined_call_operand.vmem [shape: f32[1,16], index: 2, kind: input, shape index: {}]   ;;  %s648_s3 = inlined_call_operand.vmem [shape: bf16[2,20,16], index: 3, kind: output, shape index: {}]  }
   0x1 LB: > { %s468_s13 = sadd.s32 4294967295, %s562_s12   ;;  %p472_p0 = scmp.ge.s32.totalorder %s562_s12, 1  ;;  %s562_s12 = sphi %s587_s12, %s13_s12  }
   0x2   : > { %p137_p1 = scmp.lt.s32.totalorder %s562_s12, 3 }
   0x4   : > { %p138_p2 = pnand %p472_p0, %p137_p1 }
   0x5   : > { %p161_p3 = scmp.lt.s32.totalorder (!%p138_p2), %s468_s13, 1  ;;  %v547_v0 = vld [vmem:[%s646_s1] sm:$0xff] (!%p138_p2)   ;;  %v548_v1 = vld [vmem:[%s646_s1 + $0x8] sm:$0xff] (!%p138_p2)   ;;  %v549_v2 = vld [vmem:[%s646_s1 + $0x10] sm:$0xff] (!%p138_p2)   ;;  %vm219_vm0 = vsmask.f32 (!%p138_p2), 5376 }
   0x6   : > { %141 = sbr.rel (%p138_p2) target bundleno = 373 (0x175), region = 32  ;;  %510 = vmatprep.subr.bf16.mxu0 (!%p138_p2), %v547_v0  ;;  %v550_v13 = vld [vmem:[%s646_s1 + $0x18] sm:$0xff] (!%p138_p2)   ;;  %v551_v28 = vld [vmem:[%s646_s1 + $0x20] sm:$0xff] (!%p138_p2)   ;;  %s564_s28 = smov (!%p138_p2), 64   ;;  %vm191_vm1 = vsmask.f32 (!%p138_p2), 7424 }
   0x7   : > { %511 = vmatpush3.bf16.msra.mxu0 (!%p138_p2), %v547_v0  ;;  %s565_s29 = smov (!%p138_p2), 32   ;;  %vm244_vm2 = vcmask (!%p138_p2), 1044480   ;;  %v552_v35 = vld [vmem:[%s646_s1 + $0x28] sm:$0xff] (!%p138_p2)   ;;  %v554_v38 = vld [vmem:[%s646_s1 + $0x30] sm:$0xff] (!%p138_p2)   ;;  %s566_s7 = smov (!%p138_p2), 96   ;;  %v555_v39 = vld [vmem:[%s646_s1 + $0x38] sm:$0xff] (!%p138_p2)  }
   0x8   : > { %512 = vmatprep.subr.bf16.mxu0 (!%p138_p2), %v548_v1  ;;  %vm252_vm3 = vcmask (!%p138_p2), 261120   ;;  %vm258_vm4 = vcmask (!%p138_p2), 523264   ;;  %vm263_vm5 = vcmask (!%p138_p2), 785408   ;;  %v482_v53 = vld [vmem:[%s647_s2] ss:$0 sm:$0xff] (!%p138_p2)  ;;  %vm411_vm6 = vcmask (!%p138_p2), 123904  }
   0x9   : > { %vm408_vm7 = vcmask (!%p138_p2), 125952  }
   0xb   : > { %513 = vmatpush3.bf16.msra.mxu0 (!%p138_p2), %v548_v1 }
   0xc   : > { %514 = vmatprep.subr.bf16.mxu0 (!%p138_p2), %v549_v2 }
   0xd   : > { %s650_s13 = smov (!%p161_p3, %s468_s13), 1 }
   0xe   : > { %s496_s18 = sshll.u32 %s650_s13, 4  ;;  %s530_s14 = smul.u32 12, %s650_s13 }
   0xf   : > { %s607_s21 = scalar_lea.vmem %s645_s0, %s496_s18  ;;  %515 = vmatpush3.bf16.msra.mxu0 %v549_v2 }
  0x10   : > { %v542_v3 = vld [vmem:[%s607_s21 + $0x8] sm:$0x1f]   ;;  %v173_v7 = vld [vmem:[%s607_s21 + $0x4] sm:$0xf]  ;;  %v176_v8 = vld [vmem:[%s607_s21] sm:$0xc]  ;;  %516 = vmatprep.subr.bf16.mxu0 %v550_v13  ;;  %s170_s17 = scalar_lea.vmem %s648_s3, %s530_s14 }
  0x11   : > { %v543_v4 = vld [vmem:[%s607_s21 + $0x8] ss:$0 sps:$4 sm:$0x77]   ;;  %v229_v5 = vshrl.u32 %v542_v3, 16  ;;  %v232_v6 = vshll.u32 %v542_v3, 16  ;;  %v479_v11 = vcombine.low %v176_v8, %v173_v7  ;;  %v246_v32 = vrot.slane %v542_v3, 3 }
  0x12   : > { %v200_v9 = vshll.u32 %v543_v4, 16  ;;  %v204_v10 = vshrl.u32 %v543_v4, 16  ;;  %v172_v12 = vld [vmem:[%s607_s21] sm:$0xf] }
  0x13   : > { %v231_v14 = vrot.slane %v229_v5, 2  ;;  %v234_v15 = vrot.slane %v232_v6, 3  ;;  %v476_v16 = vcombine.low %v172_v12, %v173_v7  ;;  %v179_v17 = vld [vmem:[%s607_s21] sm:$0x8]  ;;  %v221_v19 = vshrl.u32 %v479_v11, 16  ;;  %517 = vmatpush3.bf16.msra.mxu0 %v550_v13 }
  0x14   : > { %v202_v18 = vrot.slane %v200_v9, 1  ;;  %v224_v20 = vshll.u32 %v479_v11, 16  ;;  %v481_v24 = vcombine.low %v179_v17, %v173_v7  ;;  %518 = vmatprep.subr.bf16.mxu0 %v551_v28  ;;  %v553_v42 = vld [vmem:[%s607_s21 + $0x8] ss:$0 sps:$4 sm:$0x33]  }
  0x15   : > { %v235_v21 = vor.u32 %v234_v15, %v231_v14  ;;  %v193_v22 = vshrl.u32 %v476_v16, 16  ;;  %v195_v23 = vshll.u32 %v476_v16, 16  ;;  %v223_v26 = vrot.slane %v221_v19, 2 }
  0x16   : > { %v206_v25 = vor.u32 %v204_v10, %v202_v18  ;;  %v226_v27 = vrot.slane %v224_v20, 3  ;;  %v245_v33 = vrot.slane %v481_v24, 3 }
  0x17   : > { %239 = vrot.lane.b32.xlu1 %v235_v21, %s564_s28  ;;  %v197_v29 = vrot.slane %v195_v23, 1  ;;  %519 = vmatpush3.bf16.msra.mxu0 %v551_v28 }
  0x18   : > { %209 = vrot.lane.b32.xlu0 %v206_v25, %s565_s29  ;;  %v227_v30 = vor.u32 %v226_v27, %v223_v26  ;;  %v247_v37 = vsel %vm244_vm2, %v245_v33, %v246_v32  ;;  %520 = vmatprep.subr.bf16.mxu0 %v552_v35 }
  0x19   : > { %v198_v31 = vor.u32 %v197_v29, %v193_v22 }
  0x1a   : > { %v236_v34 = vsel %vm219_vm0, %v227_v30, %v235_v21 }
  0x1b   : > { %237 = vrot.lane.b32.xlu1 %v236_v34, %s564_s28  ;;  %v203_v36 = vsel %vm191_vm1, %v198_v31, %v202_v18  ;;  %521 = vmatpush3.bf16.msra.mxu0 %v552_v35 }
  0x1c   : > { %207 = vrot.lane.b32.xlu0 %v203_v36, %s565_s29  ;;  %522 = vmatprep.subr.bf16.mxu0 %v554_v38 }
  0x1f   : > { %250 = vrot.lane.b32.xlu1 %v246_v32, %s566_s7  ;;  %523 = vmatpush3.bf16.msra.mxu0 %v554_v38 }
  0x20   : > { %248 = vrot.lane.b32.xlu0 %v247_v37, %s566_s7  ;;  %524 = vmatprep.subr.bf16.mxu0 %v555_v39 }
  0x23   : > { %525 = vmatpush3.bf16.msra.mxu0 %v555_v39 }
  0x89   : > { %v240_v40 = vpop.permute.xlu1 %239 }
  0x8a   : > { %v210_v41 = vpop.permute.xlu0 %209 }
  0x8b   : > { %v257_v44 = vsel %vm252_vm3, %v553_v42, %v210_v41 }
  0x8c   : > { %v262_v48 = vsel %vm258_vm4, %v257_v44, %v240_v40 }
  0x8d   : > { %v238_v43 = vpop.permute.xlu1 %237 }
  0x8e   : > { %v208_v45 = vpop.permute.xlu0 %207 }
  0x8f   : > { %v254_v46 = vsel %vm252_vm3, %v476_v16, %v208_v45 }
  0x90   : > { %v260_v50 = vsel %vm258_vm4, %v254_v46, %v238_v43 }
  0x91   : > { %v251_v47 = vpop.permute.xlu1 %250 }
  0x92   : > { %v249_v49 = vpop.permute.xlu0 %248  ;;  %v268_v51 = vsel %vm263_vm5, %v262_v48, %v251_v47 }
  0x93   : > { %v265_v52 = vsel %vm263_vm5, %v260_v50, %v249_v49 }
  0x94   : > { %526 = vmatprep.mubr.bf16.mxu0 %v265_v52 }
  0x95   : > { %527 = vmatmul.mubr.bf16.vlgmr.msra.gmra.mrb[0].mxu0 %v268_v51 }
 0x168   : > { %v528_v54 = vpop.f32.mrb[0].mxu0 }
 0x169   : > { %v384_v55 = vadd.f32 %v528_v54, %v482_v53  ;;  %v375_v56 = vpop.f32.mrb[1].mxu0 }
 0x16a   : > { %v376_v57 = vadd.f32 %v482_v53, %v375_v56  ;;  %v529_v58 = vpop.f32.mrb[2].mxu0 }
 0x16b   : > { %v391_v59 = vmul.f32 0.1, %v384_v55  ;;  %v378_v60 = vpop.f32.mrb[3].mxu0 }
 0x16c   : > { %v389_v61 = vmul.f32 0.1, %v376_v57  ;;  %v379_v62 = vadd.f32 %v482_v53, %v378_v60 }
 0x16d   : > { %v394_v63 = vmax.f32 %v384_v55, %v391_v59 }
 0x16e   : > { %v392_v0 = vmax.f32 %v376_v57, %v389_v61  ;;  %v390_v1 = vmul.f32 0.1, %v379_v62 }
 0x16f   : > { %v499_v2 = vpack.c.bf16 %v394_v63, %v394_v63 }
 0x170   : > { %v497_v3 = vpack.c.bf16 %v392_v0, %v392_v0  ;;  %v393_v4 = vmax.f32 %v379_v62, %v390_v1 }
 0x171   : > { %412 = vst.msk [vmem:[%s170_s17 + $0x8] sm:$0x3] %vm411_vm6, %v499_v2 }
 0x172   : > { %409 = vst.msk [vmem:[%s170_s17] sm:$0xf] %vm408_vm7, %v497_v3  ;;  %v498_v5 = vpack.c.bf16 %v393_v4, %v393_v4 }
 0x174   : > { %410 = vst.msk [vmem:[%s170_s17 + $0x4] sm:$0xf] %vm408_vm7, %v498_v5 }
 0x175 PF: > { %s13_s12 = sadd.s32 1, %s562_s12  }
 0x176   : > { %p10_p4 = scmp.ge.s32.totalorder %s13_s12, 4  }
 0x178   :  { %12 = sbr.rel (!%p10_p4) target bundleno = 1 (0x1), region = 62 }

// kernel: tile.8
= control target key start
LH: loop header
LB: loop body
LE: loop exit
PB: predicated region body
PF: predicated region fallthrough
CT: control target
= control target key end

     0   :  { %s22_s0 = inlined_call_operand.vmem [shape: f32[3], index: 0, kind: input, shape index: {}]   ;;  %s23_s1 = inlined_call_operand.vmem [shape: f32[4,3], index: 1, kind: output, shape index: {}]  }
   0x1   :  { %v4_v0 = vld [vmem:[%s22_s0] ss:$0 sm:$0xff] }
   0x2   :  { %5 = vst [vmem:[%s23_s1] sm:$0xf] %v4_v0 }

// kernel: tile.9
= control target key start
LH: loop header
LB: loop body
LE: loop exit
PB: predicated region body
PF: predicated region fallthrough
CT: control target
= control target key end

     0   :  { %vm7_vm0 = vcmask 23552   ;;  %s37_s8 = smov 3   ;;  %s38_s9 = smov 6   ;;  %vm13_vm1 = vcmask 97352   ;;  %vm19_vm2 = vcmask 72752   ;;  %vm25_vm3 = vcmask 48152   ;;  %s55_s0 = inlined_call_operand.vmem [shape: f32[4,3], index: 0, kind: input, shape index: {}]   ;;  %s56_s1 = inlined_call_operand.vmem [shape: f32[1,12], index: 1, kind: output, shape index: {}]  }
   0x1   :  { %v4_v0 = vld [vmem:[%s55_s0] sm:$0xf]  ;;  %s36_s0 = smov 9  }
   0x2   :  { %5 = vst [vmem:[#allocation1] sm:$0xf] %v4_v0 }
   0x9   :  { %v10_v1 = vld [vmem:[#allocation1 + $0x3] sm:$0x1]   ;;  %v22_v2 = vld [vmem:[#allocation1 + $0x1] sm:$0x1]   ;;  %v6_v3 = vld [vmem:[#allocation1] sm:$0x1]  }
   0xa   :  { %11 = vrot.lane.b32.xlu0 %v10_v1, %s36_s0  ;;  %23 = vrot.lane.b32.xlu1 %v22_v2, %s37_s8  ;;  %v16_v4 = vld [vmem:[#allocation1 + $0x2] sm:$0x1]   ;;  %8 = vst.msk [vmem:[#allocation0] sm:$0x1] %vm7_vm0, %v6_v3  }
   0xe   :  { %17 = vrot.lane.b32.xlu0 %v16_v4, %s38_s9 }
  0x7c   :  { %v12_v5 = vpop.permute.xlu0 %11   ;;  %v24_v6 = vpop.permute.xlu1 %23  }
  0x7d   :  { %14 = vst.msk [vmem:[#allocation0] sm:$0x1] %vm13_vm1, %v12_v5  }
  0x80   :  { %v18_v7 = vpop.permute.xlu0 %17  }
  0x81   :  { %20 = vst.msk [vmem:[#allocation0] sm:$0x1] %vm19_vm2, %v18_v7  }
  0x82   :  { %26 = vst.msk [vmem:[#allocation0] sm:$0x1] %vm25_vm3, %v24_v6  }
  0x89   :  { %v30_v8 = vld [vmem:[#allocation0] sm:$0x1] }
  0x8a   :  { %32 = vst [vmem:[%s56_s1] sm:$0x1] %v30_v8 }

// kernel: idepth_block_forward.5
= control target key start
LH: loop header
LB: loop body
LE: loop exit
PB: predicated region body
PF: predicated region fallthrough
CT: control target
= control target key end

     0   :  { %s3937_s18 = smov 0   ;;  %s5070_s0 = inlined_call_operand.vmem [shape: bf16[2,48,16], index: 0, kind: input, shape index: {}]   ;;  %s5071_s1 = inlined_call_operand.vmem [shape: bf16[8,144,16], index: 1, kind: input, shape index: {}]   ;;  %s5072_s2 = inlined_call_operand.vmem [shape: f32[8,1,16], index: 2, kind: input, shape index: {}]   ;;  %s5073_s3 = inlined_call_operand.vmem [shape: bf16[144,12], index: 3, kind: input, shape index: {}]   ;;  %s5074_s4 = inlined_call_operand.vmem [shape: f32[1,12], index: 4, kind: input, shape index: {}]   ;;  %s5075_s5 = inlined_call_operand.vmem [shape: f32[2,24,12], index: 5, kind: output, shape index: {}]  }
   0x1 LB: > { %s3503_s19 = sadd.s32 4294967295, %s3896_s18   ;;  %p3507_p0 = scmp.ge.s32.totalorder %s3896_s18, 1  ;;  %s3896_s18 = sphi %s3937_s18, %s15_s18  }
   0x2   : > { %p187_p1 = scmp.lt.s32.totalorder %s3896_s18, 3 }
   0x4   : > { %p188_p2 = pnand %p3507_p0, %p187_p1 }
   0x5   : > { %p215_p3 = scmp.lt.s32.totalorder (!%p188_p2), %s3503_s19, 1  ;;  %v3898_v0 = vmov (!%p188_p2), 0   ;;  %v3809_v1 = vld [vmem:[%s5071_s1] sm:$0xff] (!%p188_p2)   ;;  %vm250_vm0 = vcmask (!%p188_p2), 130048   ;;  %v3810_v2 = vld [vmem:[%s5071_s1 + $0x8] sm:$0xff] (!%p188_p2)   ;;  %v3811_v6 = vld [vmem:[%s5071_s1 + $0x10] sm:$0xff] (!%p188_p2)  }
   0x6   : > { %191 = sbr.rel (%p188_p2) target bundleno = 3515 (0xdbb), region = 40  ;;  %609 = vmatprep.subr.bf16.mxu0 (!%p188_p2), %v3898_v0  ;;  %957 = vmatprep.subr.bf16.mxu1 (!%p188_p2), %v3898_v0  ;;  %v3812_v7 = vld [vmem:[%s5071_s1 + $0x18] sm:$0xff] (!%p188_p2)   ;;  %vm364_vm1 = vcmask (!%p188_p2), 1044480   ;;  %vm5088_vm2 = vcmask (!%p188_p2), 1046528   ;;  %vm5086_vm3 = vcmask (!%p188_p2), 1043456   ;;  %s3899_s7 = smov (!%p188_p2), 96  }
   0x7   : > { %610 = vmatpush1.bf16.msra.mxu0 (!%p188_p2), %v3809_v1  ;;  %s3900_s8 = smov (!%p188_p2), 32   ;;  %vm5085_vm4 = vcmask (!%p188_p2), 1041408   ;;  %vm5084_vm5 = vsmask.f32 (!%p188_p2), 7424  ;;  %v3813_v31 = vld [vmem:[%s5071_s1 + $0x20] sm:$0xff] (!%p188_p2)   ;;  %s3901_s11 = smov (!%p188_p2), 48  }
   0x8   : > { %611 = vmatprep.subr.bf16.mxu0 (!%p188_p2), %v3898_v0  ;;  %v3814_v42 = vld [vmem:[%s5071_s1 + $0x28] sm:$0xff] (!%p188_p2)   ;;  %vm5083_vm6 = vsmask.f32 (!%p188_p2), 4352  ;;  %s3902_s14 = smov (!%p188_p2), 80   ;;  %v3815_v54 = vld [vmem:[%s5071_s1 + $0x30] sm:$0xff] (!%p188_p2)   ;;  %s3903_s17 = smov (!%p188_p2), 16  }
   0x9   : > { %vm5082_vm7 = vsmask.f32 (!%p188_p2), 1280  ;;  %vm450_vm8 = vcmask (!%p188_p2), 1040384   ;;  %vm5087_vm9 = vsmask.f32 (!%p188_p2), 5376  ;;  %s3904_s25 = smov (!%p188_p2), 64  }
   0xa   : > { %s3905_s26 = smov (!%p188_p2), 112   ;;  %vm5081_vm10 = vcmask (!%p188_p2), 261120   ;;  %vm5080_vm11 = vcmask (!%p188_p2), 392192   ;;  %vm5079_vm12 = vcmask (!%p188_p2), 523264   ;;  %vm5078_vm13 = vcmask (!%p188_p2), 654336  }
   0xb   : > { %612 = vmatpush1.bf16.msra.mxu0 (!%p188_p2), %v3810_v2  ;;  %vm5077_vm14 = vcmask (!%p188_p2), 785408   ;;  %vm5076_vm15 = vcmask (!%p188_p2), 916480  }
   0xc   : > { %613 = vmatprep.subr.bf16.mxu0 (!%p188_p2), %v3898_v0 }
   0xd   : > { %s5269_s19 = smov (!%p215_p3, %s3503_s19), 1 }
   0xe   : > { %s3782_s22 = smul.u32 24, %s5269_s19 }
   0xf   : > { %614 = vmatpush1.bf16.msra.mxu0 %v3811_v6 }
  0x10   : > { %s3962_s27 = scalar_lea.vmem %s5070_s0, %s3782_s22  ;;  %615 = vmatprep.subr.bf16.mxu0 %v3898_v0  ;;  %s224_s30 = scalar_lea.vmem %s5075_s5, %s3782_s22 }
  0x11   : > { %v3806_v3 = vld [vmem:[%s3962_s27 + $0x8] sm:$0xff]   ;;  %v3807_v4 = vld [vmem:[%s3962_s27] sm:$0xff]   ;;  %v3808_v5 = vld [vmem:[%s3962_s27 + $0x10] sm:$0xff]  }
  0x12   : > { %252 = vst.msk [vmem:[#allocation2 + $0x8] sm:$0xff] %vm250_vm0, %v3806_v3  ;;  %251 = vst.msk [vmem:[#allocation2] sm:$0xff] %vm250_vm0, %v3807_v4  ;;  %v3816_v4 = vld [vmem:[%s5071_s1 + $0x38] sm:$0xff]  }
  0x13   : > { %253 = vst.msk [vmem:[#allocation2 + $0x10] sm:$0xff] %vm250_vm0, %v3808_v5  ;;  %616 = vmatpush1.bf16.msra.mxu0 %v3812_v7 }
  0x14   : > { %617 = vmatprep.subr.bf16.mxu0 %v3898_v0 }
  0x17   : > { %618 = vmatpush1.bf16.msra.mxu0 %v3813_v31 }
  0x18   : > { %619 = vmatprep.subr.bf16.mxu0 %v3898_v0 }
  0x19   : > { %v3978_v8 = vld [vmem:[#allocation2 + $0x8] sm:$0xff]  ;;  %v325_v12 = vld [vmem:[#allocation2] sm:$0xe0] }
  0x1a   : > { %v3980_v9 = vld [vmem:[#allocation2 + $0x8] sm:$0x7f]  ;;  %v419_v10 = vrot.slane %v3978_v8, 6  ;;  %v356_v11 = vrot.slane %v3978_v8, 1  ;;  %v366_v13 = vrot.slane %v3978_v8, 3  ;;  %v365_v14 = vrot.slane %v325_v12, 3 }
  0x1b   : > { %v323_v15 = vld [vmem:[#allocation2] sm:$0xf8]  ;;  %v341_v17 = vshll.u32 %v3980_v9, 16  ;;  %v409_v20 = vrot.slane %v3978_v8, 4  ;;  %v326_v21 = vld [vmem:[#allocation2 + $0x10] sm:$0x3]  ;;  %620 = vmatpush1.bf16.msra.mxu0 %v3814_v42 }
  0x1c   : > { %v327_v16 = vld [vmem:[#allocation2] sm:$0xc0]  ;;  %422 = vrot.lane.b32.xlu0 %v419_v10, %s3899_s7  ;;  %360 = vrot.lane.b32.xlu1 %v356_v11, %s3900_s8  ;;  %v355_v18 = vrot.slane %v323_v15, 1  ;;  %v367_v22 = vsel %vm364_vm1, %v365_v14, %v366_v13  ;;  %v368_v23 = vrot.slane %v326_v21, 3  ;;  %v345_v24 = vshrl.u32 %v3980_v9, 16 }
  0x1d   : > { %v408_v19 = vrot.slane %v327_v16, 4  ;;  %v328_v25 = vld [vmem:[#allocation2 + $0x10] sm:$0x7]  ;;  %v343_v27 = vrot.slane %v341_v17, 1  ;;  %v334_v29 = vshrl.u32 %v323_v15, 16  ;;  %v336_v33 = vshll.u32 %v323_v15, 16  ;;  %621 = vmatprep.subr.bf16.mxu0 %v3898_v0 }
  0x1e   : > { %v357_v26 = vsel %vm5088_vm2, %v355_v18, %v356_v11  ;;  %v411_v28 = vrot.slane %v328_v25, 4  ;;  %v330_v30 = vld [vmem:[#allocation2 + $0x8] sm:$0xfe]  ;;  %v329_v32 = vld [vmem:[#allocation2 + $0x10] sm:$0x1f]  ;;  %v384_v34 = vshrl.u32 %v3978_v8, 16  ;;  %v369_v38 = vsel %vm364_vm1, %v366_v13, %v368_v23 }
  0x1f   : > { %v410_v35 = vsel %vm5086_vm3, %v408_v19, %v409_v20  ;;  %v387_v36 = vshll.u32 %v3978_v8, 16  ;;  %v393_v37 = vshrl.u32 %v326_v21, 16  ;;  %v338_v39 = vrot.slane %v336_v33, 1  ;;  %v331_v59 = vld [vmem:[#allocation2 + $0x10] sm:$0x3f]  ;;  %622 = vmatpush1.bf16.msra.mxu0 %v3815_v54  ;;  %v3817_v8 = vld [vmem:[%s5071_s1 + $0x40] sm:$0xff]  }
  0x20   : > { %370 = vrot.lane.b32.xlu0 %v367_v22, %s3901_s11  ;;  %358 = vrot.lane.b32.xlu1 %v357_v26, %s3900_s8  ;;  %v396_v40 = vshll.u32 %v326_v21, 16  ;;  %v376_v41 = vshrl.u32 %v327_v16, 16  ;;  %v386_v43 = vrot.slane %v384_v34, 3  ;;  %v379_v45 = vshll.u32 %v327_v16, 16 }
  0x21   : > { %v389_v44 = vrot.slane %v387_v36, 4  ;;  %v395_v46 = vrot.slane %v393_v37, 3  ;;  %v428_v48 = vshrl.u32 %v330_v30, 16  ;;  %v431_v49 = vshll.u32 %v330_v30, 16  ;;  %623 = vmatprep.subr.bf16.mxu0 %v3898_v0  ;;  %v321_v37 = vld [vmem:[#allocation2] sm:$0xfc] }
  0x22   : > { %v398_v47 = vrot.slane %v396_v40, 4  ;;  %v347_v50 = vor.u32 %v345_v24, %v343_v27  ;;  %v420_v51 = vrot.slane %v329_v32, 6  ;;  %v378_v52 = vrot.slane %v376_v41, 3 }
  0x23   : > { %v436_v53 = vshrl.u32 %v329_v32, 16  ;;  %v412_v55 = vsel %vm5086_vm3, %v409_v20, %v411_v28  ;;  %v339_v56 = vor.u32 %v338_v39, %v334_v29  ;;  %v381_v57 = vrot.slane %v379_v45, 4  ;;  %624 = vmatpush1.bf16.msra.mxu0 %v3816_v4  ;;  %v3818_v4 = vld [vmem:[%s5071_s1 + $0x48] sm:$0xff]  }
  0x24   : > { %413 = vrot.lane.b32.xlu0 %v410_v35, %s3902_s14  ;;  %372 = vrot.lane.b32.xlu1 %v369_v38, %s3901_s11  ;;  %v439_v58 = vshll.u32 %v329_v32, 16  ;;  %v390_v60 = vor.u32 %v389_v44, %v386_v43  ;;  %v399_v61 = vor.u32 %v398_v47, %v395_v46  ;;  %v430_v62 = vrot.slane %v428_v48, 6 }
  0x25   : > { %v433_v63 = vrot.slane %v431_v49, 7  ;;  %v421_v1 = vsel %vm5085_vm4, %v419_v10, %v420_v51  ;;  %v438_v2 = vrot.slane %v436_v53, 6  ;;  %v344_v5 = vsel %vm5084_vm5, %v339_v56, %v343_v27  ;;  %625 = vmatprep.subr.bf16.mxu0 %v3898_v0  ;;  %958 = vmatpush1.bf16.msra.mxu1 %v3818_v4 }
  0x26   : > { %v441_v3 = vrot.slane %v439_v58, 7  ;;  %v382_v6 = vor.u32 %v381_v57, %v378_v52  ;;  %v451_v7 = vrot.slane %v330_v30, 7  ;;  %v452_v11 = vrot.slane %v331_v59, 7  ;;  %959 = vmatprep.subr.bf16.mxu1 %v3898_v0 }
  0x27   : > { %v400_v12 = vsel %vm5083_vm6, %v390_v60, %v399_v61  ;;  %v434_v15 = vor.u32 %v433_v63, %v430_v62  ;;  %626 = vmatpush1.bf16.msra.mxu0 %v3817_v8 }
  0x28   : > { %350 = vrot.lane.b32.xlu0 %v347_v50, %s3903_s17  ;;  %415 = vrot.lane.b32.xlu1 %v412_v55, %s3902_s14  ;;  %v453_v10 = vsel %vm450_vm8, %v451_v7, %v452_v11  ;;  %v531_v13 = vshrl.u32 %v451_v7, 16  ;;  %v534_v14 = vshll.u32 %v451_v7, 16  ;;  %v391_v18 = vsel %vm5083_vm6, %v382_v6, %v390_v60 }
  0x29   : > { %v539_v16 = vshrl.u32 %v453_v10, 16  ;;  %v542_v17 = vshll.u32 %v453_v10, 16  ;;  %v442_v19 = vor.u32 %v441_v3, %v438_v2  ;;  %1302 = vmatprep.subr.bf16.mxu0 %v3898_v0 }
  0x2a   : > { %v533_v20 = vrot.slane %v531_v13, 2  ;;  %v536_v21 = vrot.slane %v534_v14, 3 }
  0x2b   : > { %v541_v22 = vrot.slane %v539_v16, 2  ;;  %v544_v23 = vrot.slane %v542_v17, 3  ;;  %v443_v26 = vsel %vm5082_vm7, %v434_v15, %v442_v19 }
  0x2c   : > { %424 = vrot.lane.b32.xlu1 %v421_v1, %s3899_s7  ;;  %348 = vrot.lane.b32.xlu0 %v344_v5, %s3903_s17  ;;  %v537_v24 = vor.u32 %v536_v21, %v533_v20  ;;  %v254_v5 = vlaneseq }
  0x2d   : > { %v545_v25 = vor.u32 %v544_v23, %v541_v22 }
  0x2e   : > { %v255_v6 = vshrl.u32 %v254_v5, 7 }
  0x2f   : > { %v546_v27 = vsel %vm5087_vm9, %v537_v24, %v545_v25 }
  0x30   : > { %403 = vrot.lane.b32.xlu1 %v400_v12, %s3904_s25  ;;  %401 = vrot.lane.b32.xlu0 %v391_v18, %s3904_s25  ;;  %v256_v7 = vadd.s32 8, %v255_v6  ;;  %v4063_v11 = vmul.u32.u64.low 2863311531, %v255_v6  ;;  %v4064_v12 = vmul.u32.u64.high 2863311531, %v255_v6, %v4063_v11  ;;  %v257_v13 = vadd.s32 16, %v255_v6 }
  0x31   : > { %3526 = vmatprep.mubr.msk.bf16.mxu0 %vm250_vm0, %v546_v27 }
  0x32   : > { %v4066_v8 = vmul.u32.u64.low 2863311531, %v256_v7  ;;  %v4067_v10 = vmul.u32.u64.high 2863311531, %v256_v7, %v4066_v8  ;;  %v264_v16 = vshrl.u32 %v4064_v12, 2 }
  0x34   : > { %446 = vrot.lane.b32.xlu1 %v443_v26, %s3905_s26  ;;  %444 = vrot.lane.b32.xlu0 %v434_v15, %s3905_s26  ;;  %v4069_v14 = vmul.u32.u64.low 2863311531, %v257_v13  ;;  %v4070_v15 = vmul.u32.u64.high 2863311531, %v257_v13, %v4069_v14  ;;  %v275_v17 = vshrl.u32 %v4067_v10, 2  ;;  %v265_v18 = vmul.u32 6, %v264_v16 }
  0x36   : > { %v276_v19 = vmul.u32 6, %v275_v17  ;;  %v286_v20 = vshrl.u32 %v4070_v15, 2  ;;  %v266_v21 = vsub.s32 %v255_v6, %v265_v18  ;;  %v3822_v15 = vld [vmem:[%s5071_s1 + $0x68] sm:$0xff]  }
  0x38   : > { %v277_v22 = vsub.s32 %v256_v7, %v276_v19  ;;  %v287_v23 = vmul.u32 6, %v286_v20  ;;  %v300_v24 = vadd.s32 6, %v266_v21 }
  0x3a   : > { %v288_v26 = vsub.s32 %v257_v13, %v287_v23 }
  0x3c   : > { %vm293_vm7 = vcmp.ne.s32.totalorder %v288_v26, 0  ;;  %vm296_vm6 = vcmp.lt.s32.totalorder %v288_v26, 0 }
  0x3d   : > { %vm299_vm2 = vmand %vm296_vm6, %vm293_vm7  ;;  %vm5089_vm6 = vcmask 1046528   ;;  %vm5090_vm7 = vsmask.f32 5376 }
  0x8e   : > { %v423_v28 = vpop.permute.xlu0 %422  ;;  %v361_v29 = vpop.permute.xlu1 %360 }
  0x92   : > { %v371_v30 = vpop.permute.xlu0 %370  ;;  %v359_v31 = vpop.permute.xlu1 %358 }
  0x96   : > { %v414_v32 = vpop.permute.xlu0 %413  ;;  %v373_v33 = vpop.permute.xlu1 %372 }
  0x9a   : > { %v351_v34 = vpop.permute.xlu0 %350  ;;  %v416_v35 = vpop.permute.xlu1 %415 }
  0x9b   : > { %v458_v36 = vsel %vm250_vm0, %v3980_v9, %v351_v34 }
  0x9c   : > { %v463_v40 = vsel %vm5081_vm10, %v458_v36, %v361_v29  ;;  %v3516_v29 = vld [vmem:[%s5072_s2] ss:$0 sm:$0xff] }
  0x9d   : > { %v468_v44 = vsel %vm5080_vm11, %v463_v40, %v373_v33 }
  0x9e   : > { %v425_v38 = vpop.permute.xlu1 %424  ;;  %v349_v39 = vpop.permute.xlu0 %348 }
  0x9f   : > { %v456_v41 = vsel %vm250_vm0, %v321_v37, %v349_v39 }
  0xa0   : > { %v461_v42 = vsel %vm5081_vm10, %v456_v41, %v359_v31  ;;  %v3906_v41 = vmov 0.0  }
  0xa1   : > { %v466_v43 = vsel %vm5080_vm11, %v461_v42, %v371_v30  ;;  %v302_v30 = vadd.s32 6, %v288_v26 }
  0xa2   : > { %v404_v45 = vpop.permute.xlu1 %403  ;;  %v402_v46 = vpop.permute.xlu0 %401 }
  0xa3   : > { %v473_v9 = vsel %vm5079_vm12, %v468_v44, %v404_v45  ;;  %v471_v47 = vsel %vm5079_vm12, %v466_v43, %v402_v46  ;;  %vm295_vm12 = vcmp.lt.s32.totalorder %v277_v22, 0 }
  0xa4   : > { %v478_v48 = vsel %vm5078_vm13, %v473_v9, %v416_v35  ;;  %v476_v49 = vsel %vm5078_vm13, %v471_v47, %v414_v32  ;;  %vm292_vm13 = vcmp.ne.s32.totalorder %v277_v22, 0 }
  0xa5   : > { %v483_v50 = vsel %vm5077_vm14, %v478_v48, %v425_v38  ;;  %v481_v51 = vsel %vm5077_vm14, %v476_v49, %v423_v28  ;;  %vm294_vm14 = vcmp.lt.s32.totalorder %v266_v21, 0  ;;  %vm298_vm10 = vmand %vm295_vm12, %vm292_vm13  ;;  %v305_v38 = vsel %vm299_vm2, %v302_v30, %v288_v26 }
  0xa6   : > { %v447_v52 = vpop.permute.xlu1 %446  ;;  %v445_v53 = vpop.permute.xlu0 %444  ;;  %vm311_vm12 = vcmp.le.s32.totalorder %v305_v38, 4  ;;  %vm677_vm2 = vcmask 130054   ;;  %vm5092_vm13 = vcmask 1041408  }
  0xa7   : > { %v488_v54 = vsel %vm5076_vm15, %v483_v50, %v447_v52  ;;  %v486_v55 = vsel %vm5076_vm15, %v481_v51, %v445_v53  ;;  %vm291_vm15 = vcmp.ne.s32.totalorder %v266_v21, 0 }
  0xa8   : > { %v522_v56 = vshrl.u32 %v488_v54, 16  ;;  %v525_v57 = vshll.u32 %v488_v54, 16  ;;  %v515_v58 = vshrl.u32 %v486_v55, 16  ;;  %v518_v59 = vshll.u32 %v486_v55, 16  ;;  %vm297_vm11 = vmand %vm294_vm14, %vm291_vm15 }
  0xa9   : > { %v303_v27 = vsel %vm297_vm11, %v300_v24, %v266_v21 }
  0xaa   : > { %v524_v60 = vrot.slane %v522_v56, 2  ;;  %v527_v61 = vrot.slane %v525_v57, 3  ;;  %v517_v62 = vrot.slane %v515_v58, 2  ;;  %v520_v63 = vrot.slane %v518_v59, 3  ;;  %v3819_v58 = vld [vmem:[%s5071_s1 + $0x50] sm:$0xff]  }
  0xab   : > { %vm306_vm5 = vcmp.ge.s32.totalorder %v303_v27, 1  ;;  %vm309_vm4 = vcmp.le.s32.totalorder %v303_v27, 4  ;;  %960 = vmatpush1.bf16.msra.mxu1 %v3819_v58 }
  0xac   : > { %v528_v1 = vor.u32 %v527_v61, %v524_v60  ;;  %v521_v2 = vor.u32 %v520_v63, %v517_v62  ;;  %vm312_vm14 = vmand %vm306_vm5, %vm309_vm4  ;;  %vm680_vm5 = vcmask 123904   ;;  %961 = vmatprep.subr.bf16.mxu1 %v3898_v0  ;;  %v3820_v61 = vld [vmem:[%s5071_s1 + $0x58] sm:$0xff]   ;;  %v3821_v62 = vld [vmem:[%s5071_s1 + $0x60] sm:$0xff]  }
  0xad   : > { %v4078_v42 = vsel %vm312_vm14, 1.0, %v3906_v41  ;;  %vm5094_vm14 = vsmask.f32 7424 }
  0xae   : > { %v529_v3 = vsel %vm5087_vm9, %v521_v2, %v528_v1 }
  0xaf   : > { %642 = vmatmul.mubr.bf16.vlgmr.msra.gmra.mrb[0].mxu0 %v529_v3  ;;  %962 = vmatpush1.bf16.msra.mxu1 %v3820_v61 }
  0xb0   : > { %3527 = vmatprep.mubr.msk.bf16.mxu0 %vm250_vm0, %v545_v25  ;;  %v301_v25 = vadd.s32 6, %v277_v22  ;;  %963 = vmatprep.subr.bf16.mxu1 %v3898_v0 }
  0xb2   : > { %v304_v28 = vsel %vm298_vm10, %v301_v25, %v277_v22  ;;  %vm308_vm10 = vcmp.ge.s32.totalorder %v305_v38, 1 }
  0xb3   : > { %vm307_vm3 = vcmp.ge.s32.totalorder %v304_v28, 1  ;;  %vm310_vm9 = vcmp.le.s32.totalorder %v304_v28, 4  ;;  %vm314_vm4 = vmand %vm308_vm10, %vm311_vm12  ;;  %964 = vmatpush1.bf16.msra.mxu1 %v3821_v62  ;;  %vm5097_vm12 = vsmask.f32 1280 }
  0xb4   : > { %vm313_vm11 = vmand %vm307_vm3, %vm310_vm9  ;;  %v4084_v53 = vsel %vm314_vm4, 1.0, %v3906_v41  ;;  %vm670_vm3 = vcmask 1045504   ;;  %965 = vmatprep.subr.bf16.mxu1 %v3898_v0  ;;  %vm5091_vm9 = vcmask 1043456   ;;  %vm5098_vm4 = vcmask 261120  }
  0xb5   : > { %v4080_v43 = vsel %vm313_vm11, 1.0, %v3906_v41  ;;  %vm5093_vm15 = vmmov %vm5091_vm9  ;;  %vm5095_vm11 = vsmask.f32 4352 }
  0xb6   : > { %vm5096_vm10 = vmmov %vm5095_vm11 }
  0xb7   : > { %650 = vmatmul.mubr.bf16.gmra.mrb[4].mxu0 %v528_v1  ;;  %966 = vmatpush1.bf16.msra.mxu1 %v3822_v15 }
  0xb8   : > { %967 = vmatprep.subr.bf16.mxu1 %v3898_v0 }
 0x182   : > { %v643_v31 = vpop.f32.mrb[0].mxu0 }
 0x183   : > { %v644_v32 = vadd.f32 %v3516_v29, %v643_v31  ;;  %v645_v33 = vpop.f32.mrb[1].mxu0 }
 0x184   : > { %v646_v34 = vpop.f32.mrb[2].mxu0 }
 0x185   : > { %v657_v35 = vmul.f32 0.1, %v644_v32  ;;  %v647_v36 = vadd.f32 %v3516_v29, %v646_v34  ;;  %v648_v37 = vpop.f32.mrb[3].mxu0 }
 0x186   : > { %v3823_v37 = vld [vmem:[%s5071_s1 + $0x70] sm:$0xff]  }
 0x187   : > { %v660_v39 = vmax.f32 %v644_v32, %v657_v35  ;;  %v658_v40 = vmul.f32 0.1, %v647_v36  ;;  %968 = vmatpush1.bf16.msra.mxu1 %v3823_v37 }
 0x188   : > { %969 = vmatprep.subr.bf16.mxu1 %v3898_v0 }
 0x189   : > { %v661_v44 = vmax.f32 %v647_v36, %v658_v40  ;;  %v663_v46 = vmul.f32 %v4078_v42, %v660_v39 }
 0x18a   : > { %v651_v45 = vpop.f32.mrb[4].mxu0 }
 0x18b   : > { %v664_v9 = vmul.f32 %v4080_v43, %v661_v44  ;;  %v652_v47 = vadd.f32 %v3516_v29, %v651_v45  ;;  %v653_v48 = vpop.f32.mrb[5].mxu0 }
 0x18c   : > { %v654_v49 = vpop.f32.mrb[6].mxu0 }
 0x18d   : > { %v666_v50 = vpack.c.bf16 %v664_v9, %v663_v46  ;;  %v659_v51 = vmul.f32 0.1, %v652_v47  ;;  %v655_v52 = vpop.f32.mrb[7].mxu0 }
 0x18f   : > { %v671_v54 = vrot.slane %v666_v50, 2  ;;  %v662_v55 = vmax.f32 %v652_v47, %v659_v51 }
 0x191   : > { %678 = vst.msk [vmem:[#allocation2] sm:$0xc0] %vm677_vm2, %v671_v54  ;;  %v665_v56 = vmul.f32 %v4084_v53, %v662_v55 }
 0x193   : > { %v667_v57 = vpack.c.bf16 %v665_v56, %v665_v56 }
 0x195   : > { %v672_v59 = vrot.slane %v667_v57, 2 }
 0x197   : > { %v673_v60 = vsel %vm670_vm3, %v671_v54, %v672_v59  ;;  %681 = vst.msk [vmem:[#allocation2 + $0x10] sm:$0x3] %vm680_vm5, %v672_v59  ;;  %v3824_v54 = vld [vmem:[%s5071_s1 + $0x78] sm:$0xff]  }
 0x198   : > { %679 = vst.msk [vmem:[#allocation2 + $0x8] sm:$0xff] %vm250_vm0, %v673_v60  ;;  %v4112_v12 = vld [vmem:[#allocation2] sm:$0xf8]  ;;  %970 = vmatpush1.bf16.msra.mxu1 %v3824_v54 }
 0x199   : > { %v714_v16 = vrot.slane %v4112_v12, 1  ;;  %v686_v20 = vld [vmem:[#allocation2] sm:$0xe0]  ;;  %v696_v31 = vshll.u32 %v4112_v12, 16  ;;  %971 = vmatprep.subr.bf16.mxu1 %v3898_v0 }
 0x19a   : > { %v688_v35 = vld [vmem:[#allocation2] sm:$0xc0]  ;;  %v723_v38 = vrot.slane %v686_v20, 3  ;;  %v3826_v20 = vld [vmem:[%s5071_s1 + $0x88] sm:$0xff]  }
 0x19b   : > { %v764_v47 = vrot.slane %v688_v35, 4  ;;  %v733_v48 = vshrl.u32 %v688_v35, 16  ;;  %v698_v50 = vrot.slane %v696_v31, 1  ;;  %v736_v52 = vshll.u32 %v688_v35, 16  ;;  %v682_v35 = vld [vmem:[#allocation2] sm:$0xfc] }
 0x19e   : > { %v4102_v63 = vld [vmem:[#allocation2 + $0x10] sm:$0x3] }
 0x19f   : > { %v692_v1 = vld [vmem:[#allocation2 + $0x10] sm:$0x3f]  ;;  %v4104_v2 = vld [vmem:[#allocation2 + $0x8] sm:$0xff]  ;;  %v726_v3 = vrot.slane %v4102_v63, 3  ;;  %v750_v41 = vshrl.u32 %v4102_v63, 16  ;;  %v753_v46 = vshll.u32 %v4102_v63, 16 }
 0x1a0   : > { %v4107_v4 = vld [vmem:[#allocation2 + $0x8] sm:$0xfe]  ;;  %v805_v5 = vrot.slane %v692_v1, 7  ;;  %v774_v6 = vrot.slane %v4104_v2, 6  ;;  %v715_v7 = vrot.slane %v4104_v2, 1  ;;  %v724_v11 = vrot.slane %v4104_v2, 3 }
 0x1a1   : > { %v804_v8 = vrot.slane %v4107_v4, 7  ;;  %v689_v10 = vld [vmem:[#allocation2 + $0x10] sm:$0x7]  ;;  %v765_v23 = vrot.slane %v4104_v2, 4  ;;  %v4126_v30 = vld [vmem:[#allocation2 + $0x8] sm:$0x7f] }
 0x1a2   : > { %777 = vrot.lane.b32.xlu0 %v774_v6, %s3899_s7  ;;  %719 = vrot.lane.b32.xlu1 %v715_v7, %s3900_s8  ;;  %v727_v21 = vsel %vm364_vm1, %v724_v11, %v726_v3  ;;  %v767_v24 = vrot.slane %v689_v10, 4  ;;  %v690_v25 = vld [vmem:[#allocation2 + $0x10] sm:$0x1f]  ;;  %v716_v26 = vsel %vm5089_vm6, %v714_v16, %v715_v7  ;;  %v741_v36 = vshrl.u32 %v4104_v2, 16  ;;  %vm5099_vm6 = vmmov %vm5098_vm4 }
 0x1a3   : > { %v806_v13 = vsel %vm450_vm8, %v804_v8, %v805_v5  ;;  %v879_v14 = vshrl.u32 %v804_v8, 16  ;;  %v882_v17 = vshll.u32 %v804_v8, 16  ;;  %v775_v34 = vrot.slane %v690_v25, 6 }
 0x1a4   : > { %v887_v18 = vshrl.u32 %v806_v13, 16  ;;  %v890_v19 = vshll.u32 %v806_v13, 16  ;;  %v701_v39 = vshll.u32 %v4126_v30, 16  ;;  %v744_v40 = vshll.u32 %v4104_v2, 16 }
 0x1a5   : > { %v881_v22 = vrot.slane %v879_v14, 2  ;;  %v884_v27 = vrot.slane %v882_v17, 3  ;;  %v768_v45 = vsel %vm5091_vm9, %v765_v23, %v767_v24  ;;  %v725_v9 = vsel %vm364_vm1, %v723_v38, %v724_v11 }
 0x1a6   : > { %v889_v28 = vrot.slane %v887_v18, 2  ;;  %v892_v29 = vrot.slane %v890_v19, 3  ;;  %730 = vrot.lane.b32.xlu1 %v727_v21, %s3901_s11  ;;  %717 = vrot.lane.b32.xlu0 %v716_v26, %s3900_s8  ;;  %v776_v49 = vsel %vm5092_vm13, %v774_v6, %v775_v34  ;;  %v743_v51 = vrot.slane %v741_v36, 3 }
 0x1a7   : > { %v885_v32 = vor.u32 %v884_v27, %v881_v22  ;;  %v703_v55 = vrot.slane %v701_v39, 1  ;;  %v746_v56 = vrot.slane %v744_v40, 4  ;;  %v752_v57 = vrot.slane %v750_v41, 3 }
 0x1a8   : > { %v4132_v33 = vor.u32 %v892_v29, %v889_v28  ;;  %v782_v58 = vshrl.u32 %v4107_v4, 16  ;;  %v755_v59 = vrot.slane %v753_v46, 4  ;;  %v785_v60 = vshll.u32 %v4107_v4, 16 }
 0x1a9   : > { %v790_v61 = vshrl.u32 %v690_v25, 16  ;;  %v793_v62 = vshll.u32 %v690_v25, 16  ;;  %v766_v63 = vsel %vm5093_vm15, %v764_v47, %v765_v23  ;;  %v705_v1 = vshrl.u32 %v4126_v30, 16 }
 0x1aa   : > { %v894_v44 = vsel %vm5090_vm7, %v885_v32, %v4132_v33  ;;  %771 = vrot.lane.b32.xlu1 %v768_v45, %s3902_s14  ;;  %728 = vrot.lane.b32.xlu0 %v725_v9, %s3901_s11  ;;  %v694_v2 = vshrl.u32 %v4112_v12, 16  ;;  %v735_v3 = vrot.slane %v733_v48, 3  ;;  %v738_v5 = vrot.slane %v736_v52, 4  ;;  %v3825_v12 = vld [vmem:[%s5071_s1 + $0x80] sm:$0xff]  }
 0x1ab   : > { %3557 = vmatprep.mubr.msk.bf16.mxu1 %vm250_vm0, %v894_v44  ;;  %v707_v6 = vor.u32 %v705_v1, %v703_v55  ;;  %v747_v4 = vor.u32 %v746_v56, %v743_v51  ;;  %v784_v11 = vrot.slane %v782_v58, 6  ;;  %v756_v8 = vor.u32 %v755_v59, %v752_v57  ;;  %972 = vmatpush1.bf16.msra.mxu1 %v3825_v12 }
 0x1ac   : > { %v699_v7 = vor.u32 %v698_v50, %v694_v2  ;;  %v787_v10 = vrot.slane %v785_v60, 7  ;;  %v792_v13 = vrot.slane %v790_v61, 6  ;;  %v795_v14 = vrot.slane %v793_v62, 7  ;;  %973 = vmatprep.subr.bf16.mxu1 %v3898_v0 }
 0x1ad   : > { %v739_v16 = vor.u32 %v738_v5, %v735_v3  ;;  %v757_v17 = vsel %vm5095_vm11, %v747_v4, %v756_v8  ;;  %vm5100_vm7 = vcmask 392192   ;;  %vm5102_vm13 = vcmask 523264   ;;  %v3827_v3 = vld [vmem:[%s5071_s1 + $0x90] sm:$0xff]   ;;  %v3547_v5 = vld [vmem:[%s5072_s2 + $0x1] ss:$0 sm:$0xff] }
 0x1ae   : > { %779 = vrot.lane.b32.xlu1 %v776_v49, %s3899_s7  ;;  %769 = vrot.lane.b32.xlu0 %v766_v63, %s3902_s14  ;;  %v704_v15 = vsel %vm5094_vm14, %v699_v7, %v703_v55  ;;  %v788_v18 = vor.u32 %v787_v10, %v784_v11  ;;  %v796_v19 = vor.u32 %v795_v14, %v792_v13  ;;  %vm5101_vm9 = vmmov %vm5100_vm7  ;;  %vm5103_vm15 = vcmask 654336  }
 0x1af   : > { %v748_v21 = vsel %vm5096_vm10, %v739_v16, %v747_v4  ;;  %974 = vmatpush1.bf16.msra.mxu1 %v3826_v20  ;;  %vm5104_vm14 = vmmov %vm5102_vm13  ;;  %vm5106_vm10 = vcmask 785408   ;;  %1303 = vmatpush1.bf16.msra.mxu0 %v3827_v3 }
 0x1b0   : > { %v797_v22 = vsel %vm5097_vm12, %v788_v18, %v796_v19  ;;  %1647 = vmatprep.subr.bf16.mxu1 %v3898_v0  ;;  %vm5105_vm11 = vmmov %vm5103_vm15  ;;  %1304 = vmatprep.subr.bf16.mxu0 %v3898_v0 }
 0x1b1   : > { %vm5107_vm12 = vmmov %vm5106_vm10 }
 0x1b2   : > { %710 = vrot.lane.b32.xlu1 %v707_v6, %s3903_s17  ;;  %708 = vrot.lane.b32.xlu0 %v704_v15, %s3903_s17 }
 0x1b6   : > { %760 = vrot.lane.b32.xlu1 %v757_v17, %s3904_s25  ;;  %758 = vrot.lane.b32.xlu0 %v748_v21, %s3904_s25 }
 0x1ba   : > { %800 = vrot.lane.b32.xlu1 %v797_v22, %s3905_s26  ;;  %798 = vrot.lane.b32.xlu0 %v788_v18, %s3905_s26 }
 0x214   : > { %v778_v23 = vpop.permute.xlu0 %777  ;;  %v720_v24 = vpop.permute.xlu1 %719 }
 0x218   : > { %v731_v25 = vpop.permute.xlu1 %730  ;;  %v718_v26 = vpop.permute.xlu0 %717 }
 0x21c   : > { %v772_v27 = vpop.permute.xlu1 %771  ;;  %v729_v28 = vpop.permute.xlu0 %728 }
 0x220   : > { %v780_v29 = vpop.permute.xlu1 %779  ;;  %v770_v31 = vpop.permute.xlu0 %769 }
 0x224   : > { %v711_v32 = vpop.permute.xlu1 %710  ;;  %v709_v36 = vpop.permute.xlu0 %708 }
 0x225   : > { %v811_v34 = vsel %vm250_vm0, %v4126_v30, %v711_v32  ;;  %v809_v38 = vsel %vm250_vm0, %v682_v35, %v709_v36  ;;  %v3829_v32 = vld [vmem:[%s5071_s1 + $0xa0] sm:$0xff]  }
 0x226   : > { %v815_v37 = vsel %vm5098_vm4, %v811_v34, %v720_v24  ;;  %v813_v39 = vsel %vm5099_vm6, %v809_v38, %v718_v26  ;;  %vm5108_vm4 = vcmask 916480   ;;  %v3830_v34 = vld [vmem:[%s5071_s1 + $0xa8] sm:$0xff]  }
 0x227   : > { %v819_v40 = vsel %vm5100_vm7, %v815_v37, %v731_v25  ;;  %v817_v44 = vsel %vm5101_vm9, %v813_v39, %v729_v28  ;;  %vm5109_vm6 = vmmov %vm5108_vm4  ;;  %vm5110_vm7 = vsmask.f32 5376  ;;  %v3828_v28 = vld [vmem:[%s5071_s1 + $0x98] sm:$0xff]   ;;  %vm5111_vm9 = vcmask 1046528  }
 0x228   : > { %v761_v41 = vpop.permute.xlu1 %760  ;;  %v759_v46 = vpop.permute.xlu0 %758  ;;  %1305 = vmatpush1.bf16.msra.mxu0 %v3828_v28 }
 0x229   : > { %v823_v45 = vsel %vm5102_vm13, %v819_v40, %v761_v41  ;;  %v821_v30 = vsel %vm5104_vm14, %v817_v44, %v759_v46  ;;  %1306 = vmatprep.subr.bf16.mxu0 %v3898_v0  ;;  %vm5112_vm13 = vmmov %vm5110_vm7  ;;  %vm5114_vm14 = vcmask 1041408  }
 0x22a   : > { %v827_v9 = vsel %vm5103_vm15, %v823_v45, %v772_v27  ;;  %v825_v47 = vsel %vm5105_vm11, %v821_v30, %v770_v31  ;;  %vm5113_vm15 = vcmask 1043456  }
 0x22b   : > { %v831_v48 = vsel %vm5106_vm10, %v827_v9, %v780_v29  ;;  %v829_v50 = vsel %vm5107_vm12, %v825_v47, %v778_v23  ;;  %vm5115_vm11 = vmmov %vm5113_vm15  ;;  %vm5116_vm10 = vsmask.f32 7424  ;;  %vm5117_vm12 = vsmask.f32 4352 }
 0x22c   : > { %v801_v49 = vpop.permute.xlu1 %800  ;;  %v799_v52 = vpop.permute.xlu0 %798  ;;  %1307 = vmatpush1.bf16.msra.mxu0 %v3829_v32 }
 0x22d   : > { %v835_v51 = vsel %vm5108_vm4, %v831_v48, %v801_v49  ;;  %v833_v56 = vsel %vm5109_vm6, %v829_v50, %v799_v52  ;;  %1308 = vmatprep.subr.bf16.mxu0 %v3898_v0  ;;  %v3831_v49 = vld [vmem:[%s5071_s1 + $0xb0] sm:$0xff]   ;;  %vm5118_vm4 = vmmov %vm5117_vm12  ;;  %vm5119_vm6 = vsmask.f32 1280 }
 0x22e   : > { %v870_v54 = vshrl.u32 %v835_v51, 16  ;;  %v873_v55 = vshll.u32 %v835_v51, 16  ;;  %v863_v57 = vshrl.u32 %v833_v56, 16  ;;  %v866_v58 = vshll.u32 %v833_v56, 16 }
 0x230   : > { %v872_v59 = vrot.slane %v870_v54, 2  ;;  %v875_v60 = vrot.slane %v873_v55, 3  ;;  %v865_v61 = vrot.slane %v863_v57, 2  ;;  %v868_v62 = vrot.slane %v866_v58, 3  ;;  %1309 = vmatpush1.bf16.msra.mxu0 %v3830_v34 }
 0x231   : > { %1310 = vmatprep.subr.bf16.mxu0 %v3898_v0 }
 0x232   : > { %v876_v63 = vor.u32 %v875_v60, %v872_v59  ;;  %v869_v1 = vor.u32 %v868_v62, %v865_v61 }
 0x234   : > { %v877_v2 = vsel %vm5110_vm7, %v869_v1, %v876_v63  ;;  %1311 = vmatpush1.bf16.msra.mxu0 %v3831_v49  ;;  %vm5120_vm7 = vcmask 261120  }
 0x235   : > { %990 = vmatmul.mubr.bf16.vlgmr.msra.gmra.mrb[0].mxu1 %v877_v2  ;;  %1312 = vmatprep.subr.bf16.mxu0 %v3898_v0 }
 0x236   : > { %3558 = vmatprep.mubr.msk.bf16.mxu1 %vm250_vm0, %v4132_v33 }
 0x23d   : > { %998 = vmatmul.mubr.bf16.gmra.mrb[4].mxu1 %v876_v63 }
 0x308   : > { %v991_v6 = vpop.f32.mrb[0].mxu1 }
 0x309   : > { %v992_v7 = vadd.f32 %v3547_v5, %v991_v6  ;;  %v993_v4 = vpop.f32.mrb[1].mxu1 }
 0x30a   : > { %v994_v11 = vpop.f32.mrb[2].mxu1 }
 0x30b   : > { %v1005_v8 = vmul.f32 0.1, %v992_v7  ;;  %v995_v10 = vadd.f32 %v3547_v5, %v994_v11  ;;  %v996_v13 = vpop.f32.mrb[3].mxu1 }
 0x30d   : > { %v1008_v33 = vmax.f32 %v992_v7, %v1005_v8  ;;  %v1006_v14 = vmul.f32 0.1, %v995_v10  ;;  %v3832_v8 = vld [vmem:[%s5071_s1 + $0xb8] sm:$0xff]  }
 0x30e   : > { %1313 = vmatpush1.bf16.msra.mxu0 %v3832_v8 }
 0x30f   : > { %v1009_v15 = vmax.f32 %v995_v10, %v1006_v14  ;;  %v1011_v16 = vmul.f32 %v4078_v42, %v1008_v33  ;;  %1314 = vmatprep.subr.bf16.mxu0 %v3898_v0 }
 0x310   : > { %v999_v12 = vpop.f32.mrb[4].mxu1 }
 0x311   : > { %v1012_v17 = vmul.f32 %v4080_v43, %v1009_v15  ;;  %v1000_v18 = vadd.f32 %v3547_v5, %v999_v12  ;;  %v1001_v19 = vpop.f32.mrb[5].mxu1 }
 0x312   : > { %v1002_v20 = vpop.f32.mrb[6].mxu1 }
 0x313   : > { %v1014_v21 = vpack.c.bf16 %v1012_v17, %v1011_v16  ;;  %v1007_v22 = vmul.f32 0.1, %v1000_v18  ;;  %v1003_v23 = vpop.f32.mrb[7].mxu1 }
 0x315   : > { %v1018_v24 = vrot.slane %v1014_v21, 2  ;;  %v1010_v25 = vmax.f32 %v1000_v18, %v1007_v22 }
 0x317   : > { %1024 = vst.msk [vmem:[#allocation2] sm:$0xc0] %vm677_vm2, %v1018_v24  ;;  %v1013_v26 = vmul.f32 %v4084_v53, %v1010_v25 }
 0x319   : > { %v1015_v27 = vpack.c.bf16 %v1013_v26, %v1013_v26 }
 0x31b   : > { %v1019_v29 = vrot.slane %v1015_v27, 2 }
 0x31d   : > { %v1020_v31 = vsel %vm670_vm3, %v1018_v24, %v1019_v29  ;;  %1026 = vst.msk [vmem:[#allocation2 + $0x10] sm:$0x3] %vm680_vm5, %v1019_v29  ;;  %v3833_v24 = vld [vmem:[%s5071_s1 + $0xc0] sm:$0xff]  }
 0x31e   : > { %1025 = vst.msk [vmem:[#allocation2 + $0x8] sm:$0xff] %vm250_vm0, %v1020_v31  ;;  %v4233_v46 = vld [vmem:[#allocation2] sm:$0xf8]  ;;  %1315 = vmatpush1.bf16.msra.mxu0 %v3833_v24 }
 0x31f   : > { %v1059_v50 = vrot.slane %v4233_v46, 1  ;;  %v1031_v55 = vld [vmem:[#allocation2] sm:$0xe0]  ;;  %v1041_v3 = vshll.u32 %v4233_v46, 16  ;;  %1316 = vmatprep.subr.bf16.mxu0 %v3898_v0 }
 0x320   : > { %v1033_v4 = vld [vmem:[#allocation2] sm:$0xc0]  ;;  %v1068_v10 = vrot.slane %v1031_v55, 3  ;;  %v3835_v55 = vld [vmem:[%s5071_s1 + $0xd0] sm:$0xff]  }
 0x321   : > { %v1109_v18 = vrot.slane %v1033_v4, 4  ;;  %v1078_v19 = vshrl.u32 %v1033_v4, 16  ;;  %v1043_v21 = vrot.slane %v1041_v3, 1  ;;  %v1081_v23 = vshll.u32 %v1033_v4, 16  ;;  %v1027_v4 = vld [vmem:[#allocation2] sm:$0xfc] }
 0x324   : > { %v4223_v35 = vld [vmem:[#allocation2 + $0x10] sm:$0x3] }
 0x325   : > { %v1037_v36 = vld [vmem:[#allocation2 + $0x10] sm:$0x3f]  ;;  %v4225_v37 = vld [vmem:[#allocation2 + $0x8] sm:$0xff]  ;;  %v1071_v38 = vrot.slane %v4223_v35, 3  ;;  %v1095_v14 = vshrl.u32 %v4223_v35, 16  ;;  %v1098_v16 = vshll.u32 %v4223_v35, 16 }
 0x326   : > { %v4228_v39 = vld [vmem:[#allocation2 + $0x8] sm:$0xfe]  ;;  %v1150_v40 = vrot.slane %v1037_v36, 7  ;;  %v1119_v41 = vrot.slane %v4225_v37, 6  ;;  %v1060_v44 = vrot.slane %v4225_v37, 1  ;;  %v1069_v45 = vrot.slane %v4225_v37, 3 }
 0x327   : > { %v1149_v9 = vrot.slane %v4228_v39, 7  ;;  %v1034_v30 = vld [vmem:[#allocation2 + $0x10] sm:$0x7]  ;;  %v1110_v58 = vrot.slane %v4225_v37, 4  ;;  %v4247_v2 = vld [vmem:[#allocation2 + $0x8] sm:$0x7f] }
 0x328   : > { %1122 = vrot.lane.b32.xlu0 %v1119_v41, %s3899_s7  ;;  %1064 = vrot.lane.b32.xlu1 %v1060_v44, %s3900_s8  ;;  %v1072_v56 = vsel %vm364_vm1, %v1069_v45, %v1071_v38  ;;  %v1112_v59 = vrot.slane %v1034_v30, 4  ;;  %v1035_v60 = vld [vmem:[#allocation2 + $0x10] sm:$0x1f]  ;;  %v1061_v61 = vsel %vm5111_vm9, %v1059_v50, %v1060_v44  ;;  %v1086_v11 = vshrl.u32 %v4225_v37, 16  ;;  %vm5121_vm9 = vmmov %vm5120_vm7 }
 0x329   : > { %v1151_v47 = vsel %vm450_vm8, %v1149_v9, %v1150_v40  ;;  %v1224_v48 = vshrl.u32 %v1149_v9, 16  ;;  %v1227_v51 = vshll.u32 %v1149_v9, 16  ;;  %v1120_v7 = vrot.slane %v1035_v60, 6 }
 0x32a   : > { %v1232_v52 = vshrl.u32 %v1151_v47, 16  ;;  %v1235_v54 = vshll.u32 %v1151_v47, 16  ;;  %v1046_v13 = vshll.u32 %v4247_v2, 16  ;;  %v1089_v33 = vshll.u32 %v4225_v37, 16 }
 0x32b   : > { %v1226_v57 = vrot.slane %v1224_v48, 2  ;;  %v1229_v62 = vrot.slane %v1227_v51, 3  ;;  %v1113_v12 = vsel %vm5113_vm15, %v1110_v58, %v1112_v59  ;;  %v1070_v17 = vsel %vm364_vm1, %v1068_v10, %v1069_v45 }
 0x32c   : > { %v1234_v63 = vrot.slane %v1232_v52, 2  ;;  %v1237_v1 = vrot.slane %v1235_v54, 3  ;;  %1075 = vrot.lane.b32.xlu1 %v1072_v56, %s3901_s11  ;;  %1062 = vrot.lane.b32.xlu0 %v1061_v61, %s3900_s8  ;;  %v1121_v20 = vsel %vm5114_vm14, %v1119_v41, %v1120_v7  ;;  %v1088_v22 = vrot.slane %v1086_v11, 3 }
 0x32d   : > { %v1230_v5 = vor.u32 %v1229_v62, %v1226_v57  ;;  %v1048_v25 = vrot.slane %v1046_v13, 1  ;;  %v1091_v26 = vrot.slane %v1089_v33, 4  ;;  %v1097_v27 = vrot.slane %v1095_v14, 3 }
 0x32e   : > { %v4253_v6 = vor.u32 %v1237_v1, %v1234_v63  ;;  %v1127_v28 = vshrl.u32 %v4228_v39, 16  ;;  %v1100_v29 = vrot.slane %v1098_v16, 4  ;;  %v1130_v31 = vshll.u32 %v4228_v39, 16 }
 0x32f   : > { %v1135_v32 = vshrl.u32 %v1035_v60, 16  ;;  %v1138_v34 = vshll.u32 %v1035_v60, 16  ;;  %v1111_v35 = vsel %vm5115_vm11, %v1109_v18, %v1110_v58  ;;  %v1050_v36 = vshrl.u32 %v4247_v2, 16 }
 0x330   : > { %v1239_v15 = vsel %vm5112_vm13, %v1230_v5, %v4253_v6  ;;  %1116 = vrot.lane.b32.xlu1 %v1113_v12, %s3902_s14  ;;  %1073 = vrot.lane.b32.xlu0 %v1070_v17, %s3901_s11  ;;  %v1039_v37 = vshrl.u32 %v4233_v46, 16  ;;  %v1080_v38 = vrot.slane %v1078_v19, 3  ;;  %v1083_v40 = vrot.slane %v1081_v23, 4  ;;  %v3834_v46 = vld [vmem:[%s5071_s1 + $0xc8] sm:$0xff]  }
 0x331   : > { %3588 = vmatprep.mubr.msk.bf16.mxu0 %vm250_vm0, %v1239_v15  ;;  %v1052_v41 = vor.u32 %v1050_v36, %v1048_v25  ;;  %v1092_v39 = vor.u32 %v1091_v26, %v1088_v22  ;;  %v1129_v45 = vrot.slane %v1127_v28, 6  ;;  %v1101_v9 = vor.u32 %v1100_v29, %v1097_v27  ;;  %1317 = vmatpush1.bf16.msra.mxu0 %v3834_v46 }
 0x332   : > { %v1044_v44 = vor.u32 %v1043_v21, %v1039_v37  ;;  %v1132_v30 = vrot.slane %v1130_v31, 7  ;;  %v1137_v47 = vrot.slane %v1135_v32, 6  ;;  %v1140_v48 = vrot.slane %v1138_v34, 7  ;;  %1318 = vmatprep.subr.bf16.mxu0 %v3898_v0 }
 0x333   : > { %v1084_v50 = vor.u32 %v1083_v40, %v1080_v38  ;;  %v1102_v51 = vsel %vm5117_vm12, %v1092_v39, %v1101_v9  ;;  %vm5122_vm13 = vcmask 392192   ;;  %vm5124_vm14 = vcmask 523264   ;;  %v3836_v38 = vld [vmem:[%s5071_s1 + $0xd8] sm:$0xff]   ;;  %v3578_v40 = vld [vmem:[%s5072_s2 + $0x2] ss:$0 sm:$0xff] }
 0x334   : > { %1124 = vrot.lane.b32.xlu1 %v1121_v20, %s3899_s7  ;;  %1114 = vrot.lane.b32.xlu0 %v1111_v35, %s3902_s14  ;;  %v1049_v49 = vsel %vm5116_vm10, %v1044_v44, %v1048_v25  ;;  %v1133_v52 = vor.u32 %v1132_v30, %v1129_v45  ;;  %v1141_v54 = vor.u32 %v1140_v48, %v1137_v47  ;;  %vm5123_vm15 = vmmov %vm5122_vm13  ;;  %vm5125_vm11 = vcmask 654336  }
 0x335   : > { %v1093_v56 = vsel %vm5118_vm4, %v1084_v50, %v1092_v39  ;;  %1319 = vmatpush1.bf16.msra.mxu0 %v3835_v55  ;;  %vm5126_vm10 = vmmov %vm5124_vm14  ;;  %vm5128_vm4 = vcmask 785408   ;;  %1648 = vmatpush1.bf16.msra.mxu1 %v3836_v38 }
 0x336   : > { %v1142_v57 = vsel %vm5119_vm6, %v1133_v52, %v1141_v54  ;;  %1992 = vmatprep.subr.bf16.mxu0 %v3898_v0  ;;  %vm5127_vm12 = vmmov %vm5125_vm11  ;;  %1649 = vmatprep.subr.bf16.mxu1 %v3898_v0 }
 0x337   : > { %vm5129_vm6 = vmmov %vm5128_vm4 }
 0x338   : > { %1055 = vrot.lane.b32.xlu1 %v1052_v41, %s3903_s17  ;;  %1053 = vrot.lane.b32.xlu0 %v1049_v49, %s3903_s17 }
 0x33c   : > { %1105 = vrot.lane.b32.xlu1 %v1102_v51, %s3904_s25  ;;  %1103 = vrot.lane.b32.xlu0 %v1093_v56, %s3904_s25 }
 0x340   : > { %1145 = vrot.lane.b32.xlu1 %v1142_v57, %s3905_s26  ;;  %1143 = vrot.lane.b32.xlu0 %v1133_v52, %s3905_s26 }
 0x39a   : > { %v1123_v58 = vpop.permute.xlu0 %1122  ;;  %v1065_v59 = vpop.permute.xlu1 %1064 }
 0x39e   : > { %v1076_v60 = vpop.permute.xlu1 %1075  ;;  %v1063_v61 = vpop.permute.xlu0 %1062 }
 0x3a2   : > { %v1117_v62 = vpop.permute.xlu1 %1116  ;;  %v1074_v63 = vpop.permute.xlu0 %1073 }
 0x3a6   : > { %v1125_v1 = vpop.permute.xlu1 %1124  ;;  %v1115_v3 = vpop.permute.xlu0 %1114 }
 0x3aa   : > { %v1056_v5 = vpop.permute.xlu1 %1055  ;;  %v1054_v11 = vpop.permute.xlu0 %1053 }
 0x3ab   : > { %v1156_v7 = vsel %vm250_vm0, %v4247_v2, %v1056_v5  ;;  %v1154_v10 = vsel %vm250_vm0, %v1027_v4, %v1054_v11  ;;  %v3838_v5 = vld [vmem:[%s5071_s1 + $0xe8] sm:$0xff]  }
 0x3ac   : > { %v1160_v8 = vsel %vm5120_vm7, %v1156_v7, %v1065_v59  ;;  %v1158_v13 = vsel %vm5121_vm9, %v1154_v10, %v1063_v61  ;;  %vm5130_vm7 = vcmask 916480   ;;  %v3839_v7 = vld [vmem:[%s5071_s1 + $0xf0] sm:$0xff]  }
 0x3ad   : > { %v1164_v33 = vsel %vm5122_vm13, %v1160_v8, %v1076_v60  ;;  %v1162_v15 = vsel %vm5123_vm15, %v1158_v13, %v1074_v63  ;;  %vm5131_vm9 = vmmov %vm5130_vm7  ;;  %vm5132_vm13 = vsmask.f32 5376  ;;  %v3837_v63 = vld [vmem:[%s5071_s1 + $0xe0] sm:$0xff]   ;;  %vm5133_vm15 = vcmask 1046528  }
 0x3ae   : > { %v1106_v14 = vpop.permute.xlu1 %1105  ;;  %v1104_v16 = vpop.permute.xlu0 %1103  ;;  %1650 = vmatpush1.bf16.msra.mxu1 %v3837_v63 }
 0x3af   : > { %v1168_v12 = vsel %vm5124_vm14, %v1164_v33, %v1106_v14  ;;  %v1166_v2 = vsel %vm5126_vm10, %v1162_v15, %v1104_v16  ;;  %1651 = vmatprep.subr.bf16.mxu1 %v3898_v0  ;;  %vm5134_vm14 = vmmov %vm5132_vm13  ;;  %vm5136_vm10 = vcmask 1041408  }
 0x3b0   : > { %v1172_v17 = vsel %vm5125_vm11, %v1168_v12, %v1117_v62  ;;  %v1170_v18 = vsel %vm5127_vm12, %v1166_v2, %v1115_v3  ;;  %vm5135_vm11 = vcmask 1043456  }
 0x3b1   : > { %v1176_v19 = vsel %vm5128_vm4, %v1172_v17, %v1125_v1  ;;  %v1174_v21 = vsel %vm5129_vm6, %v1170_v18, %v1123_v58  ;;  %vm5137_vm12 = vmmov %vm5135_vm11  ;;  %vm5138_vm4 = vsmask.f32 7424  ;;  %vm5139_vm6 = vsmask.f32 4352 }
 0x3b2   : > { %v1146_v20 = vpop.permute.xlu1 %1145  ;;  %v1144_v23 = vpop.permute.xlu0 %1143  ;;  %1652 = vmatpush1.bf16.msra.mxu1 %v3838_v5 }
 0x3b3   : > { %v1180_v22 = vsel %vm5130_vm7, %v1176_v19, %v1146_v20  ;;  %v1178_v26 = vsel %vm5131_vm9, %v1174_v21, %v1144_v23  ;;  %1653 = vmatprep.subr.bf16.mxu1 %v3898_v0  ;;  %v3840_v20 = vld [vmem:[%s5071_s1 + $0xf8] sm:$0xff]   ;;  %vm5140_vm7 = vmmov %vm5139_vm6  ;;  %vm5141_vm9 = vsmask.f32 1280 }
 0x3b4   : > { %v1215_v24 = vshrl.u32 %v1180_v22, 16  ;;  %v1218_v25 = vshll.u32 %v1180_v22, 16  ;;  %v1208_v27 = vshrl.u32 %v1178_v26, 16  ;;  %v1211_v28 = vshll.u32 %v1178_v26, 16 }
 0x3b6   : > { %v1217_v29 = vrot.slane %v1215_v24, 2  ;;  %v1220_v31 = vrot.slane %v1218_v25, 3  ;;  %v1210_v32 = vrot.slane %v1208_v27, 2  ;;  %v1213_v34 = vrot.slane %v1211_v28, 3  ;;  %1654 = vmatpush1.bf16.msra.mxu1 %v3839_v7 }
 0x3b7   : > { %1655 = vmatprep.subr.bf16.mxu1 %v3898_v0 }
 0x3b8   : > { %v1221_v35 = vor.u32 %v1220_v31, %v1217_v29  ;;  %v1214_v36 = vor.u32 %v1213_v34, %v1210_v32 }
 0x3ba   : > { %v1222_v37 = vsel %vm5132_vm13, %v1214_v36, %v1221_v35  ;;  %1656 = vmatpush1.bf16.msra.mxu1 %v3840_v20  ;;  %vm5142_vm13 = vcmask 261120  }
 0x3bb   : > { %1335 = vmatmul.mubr.bf16.vlgmr.msra.gmra.mrb[8].mxu0 %v1222_v37  ;;  %1657 = vmatprep.subr.bf16.mxu1 %v3898_v0 }
 0x3bc   : > { %3589 = vmatprep.mubr.msk.bf16.mxu0 %vm250_vm0, %v4253_v6 }
 0x3c3   : > { %1343 = vmatmul.mubr.bf16.gmra.mrb[12].mxu0 %v1221_v35 }
 0x48e   : > { %v1336_v41 = vpop.f32.mrb[8].mxu0 }
 0x48f   : > { %v1337_v44 = vadd.f32 %v3578_v40, %v1336_v41  ;;  %v1338_v39 = vpop.f32.mrb[9].mxu0 }
 0x490   : > { %v1339_v45 = vpop.f32.mrb[10].mxu0 }
 0x491   : > { %v1350_v9 = vmul.f32 0.1, %v1337_v44  ;;  %v1340_v30 = vadd.f32 %v3578_v40, %v1339_v45  ;;  %v1341_v47 = vpop.f32.mrb[11].mxu0 }
 0x493   : > { %v1353_v6 = vmax.f32 %v1337_v44, %v1350_v9  ;;  %v1351_v48 = vmul.f32 0.1, %v1340_v30  ;;  %v3841_v9 = vld [vmem:[%s5071_s1 + $0x100] sm:$0xff]  }
 0x494   : > { %1658 = vmatpush1.bf16.msra.mxu1 %v3841_v9 }
 0x495   : > { %v1354_v49 = vmax.f32 %v1340_v30, %v1351_v48  ;;  %v1356_v50 = vmul.f32 %v4078_v42, %v1353_v6  ;;  %1659 = vmatprep.subr.bf16.mxu1 %v3898_v0 }
 0x496   : > { %v1344_v46 = vpop.f32.mrb[12].mxu0 }
 0x497   : > { %v1357_v51 = vmul.f32 %v4080_v43, %v1354_v49  ;;  %v1345_v52 = vadd.f32 %v3578_v40, %v1344_v46  ;;  %v1346_v54 = vpop.f32.mrb[13].mxu0 }
 0x498   : > { %v1347_v55 = vpop.f32.mrb[14].mxu0 }
 0x499   : > { %v1359_v56 = vpack.c.bf16 %v1357_v51, %v1356_v50  ;;  %v1352_v57 = vmul.f32 0.1, %v1345_v52  ;;  %v1348_v58 = vpop.f32.mrb[15].mxu0 }
 0x49b   : > { %v1363_v59 = vrot.slane %v1359_v56, 2  ;;  %v1355_v60 = vmax.f32 %v1345_v52, %v1352_v57 }
 0x49d   : > { %1369 = vst.msk [vmem:[#allocation2] sm:$0xc0] %vm677_vm2, %v1363_v59  ;;  %v1358_v61 = vmul.f32 %v4084_v53, %v1355_v60 }
 0x49f   : > { %v1360_v62 = vpack.c.bf16 %v1358_v61, %v1358_v61 }
 0x4a1   : > { %v1364_v1 = vrot.slane %v1360_v62, 2 }
 0x4a3   : > { %v1365_v3 = vsel %vm670_vm3, %v1363_v59, %v1364_v1  ;;  %1371 = vst.msk [vmem:[#allocation2 + $0x10] sm:$0x3] %vm680_vm5, %v1364_v1  ;;  %v3842_v59 = vld [vmem:[%s5071_s1 + $0x108] sm:$0xff]  }
 0x4a4   : > { %1370 = vst.msk [vmem:[#allocation2 + $0x8] sm:$0xff] %vm250_vm0, %v1365_v3  ;;  %v4354_v16 = vld [vmem:[#allocation2] sm:$0xf8]  ;;  %1660 = vmatpush1.bf16.msra.mxu1 %v3842_v59 }
 0x4a5   : > { %v1404_v21 = vrot.slane %v4354_v16, 1  ;;  %v1376_v25 = vld [vmem:[#allocation2] sm:$0xe0]  ;;  %v1386_v38 = vshll.u32 %v4354_v16, 16  ;;  %1661 = vmatprep.subr.bf16.mxu1 %v3898_v0 }
 0x4a6   : > { %v1378_v39 = vld [vmem:[#allocation2] sm:$0xc0]  ;;  %v1413_v30 = vrot.slane %v1376_v25, 3  ;;  %v3844_v25 = vld [vmem:[%s5071_s1 + $0x118] sm:$0xff]  }
 0x4a7   : > { %v1454_v52 = vrot.slane %v1378_v39, 4  ;;  %v1423_v54 = vshrl.u32 %v1378_v39, 16  ;;  %v1388_v56 = vrot.slane %v1386_v38, 1  ;;  %v1426_v58 = vshll.u32 %v1378_v39, 16  ;;  %v1372_v39 = vld [vmem:[#allocation2] sm:$0xfc] }
 0x4aa   : > { %v4344_v4 = vld [vmem:[#allocation2 + $0x10] sm:$0x3] }
 0x4ab   : > { %v1382_v11 = vld [vmem:[#allocation2 + $0x10] sm:$0x3f]  ;;  %v4346_v8 = vld [vmem:[#allocation2 + $0x8] sm:$0xff]  ;;  %v1416_v10 = vrot.slane %v4344_v4, 3  ;;  %v1440_v48 = vshrl.u32 %v4344_v4, 16  ;;  %v1443_v50 = vshll.u32 %v4344_v4, 16 }
 0x4ac   : > { %v4349_v13 = vld [vmem:[#allocation2 + $0x8] sm:$0xfe]  ;;  %v1495_v33 = vrot.slane %v1382_v11, 7  ;;  %v1464_v14 = vrot.slane %v4346_v8, 6  ;;  %v1405_v15 = vrot.slane %v4346_v8, 1  ;;  %v1414_v12 = vrot.slane %v4346_v8, 3 }
 0x4ad   : > { %v1494_v17 = vrot.slane %v4349_v13, 7  ;;  %v1379_v2 = vld [vmem:[#allocation2 + $0x10] sm:$0x7]  ;;  %v1455_v28 = vrot.slane %v4346_v8, 4  ;;  %v4368_v37 = vld [vmem:[#allocation2 + $0x8] sm:$0x7f] }
 0x4ae   : > { %1467 = vrot.lane.b32.xlu0 %v1464_v14, %s3899_s7  ;;  %1409 = vrot.lane.b32.xlu1 %v1405_v15, %s3900_s8  ;;  %v1417_v26 = vsel %vm364_vm1, %v1414_v12, %v1416_v10  ;;  %v1457_v29 = vrot.slane %v1379_v2, 4  ;;  %v1380_v31 = vld [vmem:[#allocation2 + $0x10] sm:$0x1f]  ;;  %v1406_v32 = vsel %vm5133_vm15, %v1404_v21, %v1405_v15  ;;  %v1431_v45 = vshrl.u32 %v4346_v8, 16  ;;  %vm5143_vm15 = vmmov %vm5142_vm13 }
 0x4af   : > { %v1496_v18 = vsel %vm450_vm8, %v1494_v17, %v1495_v33  ;;  %v1569_v19 = vshrl.u32 %v1494_v17, 16  ;;  %v1572_v22 = vshll.u32 %v1494_v17, 16  ;;  %v1465_v44 = vrot.slane %v1380_v31, 6 }
 0x4b0   : > { %v1577_v23 = vshrl.u32 %v1496_v18, 16  ;;  %v1580_v24 = vshll.u32 %v1496_v18, 16  ;;  %v1391_v47 = vshll.u32 %v4368_v37, 16  ;;  %v1434_v6 = vshll.u32 %v4346_v8, 16 }
 0x4b1   : > { %v1571_v27 = vrot.slane %v1569_v19, 2  ;;  %v1574_v34 = vrot.slane %v1572_v22, 3  ;;  %v1458_v46 = vsel %vm5135_vm11, %v1455_v28, %v1457_v29  ;;  %v1415_v51 = vsel %vm364_vm1, %v1413_v30, %v1414_v12 }
 0x4b2   : > { %v1579_v35 = vrot.slane %v1577_v23, 2  ;;  %v1582_v36 = vrot.slane %v1580_v24, 3  ;;  %1420 = vrot.lane.b32.xlu1 %v1417_v26, %s3901_s11  ;;  %1407 = vrot.lane.b32.xlu0 %v1406_v32, %s3900_s8  ;;  %v1466_v55 = vsel %vm5136_vm10, %v1464_v14, %v1465_v44  ;;  %v1433_v57 = vrot.slane %v1431_v45, 3 }
 0x4b3   : > { %v1575_v40 = vor.u32 %v1574_v34, %v1571_v27  ;;  %v1393_v60 = vrot.slane %v1391_v47, 1  ;;  %v1436_v61 = vrot.slane %v1434_v6, 4  ;;  %v1442_v62 = vrot.slane %v1440_v48, 3 }
 0x4b4   : > { %v4374_v41 = vor.u32 %v1582_v36, %v1579_v35  ;;  %v1472_v63 = vshrl.u32 %v4349_v13, 16  ;;  %v1445_v1 = vrot.slane %v1443_v50, 4  ;;  %v1475_v3 = vshll.u32 %v4349_v13, 16 }
 0x4b5   : > { %v1480_v5 = vshrl.u32 %v1380_v31, 16  ;;  %v1483_v7 = vshll.u32 %v1380_v31, 16  ;;  %v1456_v4 = vsel %vm5137_vm12, %v1454_v52, %v1455_v28  ;;  %v1395_v11 = vshrl.u32 %v4368_v37, 16 }
 0x4b6   : > { %v1584_v49 = vsel %vm5134_vm14, %v1575_v40, %v4374_v41  ;;  %1461 = vrot.lane.b32.xlu1 %v1458_v46, %s3902_s14  ;;  %1418 = vrot.lane.b32.xlu0 %v1415_v51, %s3901_s11  ;;  %v1384_v8 = vshrl.u32 %v4354_v16, 16  ;;  %v1425_v10 = vrot.slane %v1423_v54, 3  ;;  %v1428_v33 = vrot.slane %v1426_v58, 4  ;;  %v3843_v16 = vld [vmem:[%s5071_s1 + $0x110] sm:$0xff]  }
 0x4b7   : > { %3619 = vmatprep.mubr.msk.bf16.mxu1 %vm250_vm0, %v1584_v49  ;;  %v1397_v14 = vor.u32 %v1395_v11, %v1393_v60  ;;  %v1437_v13 = vor.u32 %v1436_v61, %v1433_v57  ;;  %v1474_v12 = vrot.slane %v1472_v63, 6  ;;  %v1446_v17 = vor.u32 %v1445_v1, %v1442_v62  ;;  %1662 = vmatpush1.bf16.msra.mxu1 %v3843_v16 }
 0x4b8   : > { %v1389_v15 = vor.u32 %v1388_v56, %v1384_v8  ;;  %v1477_v2 = vrot.slane %v1475_v3, 7  ;;  %v1482_v18 = vrot.slane %v1480_v5, 6  ;;  %v1485_v19 = vrot.slane %v1483_v7, 7  ;;  %1663 = vmatprep.subr.bf16.mxu1 %v3898_v0 }
 0x4b9   : > { %v1429_v21 = vor.u32 %v1428_v33, %v1425_v10  ;;  %v1447_v22 = vsel %vm5139_vm6, %v1437_v13, %v1446_v17  ;;  %vm5144_vm14 = vcmask 392192   ;;  %vm5146_vm10 = vcmask 523264   ;;  %v3845_v10 = vld [vmem:[%s5071_s1 + $0x120] sm:$0xff]  }
 0x4ba   : > { %1469 = vrot.lane.b32.xlu1 %v1466_v55, %s3899_s7  ;;  %1459 = vrot.lane.b32.xlu0 %v1456_v4, %s3902_s14  ;;  %v1394_v20 = vsel %vm5138_vm4, %v1389_v15, %v1393_v60  ;;  %v1478_v23 = vor.u32 %v1477_v2, %v1474_v12  ;;  %v1486_v24 = vor.u32 %v1485_v19, %v1482_v18  ;;  %vm5145_vm11 = vmmov %vm5144_vm14  ;;  %vm5147_vm12 = vcmask 654336   ;;  %v3609_v33 = vld [vmem:[%s5072_s2 + $0x3] ss:$0 sm:$0xff] }
 0x4bb   : > { %v1438_v26 = vsel %vm5140_vm7, %v1429_v21, %v1437_v13  ;;  %1664 = vmatpush1.bf16.msra.mxu1 %v3844_v25  ;;  %vm5148_vm4 = vmmov %vm5146_vm10  ;;  %vm5150_vm7 = vcmask 785408   ;;  %1993 = vmatpush1.bf16.msra.mxu0 %v3845_v10 }
 0x4bc   : > { %v1487_v27 = vsel %vm5141_vm9, %v1478_v23, %v1486_v24  ;;  %2337 = vmatprep.subr.bf16.mxu1 %v3898_v0  ;;  %vm5149_vm6 = vmmov %vm5147_vm12  ;;  %1994 = vmatprep.subr.bf16.mxu0 %v3898_v0 }
 0x4bd   : > { %vm5151_vm9 = vmmov %vm5150_vm7 }
 0x4be   : > { %1400 = vrot.lane.b32.xlu1 %v1397_v14, %s3903_s17  ;;  %1398 = vrot.lane.b32.xlu0 %v1394_v20, %s3903_s17 }
 0x4c2   : > { %1450 = vrot.lane.b32.xlu1 %v1447_v22, %s3904_s25  ;;  %1448 = vrot.lane.b32.xlu0 %v1438_v26, %s3904_s25 }
 0x4c6   : > { %1490 = vrot.lane.b32.xlu1 %v1487_v27, %s3905_s26  ;;  %1488 = vrot.lane.b32.xlu0 %v1478_v23, %s3905_s26 }
 0x520   : > { %v1468_v28 = vpop.permute.xlu0 %1467  ;;  %v1410_v29 = vpop.permute.xlu1 %1409 }
 0x524   : > { %v1421_v31 = vpop.permute.xlu1 %1420  ;;  %v1408_v32 = vpop.permute.xlu0 %1407 }
 0x528   : > { %v1462_v34 = vpop.permute.xlu1 %1461  ;;  %v1419_v35 = vpop.permute.xlu0 %1418 }
 0x52c   : > { %v1470_v36 = vpop.permute.xlu1 %1469  ;;  %v1460_v38 = vpop.permute.xlu0 %1459 }
 0x530   : > { %v1401_v40 = vpop.permute.xlu1 %1400  ;;  %v1399_v45 = vpop.permute.xlu0 %1398 }
 0x531   : > { %v1501_v44 = vsel %vm250_vm0, %v4368_v37, %v1401_v40  ;;  %v1499_v30 = vsel %vm250_vm0, %v1372_v39, %v1399_v45  ;;  %v3847_v40 = vld [vmem:[%s5071_s1 + $0x130] sm:$0xff]  }
 0x532   : > { %v1505_v9 = vsel %vm5142_vm13, %v1501_v44, %v1410_v29  ;;  %v1503_v47 = vsel %vm5143_vm15, %v1499_v30, %v1408_v32  ;;  %vm5152_vm13 = vcmask 916480   ;;  %v3848_v44 = vld [vmem:[%s5071_s1 + $0x138] sm:$0xff]  }
 0x533   : > { %v1509_v6 = vsel %vm5144_vm14, %v1505_v9, %v1421_v31  ;;  %v1507_v49 = vsel %vm5145_vm11, %v1503_v47, %v1419_v35  ;;  %vm5153_vm15 = vmmov %vm5152_vm13  ;;  %vm5154_vm14 = vsmask.f32 5376  ;;  %v3846_v35 = vld [vmem:[%s5071_s1 + $0x128] sm:$0xff]   ;;  %vm5155_vm11 = vcmask 1046528  }
 0x534   : > { %v1451_v48 = vpop.permute.xlu1 %1450  ;;  %v1449_v50 = vpop.permute.xlu0 %1448  ;;  %1995 = vmatpush1.bf16.msra.mxu0 %v3846_v35 }
 0x535   : > { %v1513_v46 = vsel %vm5146_vm10, %v1509_v6, %v1451_v48  ;;  %v1511_v37 = vsel %vm5148_vm4, %v1507_v49, %v1449_v50  ;;  %1996 = vmatprep.subr.bf16.mxu0 %v3898_v0  ;;  %vm5156_vm10 = vmmov %vm5154_vm14  ;;  %vm5158_vm4 = vcmask 1041408  }
 0x536   : > { %v1517_v51 = vsel %vm5147_vm12, %v1513_v46, %v1462_v34  ;;  %v1515_v52 = vsel %vm5149_vm6, %v1511_v37, %v1460_v38  ;;  %vm5157_vm12 = vcmask 1043456  }
 0x537   : > { %v1521_v54 = vsel %vm5150_vm7, %v1517_v51, %v1470_v36  ;;  %v1519_v56 = vsel %vm5151_vm9, %v1515_v52, %v1468_v28  ;;  %vm5159_vm6 = vmmov %vm5157_vm12  ;;  %vm5160_vm7 = vsmask.f32 7424  ;;  %vm5161_vm9 = vsmask.f32 4352 }
 0x538   : > { %v1491_v55 = vpop.permute.xlu1 %1490  ;;  %v1489_v58 = vpop.permute.xlu0 %1488  ;;  %1997 = vmatpush1.bf16.msra.mxu0 %v3847_v40 }
 0x539   : > { %v1525_v57 = vsel %vm5152_vm13, %v1521_v54, %v1491_v55  ;;  %v1523_v61 = vsel %vm5153_vm15, %v1519_v56, %v1489_v58  ;;  %1998 = vmatprep.subr.bf16.mxu0 %v3898_v0  ;;  %v3849_v55 = vld [vmem:[%s5071_s1 + $0x140] sm:$0xff]   ;;  %vm5162_vm13 = vmmov %vm5161_vm9  ;;  %vm5163_vm15 = vsmask.f32 1280 }
 0x53a   : > { %v1560_v59 = vshrl.u32 %v1525_v57, 16  ;;  %v1563_v60 = vshll.u32 %v1525_v57, 16  ;;  %v1553_v62 = vshrl.u32 %v1523_v61, 16  ;;  %v1556_v63 = vshll.u32 %v1523_v61, 16 }
 0x53c   : > { %v1562_v1 = vrot.slane %v1560_v59, 2  ;;  %v1565_v3 = vrot.slane %v1563_v60, 3  ;;  %v1555_v5 = vrot.slane %v1553_v62, 2  ;;  %v1558_v7 = vrot.slane %v1556_v63, 3  ;;  %1999 = vmatpush1.bf16.msra.mxu0 %v3848_v44 }
 0x53d   : > { %2000 = vmatprep.subr.bf16.mxu0 %v3898_v0 }
 0x53e   : > { %v1566_v4 = vor.u32 %v1565_v3, %v1562_v1  ;;  %v1559_v11 = vor.u32 %v1558_v7, %v1555_v5 }
 0x540   : > { %v1567_v8 = vsel %vm5154_vm14, %v1559_v11, %v1566_v4  ;;  %2001 = vmatpush1.bf16.msra.mxu0 %v3849_v55  ;;  %vm5164_vm14 = vcmask 261120  }
 0x541   : > { %1680 = vmatmul.mubr.bf16.vlgmr.msra.gmra.mrb[8].mxu1 %v1567_v8  ;;  %2002 = vmatprep.subr.bf16.mxu0 %v3898_v0 }
 0x542   : > { %3620 = vmatprep.mubr.msk.bf16.mxu1 %vm250_vm0, %v4374_v41 }
 0x549   : > { %1688 = vmatmul.mubr.bf16.gmra.mrb[12].mxu1 %v1566_v4 }
 0x614   : > { %v1681_v14 = vpop.f32.mrb[8].mxu1 }
 0x615   : > { %v1682_v15 = vadd.f32 %v3609_v33, %v1681_v14  ;;  %v1683_v13 = vpop.f32.mrb[9].mxu1 }
 0x616   : > { %v1684_v12 = vpop.f32.mrb[10].mxu1 }
 0x617   : > { %v1695_v17 = vmul.f32 0.1, %v1682_v15  ;;  %v1685_v2 = vadd.f32 %v3609_v33, %v1684_v12  ;;  %v1686_v18 = vpop.f32.mrb[11].mxu1 }
 0x619   : > { %v1698_v41 = vmax.f32 %v1682_v15, %v1695_v17  ;;  %v1696_v19 = vmul.f32 0.1, %v1685_v2  ;;  %v3850_v17 = vld [vmem:[%s5071_s1 + $0x148] sm:$0xff]  }
 0x61a   : > { %2003 = vmatpush1.bf16.msra.mxu0 %v3850_v17 }
 0x61b   : > { %v1699_v20 = vmax.f32 %v1685_v2, %v1696_v19  ;;  %v1701_v21 = vmul.f32 %v4078_v42, %v1698_v41  ;;  %2004 = vmatprep.subr.bf16.mxu0 %v3898_v0 }
 0x61c   : > { %v1689_v16 = vpop.f32.mrb[12].mxu1 }
 0x61d   : > { %v1702_v22 = vmul.f32 %v4080_v43, %v1699_v20  ;;  %v1690_v23 = vadd.f32 %v3609_v33, %v1689_v16  ;;  %v1691_v24 = vpop.f32.mrb[13].mxu1 }
 0x61e   : > { %v1692_v25 = vpop.f32.mrb[14].mxu1 }
 0x61f   : > { %v1704_v26 = vpack.c.bf16 %v1702_v22, %v1701_v21  ;;  %v1697_v27 = vmul.f32 0.1, %v1690_v23  ;;  %v1693_v28 = vpop.f32.mrb[15].mxu1 }
 0x621   : > { %v1708_v29 = vrot.slane %v1704_v26, 2  ;;  %v1700_v31 = vmax.f32 %v1690_v23, %v1697_v27 }
 0x623   : > { %1714 = vst.msk [vmem:[#allocation2] sm:$0xc0] %vm677_vm2, %v1708_v29  ;;  %v1703_v32 = vmul.f32 %v4084_v53, %v1700_v31 }
 0x625   : > { %v1705_v34 = vpack.c.bf16 %v1703_v32, %v1703_v32 }
 0x627   : > { %v1709_v36 = vrot.slane %v1705_v34, 2 }
 0x629   : > { %v1710_v38 = vsel %vm670_vm3, %v1708_v29, %v1709_v36  ;;  %1716 = vst.msk [vmem:[#allocation2 + $0x10] sm:$0x3] %vm680_vm5, %v1709_v36  ;;  %v3851_v29 = vld [vmem:[%s5071_s1 + $0x150] sm:$0xff]  }
 0x62a   : > { %1715 = vst.msk [vmem:[#allocation2 + $0x8] sm:$0xff] %vm250_vm0, %v1710_v38  ;;  %v4475_v50 = vld [vmem:[#allocation2] sm:$0xf8]  ;;  %2005 = vmatpush1.bf16.msra.mxu0 %v3851_v29 }
 0x62b   : > { %v1749_v56 = vrot.slane %v4475_v50, 1  ;;  %v1721_v60 = vld [vmem:[#allocation2] sm:$0xe0]  ;;  %v1731_v10 = vshll.u32 %v4475_v50, 16  ;;  %2006 = vmatprep.subr.bf16.mxu0 %v3898_v0 }
 0x62c   : > { %v1723_v13 = vld [vmem:[#allocation2] sm:$0xc0]  ;;  %v1758_v2 = vrot.slane %v1721_v60, 3 }
 0x62d   : > { %v1799_v23 = vrot.slane %v1723_v13, 4  ;;  %v1768_v24 = vshrl.u32 %v1723_v13, 16  ;;  %v1733_v26 = vrot.slane %v1731_v10, 1  ;;  %v1771_v28 = vshll.u32 %v1723_v13, 16  ;;  %v3853_v60 = vld [vmem:[%s5071_s1 + $0x160] sm:$0xff]  }
 0x62e   : > { %v1717_v13 = vld [vmem:[#allocation2] sm:$0xfc] }
 0x630   : > { %v4465_v39 = vld [vmem:[#allocation2 + $0x10] sm:$0x3] }
 0x631   : > { %v1727_v45 = vld [vmem:[#allocation2 + $0x10] sm:$0x3f]  ;;  %v4467_v9 = vld [vmem:[#allocation2 + $0x8] sm:$0xff]  ;;  %v1761_v30 = vrot.slane %v4465_v39, 3  ;;  %v1785_v19 = vshrl.u32 %v4465_v39, 16  ;;  %v1788_v21 = vshll.u32 %v4465_v39, 16 }
 0x632   : > { %v4470_v47 = vld [vmem:[#allocation2 + $0x8] sm:$0xfe]  ;;  %v1840_v6 = vrot.slane %v1727_v45, 7  ;;  %v1809_v48 = vrot.slane %v4467_v9, 6  ;;  %v1750_v49 = vrot.slane %v4467_v9, 1  ;;  %v1759_v46 = vrot.slane %v4467_v9, 3 }
 0x633   : > { %v1839_v51 = vrot.slane %v4470_v47, 7  ;;  %v1724_v37 = vld [vmem:[#allocation2 + $0x10] sm:$0x7]  ;;  %v1800_v63 = vrot.slane %v4467_v9, 4  ;;  %v4489_v8 = vld [vmem:[#allocation2 + $0x8] sm:$0x7f] }
 0x634   : > { %1812 = vrot.lane.b32.xlu0 %v1809_v48, %s3899_s7  ;;  %1754 = vrot.lane.b32.xlu1 %v1750_v49, %s3900_s8  ;;  %v1762_v61 = vsel %vm364_vm1, %v1759_v46, %v1761_v30  ;;  %v1802_v1 = vrot.slane %v1724_v37, 4  ;;  %v1725_v3 = vld [vmem:[#allocation2 + $0x10] sm:$0x1f]  ;;  %v1751_v5 = vsel %vm5155_vm11, %v1749_v56, %v1750_v49  ;;  %v1776_v12 = vshrl.u32 %v4467_v9, 16  ;;  %vm5165_vm11 = vmmov %vm5164_vm14 }
 0x635   : > { %v1841_v52 = vsel %vm450_vm8, %v1839_v51, %v1840_v6  ;;  %v1914_v54 = vshrl.u32 %v1839_v51, 16  ;;  %v1917_v57 = vshll.u32 %v1839_v51, 16  ;;  %v1810_v15 = vrot.slane %v1725_v3, 6 }
 0x636   : > { %v1922_v58 = vshrl.u32 %v1841_v52, 16  ;;  %v1925_v59 = vshll.u32 %v1841_v52, 16  ;;  %v1736_v18 = vshll.u32 %v4489_v8, 16  ;;  %v1779_v41 = vshll.u32 %v4467_v9, 16 }
 0x637   : > { %v1916_v62 = vrot.slane %v1914_v54, 2  ;;  %v1919_v7 = vrot.slane %v1917_v57, 3  ;;  %v1803_v16 = vsel %vm5157_vm12, %v1800_v63, %v1802_v1  ;;  %v1760_v22 = vsel %vm364_vm1, %v1758_v2, %v1759_v46 }
 0x638   : > { %v1924_v4 = vrot.slane %v1922_v58, 2  ;;  %v1927_v11 = vrot.slane %v1925_v59, 3  ;;  %1765 = vrot.lane.b32.xlu1 %v1762_v61, %s3901_s11  ;;  %1752 = vrot.lane.b32.xlu0 %v1751_v5, %s3900_s8  ;;  %v1811_v25 = vsel %vm5158_vm4, %v1809_v48, %v1810_v15  ;;  %v1778_v27 = vrot.slane %v1776_v12, 3 }
 0x639   : > { %v1920_v33 = vor.u32 %v1919_v7, %v1916_v62  ;;  %v1738_v31 = vrot.slane %v1736_v18, 1  ;;  %v1781_v32 = vrot.slane %v1779_v41, 4  ;;  %v1787_v34 = vrot.slane %v1785_v19, 3 }
 0x63a   : > { %v4495_v14 = vor.u32 %v1927_v11, %v1924_v4  ;;  %v1817_v35 = vshrl.u32 %v4470_v47, 16  ;;  %v1790_v36 = vrot.slane %v1788_v21, 4  ;;  %v1820_v38 = vshll.u32 %v4470_v47, 16 }
 0x63b   : > { %v1825_v40 = vshrl.u32 %v1725_v3, 16  ;;  %v1828_v44 = vshll.u32 %v1725_v3, 16  ;;  %v1801_v39 = vsel %vm5159_vm6, %v1799_v23, %v1800_v63  ;;  %v1740_v45 = vshrl.u32 %v4489_v8, 16 }
 0x63c   : > { %v1929_v20 = vsel %vm5156_vm10, %v1920_v33, %v4495_v14  ;;  %1806 = vrot.lane.b32.xlu1 %v1803_v16, %s3902_s14  ;;  %1763 = vrot.lane.b32.xlu0 %v1760_v22, %s3901_s11  ;;  %v1729_v9 = vshrl.u32 %v4475_v50, 16  ;;  %v1770_v30 = vrot.slane %v1768_v24, 3  ;;  %v1773_v6 = vrot.slane %v1771_v28, 4  ;;  %v3852_v50 = vld [vmem:[%s5071_s1 + $0x158] sm:$0xff]  }
 0x63d   : > { %3650 = vmatprep.mubr.msk.bf16.mxu0 %vm250_vm0, %v1929_v20  ;;  %v1742_v48 = vor.u32 %v1740_v45, %v1738_v31  ;;  %v1782_v47 = vor.u32 %v1781_v32, %v1778_v27  ;;  %v1819_v46 = vrot.slane %v1817_v35, 6  ;;  %v1791_v51 = vor.u32 %v1790_v36, %v1787_v34  ;;  %2007 = vmatpush1.bf16.msra.mxu0 %v3852_v50 }
 0x63e   : > { %v1734_v49 = vor.u32 %v1733_v26, %v1729_v9  ;;  %v1822_v37 = vrot.slane %v1820_v38, 7  ;;  %v1827_v52 = vrot.slane %v1825_v40, 6  ;;  %v1830_v54 = vrot.slane %v1828_v44, 7  ;;  %2008 = vmatprep.subr.bf16.mxu0 %v3898_v0 }
 0x63f   : > { %v1774_v56 = vor.u32 %v1773_v6, %v1770_v30  ;;  %v1792_v57 = vsel %vm5161_vm9, %v1782_v47, %v1791_v51  ;;  %vm5166_vm10 = vcmask 392192   ;;  %vm5168_vm4 = vcmask 523264   ;;  %v3854_v30 = vld [vmem:[%s5071_s1 + $0x168] sm:$0xff]   ;;  %v3640_v6 = vld [vmem:[%s5072_s2 + $0x4] ss:$0 sm:$0xff] }
 0x640   : > { %1814 = vrot.lane.b32.xlu1 %v1811_v25, %s3899_s7  ;;  %1804 = vrot.lane.b32.xlu0 %v1801_v39, %s3902_s14  ;;  %v1739_v55 = vsel %vm5160_vm7, %v1734_v49, %v1738_v31  ;;  %v1823_v58 = vor.u32 %v1822_v37, %v1819_v46  ;;  %v1831_v59 = vor.u32 %v1830_v54, %v1827_v52  ;;  %vm5167_vm12 = vmmov %vm5166_vm10  ;;  %vm5169_vm6 = vcmask 654336  }
 0x641   : > { %v1783_v61 = vsel %vm5162_vm13, %v1774_v56, %v1782_v47  ;;  %2009 = vmatpush1.bf16.msra.mxu0 %v3853_v60  ;;  %vm5170_vm7 = vmmov %vm5168_vm4  ;;  %vm5172_vm13 = vcmask 785408   ;;  %2338 = vmatpush1.bf16.msra.mxu1 %v3854_v30 }
 0x642   : > { %v1832_v62 = vsel %vm5163_vm15, %v1823_v58, %v1831_v59  ;;  %2682 = vmatprep.subr.bf16.mxu0 %v3898_v0  ;;  %vm5171_vm9 = vmmov %vm5169_vm6  ;;  %2339 = vmatprep.subr.bf16.mxu1 %v3898_v0 }
 0x643   : > { %vm5173_vm15 = vmmov %vm5172_vm13 }
 0x644   : > { %1745 = vrot.lane.b32.xlu1 %v1742_v48, %s3903_s17  ;;  %1743 = vrot.lane.b32.xlu0 %v1739_v55, %s3903_s17 }
 0x648   : > { %1795 = vrot.lane.b32.xlu1 %v1792_v57, %s3904_s25  ;;  %1793 = vrot.lane.b32.xlu0 %v1783_v61, %s3904_s25 }
 0x64c   : > { %1835 = vrot.lane.b32.xlu1 %v1832_v62, %s3905_s26  ;;  %1833 = vrot.lane.b32.xlu0 %v1823_v58, %s3905_s26 }
 0x6a6   : > { %v1813_v63 = vpop.permute.xlu0 %1812  ;;  %v1755_v1 = vpop.permute.xlu1 %1754 }
 0x6aa   : > { %v1766_v3 = vpop.permute.xlu1 %1765  ;;  %v1753_v5 = vpop.permute.xlu0 %1752 }
 0x6ae   : > { %v1807_v7 = vpop.permute.xlu1 %1806  ;;  %v1764_v4 = vpop.permute.xlu0 %1763 }
 0x6b2   : > { %v1815_v11 = vpop.permute.xlu1 %1814  ;;  %v1805_v10 = vpop.permute.xlu0 %1804 }
 0x6b6   : > { %v1746_v33 = vpop.permute.xlu1 %1745  ;;  %v1744_v12 = vpop.permute.xlu0 %1743 }
 0x6b7   : > { %v1846_v15 = vsel %vm250_vm0, %v4489_v8, %v1746_v33  ;;  %v1844_v2 = vsel %vm250_vm0, %v1717_v13, %v1744_v12  ;;  %v3856_v33 = vld [vmem:[%s5071_s1 + $0x178] sm:$0xff]  }
 0x6b8   : > { %v1850_v17 = vsel %vm5164_vm14, %v1846_v15, %v1755_v1  ;;  %v1848_v18 = vsel %vm5165_vm11, %v1844_v2, %v1753_v5  ;;  %vm5174_vm14 = vcmask 916480   ;;  %v3857_v15 = vld [vmem:[%s5071_s1 + $0x180] sm:$0xff]  }
 0x6b9   : > { %v1854_v41 = vsel %vm5166_vm10, %v1850_v17, %v1766_v3  ;;  %v1852_v20 = vsel %vm5167_vm12, %v1848_v18, %v1764_v4  ;;  %vm5175_vm11 = vmmov %vm5174_vm14  ;;  %vm5176_vm10 = vsmask.f32 5376  ;;  %v3855_v4 = vld [vmem:[%s5071_s1 + $0x170] sm:$0xff]   ;;  %vm5177_vm12 = vcmask 1046528  }
 0x6ba   : > { %v1796_v19 = vpop.permute.xlu1 %1795  ;;  %v1794_v21 = vpop.permute.xlu0 %1793  ;;  %2340 = vmatpush1.bf16.msra.mxu1 %v3855_v4 }
 0x6bb   : > { %v1858_v16 = vsel %vm5168_vm4, %v1854_v41, %v1796_v19  ;;  %v1856_v8 = vsel %vm5170_vm7, %v1852_v20, %v1794_v21  ;;  %2341 = vmatprep.subr.bf16.mxu1 %v3898_v0  ;;  %vm5178_vm4 = vmmov %vm5176_vm10  ;;  %vm5180_vm7 = vcmask 1041408  }
 0x6bc   : > { %v1862_v22 = vsel %vm5169_vm6, %v1858_v16, %v1807_v7  ;;  %v1860_v23 = vsel %vm5171_vm9, %v1856_v8, %v1805_v10  ;;  %vm5179_vm6 = vcmask 1043456  }
 0x6bd   : > { %v1866_v24 = vsel %vm5172_vm13, %v1862_v22, %v1815_v11  ;;  %v1864_v26 = vsel %vm5173_vm15, %v1860_v23, %v1813_v63  ;;  %vm5181_vm9 = vmmov %vm5179_vm6  ;;  %vm5182_vm13 = vsmask.f32 7424  ;;  %vm5183_vm15 = vsmask.f32 4352 }
 0x6be   : > { %v1836_v25 = vpop.permute.xlu1 %1835  ;;  %v1834_v28 = vpop.permute.xlu0 %1833  ;;  %2342 = vmatpush1.bf16.msra.mxu1 %v3856_v33 }
 0x6bf   : > { %v1870_v27 = vsel %vm5174_vm14, %v1866_v24, %v1836_v25  ;;  %v1868_v32 = vsel %vm5175_vm11, %v1864_v26, %v1834_v28  ;;  %2343 = vmatprep.subr.bf16.mxu1 %v3898_v0  ;;  %v3858_v25 = vld [vmem:[%s5071_s1 + $0x188] sm:$0xff]   ;;  %vm5184_vm14 = vmmov %vm5183_vm15  ;;  %vm5185_vm11 = vsmask.f32 1280 }
 0x6c0   : > { %v1905_v29 = vshrl.u32 %v1870_v27, 16  ;;  %v1908_v31 = vshll.u32 %v1870_v27, 16  ;;  %v1898_v34 = vshrl.u32 %v1868_v32, 16  ;;  %v1901_v35 = vshll.u32 %v1868_v32, 16 }
 0x6c2   : > { %v1907_v36 = vrot.slane %v1905_v29, 2  ;;  %v1910_v38 = vrot.slane %v1908_v31, 3  ;;  %v1900_v40 = vrot.slane %v1898_v34, 2  ;;  %v1903_v44 = vrot.slane %v1901_v35, 3  ;;  %2344 = vmatpush1.bf16.msra.mxu1 %v3857_v15 }
 0x6c3   : > { %2345 = vmatprep.subr.bf16.mxu1 %v3898_v0 }
 0x6c4   : > { %v1911_v39 = vor.u32 %v1910_v38, %v1907_v36  ;;  %v1904_v45 = vor.u32 %v1903_v44, %v1900_v40 }
 0x6c6   : > { %v1912_v9 = vsel %vm5176_vm10, %v1904_v45, %v1911_v39  ;;  %2346 = vmatpush1.bf16.msra.mxu1 %v3858_v25  ;;  %vm5186_vm10 = vcmask 261120  }
 0x6c7   : > { %2025 = vmatmul.mubr.bf16.vlgmr.msra.gmra.mrb[16].mxu0 %v1912_v9  ;;  %2347 = vmatprep.subr.bf16.mxu1 %v3898_v0 }
 0x6c8   : > { %3651 = vmatprep.mubr.msk.bf16.mxu0 %vm250_vm0, %v4495_v14 }
 0x6cf   : > { %2033 = vmatmul.mubr.bf16.gmra.mrb[20].mxu0 %v1911_v39 }
 0x79a   : > { %v2026_v48 = vpop.f32.mrb[16].mxu0 }
 0x79b   : > { %v2027_v49 = vadd.f32 %v3640_v6, %v2026_v48  ;;  %v2028_v47 = vpop.f32.mrb[17].mxu0 }
 0x79c   : > { %v2029_v46 = vpop.f32.mrb[18].mxu0 }
 0x79d   : > { %v2040_v51 = vmul.f32 0.1, %v2027_v49  ;;  %v2030_v37 = vadd.f32 %v3640_v6, %v2029_v46  ;;  %v2031_v52 = vpop.f32.mrb[19].mxu0 }
 0x79f   : > { %v2043_v14 = vmax.f32 %v2027_v49, %v2040_v51  ;;  %v2041_v54 = vmul.f32 0.1, %v2030_v37  ;;  %v3859_v51 = vld [vmem:[%s5071_s1 + $0x190] sm:$0xff]  }
 0x7a0   : > { %2348 = vmatpush1.bf16.msra.mxu1 %v3859_v51 }
 0x7a1   : > { %v2044_v55 = vmax.f32 %v2030_v37, %v2041_v54  ;;  %v2046_v56 = vmul.f32 %v4078_v42, %v2043_v14  ;;  %2349 = vmatprep.subr.bf16.mxu1 %v3898_v0 }
 0x7a2   : > { %v2034_v50 = vpop.f32.mrb[20].mxu0 }
 0x7a3   : > { %v2047_v57 = vmul.f32 %v4080_v43, %v2044_v55  ;;  %v2035_v58 = vadd.f32 %v3640_v6, %v2034_v50  ;;  %v2036_v59 = vpop.f32.mrb[21].mxu0 }
 0x7a4   : > { %v2037_v60 = vpop.f32.mrb[22].mxu0 }
 0x7a5   : > { %v2049_v61 = vpack.c.bf16 %v2047_v57, %v2046_v56  ;;  %v2042_v62 = vmul.f32 0.1, %v2035_v58  ;;  %v2038_v63 = vpop.f32.mrb[23].mxu0 }
 0x7a7   : > { %v2053_v1 = vrot.slane %v2049_v61, 2  ;;  %v2045_v3 = vmax.f32 %v2035_v58, %v2042_v62 }
 0x7a9   : > { %2059 = vst.msk [vmem:[#allocation2] sm:$0xc0] %vm677_vm2, %v2053_v1  ;;  %v2048_v5 = vmul.f32 %v4084_v53, %v2045_v3 }
 0x7ab   : > { %v2050_v7 = vpack.c.bf16 %v2048_v5, %v2048_v5 }
 0x7ad   : > { %v2054_v11 = vrot.slane %v2050_v7, 2 }
 0x7af   : > { %v2055_v10 = vsel %vm670_vm3, %v2053_v1, %v2054_v11  ;;  %2061 = vst.msk [vmem:[#allocation2 + $0x10] sm:$0x3] %vm680_vm5, %v2054_v11  ;;  %v3860_v1 = vld [vmem:[%s5071_s1 + $0x198] sm:$0xff]  }
 0x7b0   : > { %2060 = vst.msk [vmem:[#allocation2 + $0x8] sm:$0xff] %vm250_vm0, %v2055_v10  ;;  %v4596_v21 = vld [vmem:[#allocation2] sm:$0xf8]  ;;  %2350 = vmatpush1.bf16.msra.mxu1 %v3860_v1 }
 0x7b1   : > { %v2094_v26 = vrot.slane %v4596_v21, 1  ;;  %v2066_v31 = vld [vmem:[#allocation2] sm:$0xe0]  ;;  %v2076_v30 = vshll.u32 %v4596_v21, 16  ;;  %2351 = vmatprep.subr.bf16.mxu1 %v3898_v0 }
 0x7b2   : > { %v2068_v47 = vld [vmem:[#allocation2] sm:$0xc0]  ;;  %v2103_v37 = vrot.slane %v2066_v31, 3  ;;  %v3862_v31 = vld [vmem:[%s5071_s1 + $0x1a8] sm:$0xff]  }
 0x7b3   : > { %v2144_v58 = vrot.slane %v2068_v47, 4  ;;  %v2113_v59 = vshrl.u32 %v2068_v47, 16  ;;  %v2078_v61 = vrot.slane %v2076_v30, 1  ;;  %v2116_v63 = vshll.u32 %v2068_v47, 16  ;;  %v2062_v47 = vld [vmem:[#allocation2] sm:$0xfc] }
 0x7b6   : > { %v4586_v13 = vld [vmem:[#allocation2 + $0x10] sm:$0x3] }
 0x7b7   : > { %v2072_v12 = vld [vmem:[#allocation2 + $0x10] sm:$0x3f]  ;;  %v4588_v17 = vld [vmem:[#allocation2 + $0x8] sm:$0xff]  ;;  %v2106_v2 = vrot.slane %v4586_v13, 3  ;;  %v2130_v54 = vshrl.u32 %v4586_v13, 16  ;;  %v2133_v56 = vshll.u32 %v4586_v13, 16 }
 0x7b8   : > { %v4591_v18 = vld [vmem:[#allocation2 + $0x8] sm:$0xfe]  ;;  %v2185_v41 = vrot.slane %v2072_v12, 7  ;;  %v2154_v19 = vrot.slane %v4588_v17, 6  ;;  %v2095_v20 = vrot.slane %v4588_v17, 1  ;;  %v2104_v16 = vrot.slane %v4588_v17, 3 }
 0x7b9   : > { %v2184_v22 = vrot.slane %v4591_v18, 7  ;;  %v2069_v8 = vld [vmem:[#allocation2 + $0x10] sm:$0x7]  ;;  %v2145_v35 = vrot.slane %v4588_v17, 4  ;;  %v4610_v9 = vld [vmem:[#allocation2 + $0x8] sm:$0x7f] }
 0x7ba   : > { %2157 = vrot.lane.b32.xlu0 %v2154_v19, %s3899_s7  ;;  %2099 = vrot.lane.b32.xlu1 %v2095_v20, %s3900_s8  ;;  %v2107_v32 = vsel %vm364_vm1, %v2104_v16, %v2106_v2  ;;  %v2147_v36 = vrot.slane %v2069_v8, 4  ;;  %v2070_v38 = vld [vmem:[#allocation2 + $0x10] sm:$0x1f]  ;;  %v2096_v40 = vsel %vm5177_vm12, %v2094_v26, %v2095_v20  ;;  %v2121_v46 = vshrl.u32 %v4588_v17, 16  ;;  %vm5187_vm12 = vmmov %vm5186_vm10 }
 0x7bb   : > { %v2186_v23 = vsel %vm450_vm8, %v2184_v22, %v2185_v41  ;;  %v2259_v24 = vshrl.u32 %v2184_v22, 16  ;;  %v2262_v27 = vshll.u32 %v2184_v22, 16  ;;  %v2155_v49 = vrot.slane %v2070_v38, 6 }
 0x7bc   : > { %v2267_v28 = vshrl.u32 %v2186_v23, 16  ;;  %v2270_v29 = vshll.u32 %v2186_v23, 16  ;;  %v2081_v52 = vshll.u32 %v4610_v9, 16  ;;  %v2124_v14 = vshll.u32 %v4588_v17, 16 }
 0x7bd   : > { %v2261_v34 = vrot.slane %v2259_v24, 2  ;;  %v2264_v44 = vrot.slane %v2262_v27, 3  ;;  %v2148_v50 = vsel %vm5179_vm6, %v2145_v35, %v2147_v36  ;;  %v2105_v57 = vsel %vm364_vm1, %v2103_v37, %v2104_v16 }
 0x7be   : > { %v2269_v39 = vrot.slane %v2267_v28, 2  ;;  %v2272_v45 = vrot.slane %v2270_v29, 3  ;;  %2110 = vrot.lane.b32.xlu1 %v2107_v32, %s3901_s11  ;;  %2097 = vrot.lane.b32.xlu0 %v2096_v40, %s3900_s8  ;;  %v2156_v60 = vsel %vm5180_vm7, %v2154_v19, %v2155_v49  ;;  %v2123_v62 = vrot.slane %v2121_v46, 3 }
 0x7bf   : > { %v2265_v6 = vor.u32 %v2264_v44, %v2261_v34  ;;  %v2083_v3 = vrot.slane %v2081_v52, 1  ;;  %v2126_v5 = vrot.slane %v2124_v14, 4  ;;  %v2132_v7 = vrot.slane %v2130_v54, 3 }
 0x7c0   : > { %v4616_v48 = vor.u32 %v2272_v45, %v2269_v39  ;;  %v2162_v4 = vshrl.u32 %v4591_v18, 16  ;;  %v2135_v11 = vrot.slane %v2133_v56, 4  ;;  %v2165_v10 = vshll.u32 %v4591_v18, 16 }
 0x7c1   : > { %v2170_v33 = vshrl.u32 %v2070_v38, 16  ;;  %v2173_v15 = vshll.u32 %v2070_v38, 16  ;;  %v2146_v13 = vsel %vm5181_vm9, %v2144_v58, %v2145_v35  ;;  %v2085_v12 = vshrl.u32 %v4610_v9, 16 }
 0x7c2   : > { %v2274_v55 = vsel %vm5178_vm4, %v2265_v6, %v4616_v48  ;;  %2151 = vrot.lane.b32.xlu1 %v2148_v50, %s3902_s14  ;;  %2108 = vrot.lane.b32.xlu0 %v2105_v57, %s3901_s11  ;;  %v2074_v17 = vshrl.u32 %v4596_v21, 16  ;;  %v2115_v2 = vrot.slane %v2113_v59, 3  ;;  %v2118_v41 = vrot.slane %v2116_v63, 4  ;;  %v3861_v21 = vld [vmem:[%s5071_s1 + $0x1a0] sm:$0xff]  }
 0x7c3   : > { %3681 = vmatprep.mubr.msk.bf16.mxu1 %vm250_vm0, %v2274_v55  ;;  %v2087_v19 = vor.u32 %v2085_v12, %v2083_v3  ;;  %v2127_v18 = vor.u32 %v2126_v5, %v2123_v62  ;;  %v2164_v16 = vrot.slane %v2162_v4, 6  ;;  %v2136_v22 = vor.u32 %v2135_v11, %v2132_v7  ;;  %2352 = vmatpush1.bf16.msra.mxu1 %v3861_v21 }
 0x7c4   : > { %v2079_v20 = vor.u32 %v2078_v61, %v2074_v17  ;;  %v2167_v8 = vrot.slane %v2165_v10, 7  ;;  %v2172_v23 = vrot.slane %v2170_v33, 6  ;;  %v2175_v24 = vrot.slane %v2173_v15, 7  ;;  %2353 = vmatprep.subr.bf16.mxu1 %v3898_v0 }
 0x7c5   : > { %v2119_v26 = vor.u32 %v2118_v41, %v2115_v2  ;;  %v2137_v27 = vsel %vm5183_vm15, %v2127_v18, %v2136_v22  ;;  %vm5188_vm4 = vcmask 392192   ;;  %vm5190_vm7 = vcmask 523264   ;;  %v3863_v2 = vld [vmem:[%s5071_s1 + $0x1b0] sm:$0xff]   ;;  %v3671_v41 = vld [vmem:[%s5072_s2 + $0x5] ss:$0 sm:$0xff] }
 0x7c6   : > { %2159 = vrot.lane.b32.xlu1 %v2156_v60, %s3899_s7  ;;  %2149 = vrot.lane.b32.xlu0 %v2146_v13, %s3902_s14  ;;  %v2084_v25 = vsel %vm5182_vm13, %v2079_v20, %v2083_v3  ;;  %v2168_v28 = vor.u32 %v2167_v8, %v2164_v16  ;;  %v2176_v29 = vor.u32 %v2175_v24, %v2172_v23  ;;  %vm5189_vm6 = vmmov %vm5188_vm4  ;;  %vm5191_vm9 = vcmask 654336  }
 0x7c7   : > { %v2128_v32 = vsel %vm5184_vm14, %v2119_v26, %v2127_v18  ;;  %2354 = vmatpush1.bf16.msra.mxu1 %v3862_v31  ;;  %vm5192_vm13 = vmmov %vm5190_vm7  ;;  %vm5194_vm14 = vcmask 785408   ;;  %2683 = vmatpush1.bf16.msra.mxu0 %v3863_v2 }
 0x7c8   : > { %v2177_v34 = vsel %vm5185_vm11, %v2168_v28, %v2176_v29  ;;  %3027 = vmatprep.subr.bf16.mxu1 %v3898_v0  ;;  %vm5193_vm15 = vmmov %vm5191_vm9  ;;  %2684 = vmatprep.subr.bf16.mxu0 %v3898_v0 }
 0x7c9   : > { %vm5195_vm11 = vmmov %vm5194_vm14 }
 0x7ca   : > { %2090 = vrot.lane.b32.xlu1 %v2087_v19, %s3903_s17  ;;  %2088 = vrot.lane.b32.xlu0 %v2084_v25, %s3903_s17 }
 0x7ce   : > { %2140 = vrot.lane.b32.xlu1 %v2137_v27, %s3904_s25  ;;  %2138 = vrot.lane.b32.xlu0 %v2128_v32, %s3904_s25 }
 0x7d2   : > { %2180 = vrot.lane.b32.xlu1 %v2177_v34, %s3905_s26  ;;  %2178 = vrot.lane.b32.xlu0 %v2168_v28, %s3905_s26 }
 0x82c   : > { %v2158_v35 = vpop.permute.xlu0 %2157  ;;  %v2100_v36 = vpop.permute.xlu1 %2099 }
 0x830   : > { %v2111_v38 = vpop.permute.xlu1 %2110  ;;  %v2098_v40 = vpop.permute.xlu0 %2097 }
 0x834   : > { %v2152_v44 = vpop.permute.xlu1 %2151  ;;  %v2109_v39 = vpop.permute.xlu0 %2108 }
 0x838   : > { %v2160_v45 = vpop.permute.xlu1 %2159  ;;  %v2150_v30 = vpop.permute.xlu0 %2149 }
 0x83c   : > { %v2091_v6 = vpop.permute.xlu1 %2090  ;;  %v2089_v46 = vpop.permute.xlu0 %2088 }
 0x83d   : > { %v2191_v49 = vsel %vm250_vm0, %v4610_v9, %v2091_v6  ;;  %v2189_v37 = vsel %vm250_vm0, %v2062_v47, %v2089_v46  ;;  %v3865_v6 = vld [vmem:[%s5071_s1 + $0x1c0] sm:$0xff]  }
 0x83e   : > { %v2195_v51 = vsel %vm5186_vm10, %v2191_v49, %v2100_v36  ;;  %v2193_v52 = vsel %vm5187_vm12, %v2189_v37, %v2098_v40  ;;  %vm5196_vm10 = vcmask 916480   ;;  %v3866_v49 = vld [vmem:[%s5071_s1 + $0x1c8] sm:$0xff]  }
 0x83f   : > { %v2199_v14 = vsel %vm5188_vm4, %v2195_v51, %v2111_v38  ;;  %v2197_v55 = vsel %vm5189_vm6, %v2193_v52, %v2109_v39  ;;  %vm5197_vm12 = vmmov %vm5196_vm10  ;;  %vm5198_vm4 = vsmask.f32 5376  ;;  %v3864_v39 = vld [vmem:[%s5071_s1 + $0x1b8] sm:$0xff]   ;;  %vm5199_vm6 = vcmask 1046528  }
 0x840   : > { %v2141_v54 = vpop.permute.xlu1 %2140  ;;  %v2139_v56 = vpop.permute.xlu0 %2138  ;;  %2685 = vmatpush1.bf16.msra.mxu0 %v3864_v39 }
 0x841   : > { %v2203_v50 = vsel %vm5190_vm7, %v2199_v14, %v2141_v54  ;;  %v2201_v9 = vsel %vm5192_vm13, %v2197_v55, %v2139_v56  ;;  %2686 = vmatprep.subr.bf16.mxu0 %v3898_v0  ;;  %vm5200_vm7 = vmmov %vm5198_vm4  ;;  %vm5202_vm13 = vcmask 1041408  }
 0x842   : > { %v2207_v57 = vsel %vm5191_vm9, %v2203_v50, %v2152_v44  ;;  %v2205_v58 = vsel %vm5193_vm15, %v2201_v9, %v2150_v30  ;;  %vm5201_vm9 = vcmask 1043456  }
 0x843   : > { %v2211_v59 = vsel %vm5194_vm14, %v2207_v57, %v2160_v45  ;;  %v2209_v61 = vsel %vm5195_vm11, %v2205_v58, %v2158_v35  ;;  %vm5203_vm15 = vmmov %vm5201_vm9  ;;  %vm5204_vm14 = vsmask.f32 7424  ;;  %vm5205_vm11 = vsmask.f32 4352 }
 0x844   : > { %v2181_v60 = vpop.permute.xlu1 %2180  ;;  %v2179_v63 = vpop.permute.xlu0 %2178  ;;  %2687 = vmatpush1.bf16.msra.mxu0 %v3865_v6 }
 0x845   : > { %v2215_v62 = vsel %vm5196_vm10, %v2211_v59, %v2181_v60  ;;  %v2213_v5 = vsel %vm5197_vm12, %v2209_v61, %v2179_v63  ;;  %2688 = vmatprep.subr.bf16.mxu0 %v3898_v0  ;;  %v3867_v60 = vld [vmem:[%s5071_s1 + $0x1d0] sm:$0xff]   ;;  %vm5206_vm10 = vmmov %vm5205_vm11  ;;  %vm5207_vm12 = vsmask.f32 1280 }
 0x846   : > { %v2250_v1 = vshrl.u32 %v2215_v62, 16  ;;  %v2253_v3 = vshll.u32 %v2215_v62, 16  ;;  %v2243_v7 = vshrl.u32 %v2213_v5, 16  ;;  %v2246_v4 = vshll.u32 %v2213_v5, 16 }
 0x848   : > { %v2252_v11 = vrot.slane %v2250_v1, 2  ;;  %v2255_v10 = vrot.slane %v2253_v3, 3  ;;  %v2245_v33 = vrot.slane %v2243_v7, 2  ;;  %v2248_v15 = vrot.slane %v2246_v4, 3  ;;  %2689 = vmatpush1.bf16.msra.mxu0 %v3866_v49 }
 0x849   : > { %2690 = vmatprep.subr.bf16.mxu0 %v3898_v0 }
 0x84a   : > { %v2256_v13 = vor.u32 %v2255_v10, %v2252_v11  ;;  %v2249_v12 = vor.u32 %v2248_v15, %v2245_v33 }
 0x84c   : > { %v2257_v17 = vsel %vm5198_vm4, %v2249_v12, %v2256_v13  ;;  %2691 = vmatpush1.bf16.msra.mxu0 %v3867_v60  ;;  %vm5208_vm4 = vcmask 261120  }
 0x84d   : > { %2370 = vmatmul.mubr.bf16.vlgmr.msra.gmra.mrb[16].mxu1 %v2257_v17  ;;  %2692 = vmatprep.subr.bf16.mxu0 %v3898_v0 }
 0x84e   : > { %3682 = vmatprep.mubr.msk.bf16.mxu1 %vm250_vm0, %v4616_v48 }
 0x855   : > { %2378 = vmatmul.mubr.bf16.gmra.mrb[20].mxu1 %v2256_v13 }
 0x920   : > { %v2371_v19 = vpop.f32.mrb[16].mxu1 }
 0x921   : > { %v2372_v20 = vadd.f32 %v3671_v41, %v2371_v19  ;;  %v2373_v18 = vpop.f32.mrb[17].mxu1 }
 0x922   : > { %v2374_v16 = vpop.f32.mrb[18].mxu1 }
 0x923   : > { %v2385_v22 = vmul.f32 0.1, %v2372_v20  ;;  %v2375_v8 = vadd.f32 %v3671_v41, %v2374_v16  ;;  %v2376_v23 = vpop.f32.mrb[19].mxu1 }
 0x925   : > { %v2388_v48 = vmax.f32 %v2372_v20, %v2385_v22  ;;  %v2386_v24 = vmul.f32 0.1, %v2375_v8  ;;  %v3868_v22 = vld [vmem:[%s5071_s1 + $0x1d8] sm:$0xff]  }
 0x926   : > { %2693 = vmatpush1.bf16.msra.mxu0 %v3868_v22 }
 0x927   : > { %v2389_v25 = vmax.f32 %v2375_v8, %v2386_v24  ;;  %v2391_v26 = vmul.f32 %v4078_v42, %v2388_v48  ;;  %2694 = vmatprep.subr.bf16.mxu0 %v3898_v0 }
 0x928   : > { %v2379_v21 = vpop.f32.mrb[20].mxu1 }
 0x929   : > { %v2392_v27 = vmul.f32 %v4080_v43, %v2389_v25  ;;  %v2380_v28 = vadd.f32 %v3671_v41, %v2379_v21  ;;  %v2381_v29 = vpop.f32.mrb[21].mxu1 }
 0x92a   : > { %v2382_v31 = vpop.f32.mrb[22].mxu1 }
 0x92b   : > { %v2394_v32 = vpack.c.bf16 %v2392_v27, %v2391_v26  ;;  %v2387_v34 = vmul.f32 0.1, %v2380_v28  ;;  %v2383_v35 = vpop.f32.mrb[23].mxu1 }
 0x92d   : > { %v2398_v36 = vrot.slane %v2394_v32, 2  ;;  %v2390_v38 = vmax.f32 %v2380_v28, %v2387_v34 }
 0x92f   : > { %2404 = vst.msk [vmem:[#allocation2] sm:$0xc0] %vm677_vm2, %v2398_v36  ;;  %v2393_v40 = vmul.f32 %v4084_v53, %v2390_v38 }
 0x931   : > { %v2395_v44 = vpack.c.bf16 %v2393_v40, %v2393_v40 }
 0x933   : > { %v2399_v45 = vrot.slane %v2395_v44, 2 }
 0x935   : > { %v2400_v30 = vsel %vm670_vm3, %v2398_v36, %v2399_v45  ;;  %2406 = vst.msk [vmem:[#allocation2 + $0x10] sm:$0x3] %vm680_vm5, %v2399_v45  ;;  %v3869_v36 = vld [vmem:[%s5071_s1 + $0x1e0] sm:$0xff]  }
 0x936   : > { %2405 = vst.msk [vmem:[#allocation2 + $0x8] sm:$0xff] %vm250_vm0, %v2400_v30  ;;  %v4717_v56 = vld [vmem:[#allocation2] sm:$0xf8]  ;;  %2695 = vmatpush1.bf16.msra.mxu0 %v3869_v36 }
 0x937   : > { %v2439_v61 = vrot.slane %v4717_v56, 1  ;;  %v2411_v3 = vld [vmem:[#allocation2] sm:$0xe0]  ;;  %v2421_v2 = vshll.u32 %v4717_v56, 16  ;;  %2696 = vmatprep.subr.bf16.mxu0 %v3898_v0 }
 0x938   : > { %v2413_v18 = vld [vmem:[#allocation2] sm:$0xc0]  ;;  %v2448_v8 = vrot.slane %v2411_v3, 3  ;;  %v3871_v3 = vld [vmem:[%s5071_s1 + $0x1f0] sm:$0xff]  }
 0x939   : > { %v2489_v28 = vrot.slane %v2413_v18, 4  ;;  %v2458_v29 = vshrl.u32 %v2413_v18, 16  ;;  %v2423_v32 = vrot.slane %v2421_v2, 1  ;;  %v2461_v35 = vshll.u32 %v2413_v18, 16  ;;  %v2407_v18 = vld [vmem:[#allocation2] sm:$0xfc] }
 0x93c   : > { %v4707_v47 = vld [vmem:[#allocation2 + $0x10] sm:$0x3] }
 0x93d   : > { %v2417_v46 = vld [vmem:[#allocation2 + $0x10] sm:$0x3f]  ;;  %v4709_v51 = vld [vmem:[#allocation2 + $0x8] sm:$0xff]  ;;  %v2451_v37 = vrot.slane %v4707_v47, 3  ;;  %v2475_v24 = vshrl.u32 %v4707_v47, 16  ;;  %v2478_v26 = vshll.u32 %v4707_v47, 16 }
 0x93e   : > { %v4712_v52 = vld [vmem:[#allocation2 + $0x8] sm:$0xfe]  ;;  %v2530_v14 = vrot.slane %v2417_v46, 7  ;;  %v2499_v54 = vrot.slane %v4709_v51, 6  ;;  %v2440_v55 = vrot.slane %v4709_v51, 1  ;;  %v2449_v50 = vrot.slane %v4709_v51, 3 }
 0x93f   : > { %v2529_v57 = vrot.slane %v4712_v52, 7  ;;  %v2414_v9 = vld [vmem:[#allocation2 + $0x10] sm:$0x7]  ;;  %v2490_v4 = vrot.slane %v4709_v51, 4  ;;  %v4731_v17 = vld [vmem:[#allocation2 + $0x8] sm:$0x7f] }
 0x940   : > { %2502 = vrot.lane.b32.xlu0 %v2499_v54, %s3899_s7  ;;  %2444 = vrot.lane.b32.xlu1 %v2440_v55, %s3900_s8  ;;  %v2452_v5 = vsel %vm364_vm1, %v2449_v50, %v2451_v37  ;;  %v2492_v11 = vrot.slane %v2414_v9, 4  ;;  %v2415_v10 = vld [vmem:[#allocation2 + $0x10] sm:$0x1f]  ;;  %v2441_v33 = vsel %vm5199_vm6, %v2439_v61, %v2440_v55  ;;  %v2466_v16 = vshrl.u32 %v4709_v51, 16  ;;  %vm5209_vm6 = vmmov %vm5208_vm4 }
 0x941   : > { %v2531_v58 = vsel %vm450_vm8, %v2529_v57, %v2530_v14  ;;  %v2604_v59 = vshrl.u32 %v2529_v57, 16  ;;  %v2607_v62 = vshll.u32 %v2529_v57, 16  ;;  %v2500_v20 = vrot.slane %v2415_v10, 6 }
 0x942   : > { %v2612_v63 = vshrl.u32 %v2531_v58, 16  ;;  %v2615_v1 = vshll.u32 %v2531_v58, 16  ;;  %v2426_v23 = vshll.u32 %v4731_v17, 16  ;;  %v2469_v48 = vshll.u32 %v4709_v51, 16 }
 0x943   : > { %v2606_v7 = vrot.slane %v2604_v59, 2  ;;  %v2609_v15 = vrot.slane %v2607_v62, 3  ;;  %v2493_v21 = vsel %vm5201_vm9, %v2490_v4, %v2492_v11  ;;  %v2450_v27 = vsel %vm364_vm1, %v2448_v8, %v2449_v50 }
 0x944   : > { %v2614_v13 = vrot.slane %v2612_v63, 2  ;;  %v2617_v12 = vrot.slane %v2615_v1, 3  ;;  %2455 = vrot.lane.b32.xlu1 %v2452_v5, %s3901_s11  ;;  %2442 = vrot.lane.b32.xlu0 %v2441_v33, %s3900_s8  ;;  %v2501_v31 = vsel %vm5202_vm13, %v2499_v54, %v2500_v20  ;;  %v2468_v34 = vrot.slane %v2466_v16, 3 }
 0x945   : > { %v2610_v41 = vor.u32 %v2609_v15, %v2606_v7  ;;  %v2428_v38 = vrot.slane %v2426_v23, 1  ;;  %v2471_v40 = vrot.slane %v2469_v48, 4  ;;  %v2477_v44 = vrot.slane %v2475_v24, 3 }
 0x946   : > { %v4737_v19 = vor.u32 %v2617_v12, %v2614_v13  ;;  %v2507_v39 = vshrl.u32 %v4712_v52, 16  ;;  %v2480_v45 = vrot.slane %v2478_v26, 4  ;;  %v2510_v30 = vshll.u32 %v4712_v52, 16 }
 0x947   : > { %v2515_v6 = vshrl.u32 %v2415_v10, 16  ;;  %v2518_v49 = vshll.u32 %v2415_v10, 16  ;;  %v2491_v47 = vsel %vm5203_vm15, %v2489_v28, %v2490_v4  ;;  %v2430_v46 = vshrl.u32 %v4731_v17, 16 }
 0x948   : > { %v2619_v25 = vsel %vm5200_vm7, %v2610_v41, %v4737_v19  ;;  %2496 = vrot.lane.b32.xlu1 %v2493_v21, %s3902_s14  ;;  %2453 = vrot.lane.b32.xlu0 %v2450_v27, %s3901_s11  ;;  %v2419_v51 = vshrl.u32 %v4717_v56, 16  ;;  %v2460_v37 = vrot.slane %v2458_v29, 3  ;;  %v2463_v14 = vrot.slane %v2461_v35, 4  ;;  %v3870_v56 = vld [vmem:[%s5071_s1 + $0x1e8] sm:$0xff]  }
 0x949   : > { %3712 = vmatprep.mubr.msk.bf16.mxu0 %vm250_vm0, %v2619_v25  ;;  %v2432_v54 = vor.u32 %v2430_v46, %v2428_v38  ;;  %v2472_v52 = vor.u32 %v2471_v40, %v2468_v34  ;;  %v2509_v50 = vrot.slane %v2507_v39, 6  ;;  %v2481_v57 = vor.u32 %v2480_v45, %v2477_v44  ;;  %2697 = vmatpush1.bf16.msra.mxu0 %v3870_v56 }
 0x94a   : > { %v2424_v55 = vor.u32 %v2423_v32, %v2419_v51  ;;  %v2512_v9 = vrot.slane %v2510_v30, 7  ;;  %v2517_v58 = vrot.slane %v2515_v6, 6  ;;  %v2520_v59 = vrot.slane %v2518_v49, 7  ;;  %2698 = vmatprep.subr.bf16.mxu0 %v3898_v0 }
 0x94b   : > { %v2464_v61 = vor.u32 %v2463_v14, %v2460_v37  ;;  %v2482_v62 = vsel %vm5205_vm11, %v2472_v52, %v2481_v57  ;;  %vm5210_vm7 = vcmask 392192   ;;  %vm5212_vm13 = vcmask 523264   ;;  %v3872_v37 = vld [vmem:[%s5071_s1 + $0x1f8] sm:$0xff]   ;;  %v3702_v14 = vld [vmem:[%s5072_s2 + $0x6] ss:$0 sm:$0xff] }
 0x94c   : > { %2504 = vrot.lane.b32.xlu1 %v2501_v31, %s3899_s7  ;;  %2494 = vrot.lane.b32.xlu0 %v2491_v47, %s3902_s14  ;;  %v2429_v60 = vsel %vm5204_vm14, %v2424_v55, %v2428_v38  ;;  %v2513_v63 = vor.u32 %v2512_v9, %v2509_v50  ;;  %v2521_v1 = vor.u32 %v2520_v59, %v2517_v58  ;;  %vm5211_vm9 = vmmov %vm5210_vm7  ;;  %vm5213_vm15 = vcmask 654336  }
 0x94d   : > { %v2473_v5 = vsel %vm5206_vm10, %v2464_v61, %v2472_v52  ;;  %2699 = vmatpush1.bf16.msra.mxu0 %v3871_v3  ;;  %vm5214_vm14 = vmmov %vm5212_vm13  ;;  %vm5216_vm10 = vcmask 785408   ;;  %3028 = vmatpush1.bf16.msra.mxu1 %v3872_v37 }
 0x94e   : > { %v2522_v7 = vsel %vm5207_vm12, %v2513_v63, %v2521_v1  ;;  %3396 = vmatprep.subr.bf16.mxu0 %v3898_v0  ;;  %vm5215_vm11 = vmmov %vm5213_vm15  ;;  %3029 = vmatprep.subr.bf16.mxu1 %v3898_v0 }
 0x94f   : > { %vm5217_vm12 = vmmov %vm5216_vm10 }
 0x950   : > { %2435 = vrot.lane.b32.xlu1 %v2432_v54, %s3903_s17  ;;  %2433 = vrot.lane.b32.xlu0 %v2429_v60, %s3903_s17 }
 0x954   : > { %2485 = vrot.lane.b32.xlu1 %v2482_v62, %s3904_s25  ;;  %2483 = vrot.lane.b32.xlu0 %v2473_v5, %s3904_s25 }
 0x958   : > { %2525 = vrot.lane.b32.xlu1 %v2522_v7, %s3905_s26  ;;  %2523 = vrot.lane.b32.xlu0 %v2513_v63, %s3905_s26 }
 0x9b2   : > { %v2503_v4 = vpop.permute.xlu0 %2502  ;;  %v2445_v11 = vpop.permute.xlu1 %2444 }
 0x9b6   : > { %v2456_v10 = vpop.permute.xlu1 %2455  ;;  %v2443_v33 = vpop.permute.xlu0 %2442 }
 0x9ba   : > { %v2497_v15 = vpop.permute.xlu1 %2496  ;;  %v2454_v13 = vpop.permute.xlu0 %2453 }
 0x9be   : > { %v2505_v12 = vpop.permute.xlu1 %2504  ;;  %v2495_v2 = vpop.permute.xlu0 %2494 }
 0x9c2   : > { %v2436_v41 = vpop.permute.xlu1 %2435  ;;  %v2434_v16 = vpop.permute.xlu0 %2433 }
 0x9c3   : > { %v2536_v20 = vsel %vm250_vm0, %v4731_v17, %v2436_v41  ;;  %v2534_v8 = vsel %vm250_vm0, %v2407_v18, %v2434_v16  ;;  %v3874_v41 = vld [vmem:[%s5071_s1 + $0x208] sm:$0xff]  }
 0x9c4   : > { %v2540_v22 = vsel %vm5208_vm4, %v2536_v20, %v2445_v11  ;;  %v2538_v23 = vsel %vm5209_vm6, %v2534_v8, %v2443_v33  ;;  %vm5218_vm4 = vcmask 916480   ;;  %v3875_v20 = vld [vmem:[%s5071_s1 + $0x210] sm:$0xff]  }
 0x9c5   : > { %v2544_v48 = vsel %vm5210_vm7, %v2540_v22, %v2456_v10  ;;  %v2542_v25 = vsel %vm5211_vm9, %v2538_v23, %v2454_v13  ;;  %vm5219_vm6 = vmmov %vm5218_vm4  ;;  %vm5220_vm7 = vsmask.f32 5376  ;;  %v3873_v13 = vld [vmem:[%s5071_s1 + $0x200] sm:$0xff]   ;;  %vm5221_vm9 = vcmask 1046528  }
 0x9c6   : > { %v2486_v24 = vpop.permute.xlu1 %2485  ;;  %v2484_v26 = vpop.permute.xlu0 %2483  ;;  %3030 = vmatpush1.bf16.msra.mxu1 %v3873_v13 }
 0x9c7   : > { %v2548_v21 = vsel %vm5212_vm13, %v2544_v48, %v2486_v24  ;;  %v2546_v17 = vsel %vm5214_vm14, %v2542_v25, %v2484_v26  ;;  %3031 = vmatprep.subr.bf16.mxu1 %v3898_v0  ;;  %vm5222_vm13 = vmmov %vm5220_vm7  ;;  %vm5224_vm14 = vcmask 1041408  }
 0x9c8   : > { %v2552_v27 = vsel %vm5213_vm15, %v2548_v21, %v2497_v15  ;;  %v2550_v28 = vsel %vm5215_vm11, %v2546_v17, %v2495_v2  ;;  %vm5223_vm15 = vcmask 1043456  }
 0x9c9   : > { %v2556_v29 = vsel %vm5216_vm10, %v2552_v27, %v2505_v12  ;;  %v2554_v32 = vsel %vm5217_vm12, %v2550_v28, %v2503_v4  ;;  %vm5225_vm11 = vmmov %vm5223_vm15  ;;  %vm5226_vm10 = vsmask.f32 7424  ;;  %vm5227_vm12 = vsmask.f32 4352 }
 0x9ca   : > { %v2526_v31 = vpop.permute.xlu1 %2525  ;;  %v2524_v35 = vpop.permute.xlu0 %2523  ;;  %3032 = vmatpush1.bf16.msra.mxu1 %v3874_v41 }
 0x9cb   : > { %v2560_v34 = vsel %vm5218_vm4, %v2556_v29, %v2526_v31  ;;  %v2558_v40 = vsel %vm5219_vm6, %v2554_v32, %v2524_v35  ;;  %3033 = vmatprep.subr.bf16.mxu1 %v3898_v0  ;;  %v3876_v31 = vld [vmem:[%s5071_s1 + $0x218] sm:$0xff]   ;;  %vm5228_vm4 = vmmov %vm5227_vm12  ;;  %vm5229_vm6 = vsmask.f32 1280 }
 0x9cc   : > { %v2595_v36 = vshrl.u32 %v2560_v34, 16  ;;  %v2598_v38 = vshll.u32 %v2560_v34, 16  ;;  %v2588_v44 = vshrl.u32 %v2558_v40, 16  ;;  %v2591_v39 = vshll.u32 %v2558_v40, 16 }
 0x9ce   : > { %v2597_v45 = vrot.slane %v2595_v36, 2  ;;  %v2600_v30 = vrot.slane %v2598_v38, 3  ;;  %v2590_v6 = vrot.slane %v2588_v44, 2  ;;  %v2593_v49 = vrot.slane %v2591_v39, 3  ;;  %3034 = vmatpush1.bf16.msra.mxu1 %v3875_v20 }
 0x9cf   : > { %3035 = vmatprep.subr.bf16.mxu1 %v3898_v0 }
 0x9d0   : > { %v2601_v47 = vor.u32 %v2600_v30, %v2597_v45  ;;  %v2594_v46 = vor.u32 %v2593_v49, %v2590_v6 }
 0x9d2   : > { %v2602_v51 = vsel %vm5220_vm7, %v2594_v46, %v2601_v47  ;;  %3036 = vmatpush1.bf16.msra.mxu1 %v3876_v31  ;;  %vm5230_vm7 = vcmask 261120  }
 0x9d3   : > { %2715 = vmatmul.mubr.bf16.vlgmr.msra.gmra.mrb[24].mxu0 %v2602_v51  ;;  %3037 = vmatprep.subr.bf16.mxu1 %v3898_v0 }
 0x9d4   : > { %3713 = vmatprep.mubr.msk.bf16.mxu0 %vm250_vm0, %v4737_v19 }
 0x9db   : > { %2723 = vmatmul.mubr.bf16.gmra.mrb[28].mxu0 %v2601_v47 }
 0xaa6   : > { %v2716_v54 = vpop.f32.mrb[24].mxu0 }
 0xaa7   : > { %v2717_v55 = vadd.f32 %v3702_v14, %v2716_v54  ;;  %v2718_v52 = vpop.f32.mrb[25].mxu0 }
 0xaa8   : > { %v2719_v50 = vpop.f32.mrb[26].mxu0 }
 0xaa9   : > { %v2730_v57 = vmul.f32 0.1, %v2717_v55  ;;  %v2720_v9 = vadd.f32 %v3702_v14, %v2719_v50  ;;  %v2721_v58 = vpop.f32.mrb[27].mxu0 }
 0xaab   : > { %v2733_v19 = vmax.f32 %v2717_v55, %v2730_v57  ;;  %v2731_v59 = vmul.f32 0.1, %v2720_v9  ;;  %v3877_v57 = vld [vmem:[%s5071_s1 + $0x220] sm:$0xff]  }
 0xaac   : > { %3038 = vmatpush1.bf16.msra.mxu1 %v3877_v57 }
 0xaad   : > { %v2734_v60 = vmax.f32 %v2720_v9, %v2731_v59  ;;  %v2736_v61 = vmul.f32 %v4078_v42, %v2733_v19  ;;  %3039 = vmatprep.subr.bf16.mxu1 %v3898_v0 }
 0xaae   : > { %v2724_v56 = vpop.f32.mrb[28].mxu0 }
 0xaaf   : > { %v2737_v62 = vmul.f32 %v4080_v43, %v2734_v60  ;;  %v2725_v63 = vadd.f32 %v3702_v14, %v2724_v56  ;;  %v2726_v1 = vpop.f32.mrb[29].mxu0 }
 0xab0   : > { %v2727_v3 = vpop.f32.mrb[30].mxu0 }
 0xab1   : > { %v2739_v5 = vpack.c.bf16 %v2737_v62, %v2736_v61  ;;  %v2732_v7 = vmul.f32 0.1, %v2725_v63  ;;  %v2728_v4 = vpop.f32.mrb[31].mxu0 }
 0xab3   : > { %v2743_v11 = vrot.slane %v2739_v5, 2  ;;  %v2735_v10 = vmax.f32 %v2725_v63, %v2732_v7 }
 0xab5   : > { %2749 = vst.msk [vmem:[#allocation2] sm:$0xc0] %vm677_vm2, %v2743_v11  ;;  %v2738_v33 = vmul.f32 %v4084_v53, %v2735_v10 }
 0xab7   : > { %v2740_v15 = vpack.c.bf16 %v2738_v33, %v2738_v33 }
 0xab9   : > { %v2744_v12 = vrot.slane %v2740_v15, 2 }
 0xabb   : > { %v2745_v2 = vsel %vm670_vm3, %v2743_v11, %v2744_v12  ;;  %2751 = vst.msk [vmem:[#allocation2 + $0x10] sm:$0x3] %vm680_vm5, %v2744_v12  ;;  %v3878_v11 = vld [vmem:[%s5071_s1 + $0x228] sm:$0xff]  }
 0xabc   : > { %2750 = vst.msk [vmem:[#allocation2 + $0x8] sm:$0xff] %vm250_vm0, %v2745_v2  ;;  %v4838_v26 = vld [vmem:[#allocation2] sm:$0xf8]  ;;  %3040 = vmatpush1.bf16.msra.mxu1 %v3878_v11 }
 0xabd   : > { %v2784_v32 = vrot.slane %v4838_v26, 1  ;;  %v2756_v38 = vld [vmem:[#allocation2] sm:$0xe0]  ;;  %v2766_v37 = vshll.u32 %v4838_v26, 16  ;;  %3041 = vmatprep.subr.bf16.mxu1 %v3898_v0 }
 0xabe   : > { %v2758_v52 = vld [vmem:[#allocation2] sm:$0xc0]  ;;  %v2793_v9 = vrot.slane %v2756_v38, 3  ;;  %v3880_v38 = vld [vmem:[%s5071_s1 + $0x238] sm:$0xff]  }
 0xabf   : > { %v2834_v63 = vrot.slane %v2758_v52, 4  ;;  %v2803_v1 = vshrl.u32 %v2758_v52, 16  ;;  %v2768_v5 = vrot.slane %v2766_v37, 1  ;;  %v2806_v4 = vshll.u32 %v2758_v52, 16  ;;  %v2752_v52 = vld [vmem:[#allocation2] sm:$0xfc] }
 0xac2   : > { %v4828_v18 = vld [vmem:[#allocation2 + $0x10] sm:$0x3] }
 0xac3   : > { %v2762_v16 = vld [vmem:[#allocation2 + $0x10] sm:$0x3f]  ;;  %v4830_v22 = vld [vmem:[#allocation2 + $0x8] sm:$0xff]  ;;  %v2796_v8 = vrot.slane %v4828_v18, 3  ;;  %v2820_v59 = vshrl.u32 %v4828_v18, 16  ;;  %v2823_v61 = vshll.u32 %v4828_v18, 16 }
 0xac4   : > { %v4833_v23 = vld [vmem:[#allocation2 + $0x8] sm:$0xfe]  ;;  %v2875_v48 = vrot.slane %v2762_v16, 7  ;;  %v2844_v24 = vrot.slane %v4830_v22, 6  ;;  %v2785_v25 = vrot.slane %v4830_v22, 1  ;;  %v2794_v21 = vrot.slane %v4830_v22, 3 }
 0xac5   : > { %v2874_v27 = vrot.slane %v4833_v23, 7  ;;  %v2759_v17 = vld [vmem:[#allocation2 + $0x10] sm:$0x7]  ;;  %v2835_v39 = vrot.slane %v4830_v22, 4  ;;  %v4852_v51 = vld [vmem:[#allocation2 + $0x8] sm:$0x7f] }
 0xac6   : > { %2847 = vrot.lane.b32.xlu0 %v2844_v24, %s3899_s7  ;;  %2789 = vrot.lane.b32.xlu1 %v2785_v25, %s3900_s8  ;;  %v2797_v40 = vsel %vm364_vm1, %v2794_v21, %v2796_v8  ;;  %v2837_v45 = vrot.slane %v2759_v17, 4  ;;  %v2760_v30 = vld [vmem:[#allocation2 + $0x10] sm:$0x1f]  ;;  %v2786_v6 = vsel %vm5221_vm9, %v2784_v32, %v2785_v25  ;;  %v2811_v50 = vshrl.u32 %v4830_v22, 16  ;;  %vm5231_vm9 = vmmov %vm5230_vm7 }
 0xac7   : > { %v2876_v28 = vsel %vm450_vm8, %v2874_v27, %v2875_v48  ;;  %v2949_v29 = vshrl.u32 %v2874_v27, 16  ;;  %v2952_v34 = vshll.u32 %v2874_v27, 16  ;;  %v2845_v55 = vrot.slane %v2760_v30, 6 }
 0xac8   : > { %v2957_v35 = vshrl.u32 %v2876_v28, 16  ;;  %v2960_v36 = vshll.u32 %v2876_v28, 16  ;;  %v2771_v58 = vshll.u32 %v4852_v51, 16  ;;  %v2814_v19 = vshll.u32 %v4830_v22, 16 }
 0xac9   : > { %v2951_v44 = vrot.slane %v2949_v29, 2  ;;  %v2954_v49 = vrot.slane %v2952_v34, 3  ;;  %v2838_v56 = vsel %vm5223_vm15, %v2835_v39, %v2837_v45  ;;  %v2795_v62 = vsel %vm364_vm1, %v2793_v9, %v2794_v21 }
 0xaca   : > { %v2959_v47 = vrot.slane %v2957_v35, 2  ;;  %v2962_v46 = vrot.slane %v2960_v36, 3  ;;  %2800 = vrot.lane.b32.xlu1 %v2797_v40, %s3901_s11  ;;  %2787 = vrot.lane.b32.xlu0 %v2786_v6, %s3900_s8  ;;  %v2846_v3 = vsel %vm5224_vm14, %v2844_v24, %v2845_v55  ;;  %v2813_v7 = vrot.slane %v2811_v50, 3 }
 0xacb   : > { %v2955_v14 = vor.u32 %v2954_v49, %v2951_v44  ;;  %v2773_v10 = vrot.slane %v2771_v58, 1  ;;  %v2816_v33 = vrot.slane %v2814_v19, 4  ;;  %v2822_v15 = vrot.slane %v2820_v59, 3 }
 0xacc   : > { %v4858_v54 = vor.u32 %v2962_v46, %v2959_v47  ;;  %v2852_v13 = vshrl.u32 %v4833_v23, 16  ;;  %v2825_v12 = vrot.slane %v2823_v61, 4  ;;  %v2855_v2 = vshll.u32 %v4833_v23, 16 }
 0xacd   : > { %v2860_v41 = vshrl.u32 %v2760_v30, 16  ;;  %v2863_v20 = vshll.u32 %v2760_v30, 16  ;;  %v2836_v18 = vsel %vm5225_vm11, %v2834_v63, %v2835_v39  ;;  %v2775_v16 = vshrl.u32 %v4852_v51, 16 }
 0xace   : > { %v2964_v60 = vsel %vm5222_vm13, %v2955_v14, %v4858_v54  ;;  %2841 = vrot.lane.b32.xlu1 %v2838_v56, %s3902_s14  ;;  %2798 = vrot.lane.b32.xlu0 %v2795_v62, %s3901_s11  ;;  %v2764_v22 = vshrl.u32 %v4838_v26, 16  ;;  %v2805_v8 = vrot.slane %v2803_v1, 3  ;;  %v2808_v48 = vrot.slane %v2806_v4, 4  ;;  %v3879_v26 = vld [vmem:[%s5071_s1 + $0x230] sm:$0xff]  }
 0xacf   : > { %3743 = vmatprep.mubr.msk.bf16.mxu1 %vm250_vm0, %v2964_v60  ;;  %v2777_v24 = vor.u32 %v2775_v16, %v2773_v10  ;;  %v2817_v23 = vor.u32 %v2816_v33, %v2813_v7  ;;  %v2854_v21 = vrot.slane %v2852_v13, 6  ;;  %v2826_v27 = vor.u32 %v2825_v12, %v2822_v15  ;;  %3042 = vmatpush1.bf16.msra.mxu1 %v3879_v26 }
 0xad0   : > { %v2769_v25 = vor.u32 %v2768_v5, %v2764_v22  ;;  %v2857_v17 = vrot.slane %v2855_v2, 7  ;;  %v2862_v28 = vrot.slane %v2860_v41, 6  ;;  %v2865_v29 = vrot.slane %v2863_v20, 7  ;;  %3043 = vmatprep.subr.bf16.mxu1 %v3898_v0 }
 0xad1   : > { %v2809_v32 = vor.u32 %v2808_v48, %v2805_v8  ;;  %v2827_v34 = vsel %vm5227_vm12, %v2817_v23, %v2826_v27  ;;  %vm5232_vm13 = vcmask 392192   ;;  %vm5234_vm14 = vcmask 523264   ;;  %v3881_v8 = vld [vmem:[%s5073_s3] sm:$0xff]  }
 0xad2   : > { %2849 = vrot.lane.b32.xlu1 %v2846_v3, %s3899_s7  ;;  %2839 = vrot.lane.b32.xlu0 %v2836_v18, %s3902_s14  ;;  %v2774_v31 = vsel %vm5226_vm10, %v2769_v25, %v2773_v10  ;;  %v2858_v35 = vor.u32 %v2857_v17, %v2854_v21  ;;  %v2866_v36 = vor.u32 %v2865_v29, %v2862_v28  ;;  %vm5233_vm15 = vmmov %vm5232_vm13  ;;  %vm5235_vm11 = vcmask 654336   ;;  %v3084_v48 = vld [vmem:[%s3962_s27 + $0x4] sm:$0xc] }
 0xad3   : > { %v2818_v40 = vsel %vm5228_vm4, %v2809_v32, %v2817_v23  ;;  %3044 = vmatpush1.bf16.msra.mxu1 %v3880_v38  ;;  %vm5236_vm10 = vmmov %vm5234_vm14  ;;  %vm5238_vm4 = vcmask 785408   ;;  %3397 = vmatpush1.bf16.msra.mxu0 %v3881_v8  ;;  %v3733_v25 = vld [vmem:[%s5072_s2 + $0x7] ss:$0 sm:$0xff]  ;;  %v3088_v21 = vunpack.c.l.bf16 %v3084_v48 }
 0xad4   : > { %v2867_v44 = vsel %vm5229_vm6, %v2858_v35, %v2866_v36  ;;  %3764 = vmatprep.subr.bf16.mxu1 %v3898_v0  ;;  %vm5237_vm12 = vmmov %vm5235_vm11  ;;  %3398 = vmatprep.subr.bf16.mxu0 %v3898_v0 }
 0xad5   : > { %vm5239_vm6 = vmmov %vm5238_vm4 }
 0xad6   : > { %2780 = vrot.lane.b32.xlu1 %v2777_v24, %s3903_s17  ;;  %2778 = vrot.lane.b32.xlu0 %v2774_v31, %s3903_s17  ;;  %v3763_v24 = vld [vmem:[%s3962_s27 + $0x8] sm:$0xff]  }
 0xad7   : > { %v3762_v27 = vunpack.c.h.bf16 %v3763_v24 }
 0xad9   : > { %v3100_v38 = vrot.slane %v3762_v27, 4 }
 0xada   : > { %2830 = vrot.lane.b32.xlu1 %v2827_v34, %s3904_s25  ;;  %2828 = vrot.lane.b32.xlu0 %v2818_v40, %s3904_s25  ;;  %v3087_v34 = vld [vmem:[%s3962_s27 + $0x10] sm:$0x3] }
 0xade   : > { %2870 = vrot.lane.b32.xlu1 %v2867_v44, %s3905_s26  ;;  %2868 = vrot.lane.b32.xlu0 %v2858_v35, %s3905_s26  ;;  %v3097_v35 = vrot.slane %v3088_v21, 4 }
 0xb38   : > { %v2848_v39 = vpop.permute.xlu0 %2847  ;;  %v2790_v45 = vpop.permute.xlu1 %2789 }
 0xb3c   : > { %v2801_v30 = vpop.permute.xlu1 %2800  ;;  %v2788_v6 = vpop.permute.xlu0 %2787 }
 0xb40   : > { %v2842_v49 = vpop.permute.xlu1 %2841  ;;  %v2799_v47 = vpop.permute.xlu0 %2798 }
 0xb44   : > { %v2850_v46 = vpop.permute.xlu1 %2849  ;;  %v2840_v37 = vpop.permute.xlu0 %2839 }
 0xb48   : > { %v2781_v14 = vpop.permute.xlu1 %2780  ;;  %v2779_v50 = vpop.permute.xlu0 %2778 }
 0xb49   : > { %v2881_v55 = vsel %vm250_vm0, %v4852_v51, %v2781_v14  ;;  %v2879_v9 = vsel %vm250_vm0, %v2752_v52, %v2779_v50 }
 0xb4a   : > { %v2885_v57 = vsel %vm5230_vm7, %v2881_v55, %v2790_v45  ;;  %v2883_v58 = vsel %vm5231_vm9, %v2879_v9, %v2788_v6  ;;  %vm5240_vm7 = vcmask 916480  }
 0xb4b   : > { %v2889_v19 = vsel %vm5232_vm13, %v2885_v57, %v2801_v30  ;;  %v2887_v60 = vsel %vm5233_vm15, %v2883_v58, %v2799_v47  ;;  %vm5241_vm9 = vmmov %vm5240_vm7  ;;  %vm5242_vm13 = vsmask.f32 5376  ;;  %vm5243_vm15 = vcmask 1043456  }
 0xb4c   : > { %v2831_v59 = vpop.permute.xlu1 %2830  ;;  %v2829_v61 = vpop.permute.xlu0 %2828 }
 0xb4d   : > { %v2893_v56 = vsel %vm5234_vm14, %v2889_v19, %v2831_v59  ;;  %v2891_v51 = vsel %vm5236_vm10, %v2887_v60, %v2829_v61  ;;  %vm5244_vm14 = vmmov %vm5243_vm15  ;;  %vm5251_vm10 = vsmask.f32 7424 }
 0xb4e   : > { %v2897_v62 = vsel %vm5235_vm11, %v2893_v56, %v2842_v49  ;;  %v2895_v63 = vsel %vm5237_vm12, %v2891_v51, %v2840_v37  ;;  %vm5245_vm11 = vmmov %vm5244_vm14  ;;  %vm5252_vm12 = vsmask.f32 4352 }
 0xb4f   : > { %v2901_v1 = vsel %vm5238_vm4, %v2897_v62, %v2850_v46  ;;  %v2899_v5 = vsel %vm5239_vm6, %v2895_v63, %v2848_v39  ;;  %v3091_v39 = vunpack.c.l.bf16 %v3087_v34  ;;  %vm5253_vm4 = vmmov %vm5252_vm12  ;;  %vm5254_vm6 = vsmask.f32 1280 }
 0xb50   : > { %v2871_v3 = vpop.permute.xlu1 %2870  ;;  %v2869_v4 = vpop.permute.xlu0 %2868 }
 0xb51   : > { %v2905_v7 = vsel %vm5240_vm7, %v2901_v1, %v2871_v3  ;;  %v2903_v33 = vsel %vm5241_vm9, %v2899_v5, %v2869_v4  ;;  %v3102_v55 = vrot.slane %v3091_v39, 4  ;;  %v3884_v1 = vld [vmem:[%s5073_s3 + $0x18] sm:$0xff]   ;;  %v3886_v39 = vld [vmem:[%s5073_s3 + $0x28] sm:$0xff]   ;;  %vm5255_vm7 = vcmask 261120  }
 0xb52   : > { %v2940_v11 = vshrl.u32 %v2905_v7, 16  ;;  %v2943_v10 = vshll.u32 %v2905_v7, 16  ;;  %v2933_v15 = vshrl.u32 %v2903_v33, 16  ;;  %v2936_v13 = vshll.u32 %v2903_v33, 16  ;;  %vm5256_vm9 = vmmov %vm5255_vm7 }
 0xb54   : > { %v2942_v12 = vrot.slane %v2940_v11, 2  ;;  %v2945_v2 = vrot.slane %v2943_v10, 3  ;;  %v2935_v41 = vrot.slane %v2933_v15, 2  ;;  %v2938_v20 = vrot.slane %v2936_v13, 3 }
 0xb56   : > { %v2946_v18 = vor.u32 %v2945_v2, %v2942_v12  ;;  %v2939_v16 = vor.u32 %v2938_v20, %v2935_v41 }
 0xb58   : > { %v2947_v22 = vsel %vm5242_vm13, %v2939_v16, %v2946_v18  ;;  %v3885_v16 = vld [vmem:[%s5073_s3 + $0x20] sm:$0xff]  }
 0xb59   : > { %3060 = vmatmul.mubr.bf16.vlgmr.msra.gmra.mrb[24].mxu1 %v2947_v22 }
 0xb5a   : > { %3744 = vmatprep.mubr.msk.bf16.mxu1 %vm250_vm0, %v4858_v54  ;;  %3773 = vmatpush1.bf16.msra.mxu1 %v3881_v8  ;;  %v3761_v54 = vunpack.c.l.bf16 %v3763_v24 }
 0xb5b   : > { %3765 = vmatprep.subr.bf16.mxu1 %v3898_v0 }
 0xb5c   : > { %v3098_v36 = vrot.slane %v3761_v54, 4 }
 0xb5e   : > { %v3099_v6 = vsel %vm5243_vm15, %v3097_v35, %v3098_v36  ;;  %v3101_v49 = vsel %vm5244_vm14, %v3098_v36, %v3100_v38  ;;  %vm5259_vm14 = vcmask 523264  }
 0xb61   : > { %3068 = vmatmul.mubr.bf16.gmra.mrb[28].mxu1 %v2946_v18 }
 0xc2c   : > { %v3061_v23 = vpop.f32.mrb[24].mxu1 }
 0xc2d   : > { %v3062_v17 = vadd.f32 %v3733_v25, %v3061_v23  ;;  %v3063_v28 = vpop.f32.mrb[25].mxu1 }
 0xc2e   : > { %v3064_v29 = vpop.f32.mrb[26].mxu1 }
 0xc2f   : > { %v3075_v31 = vmul.f32 0.1, %v3062_v17  ;;  %v3065_v26 = vadd.f32 %v3733_v25, %v3064_v29  ;;  %v3066_v32 = vpop.f32.mrb[27].mxu1 }
 0xc31   : > { %v3078_v40 = vmax.f32 %v3062_v17, %v3075_v31  ;;  %v3076_v44 = vmul.f32 0.1, %v3065_v26 }
 0xc33   : > { %v3081_v45 = vmul.f32 %v4078_v42, %v3078_v40  ;;  %v3079_v30 = vmax.f32 %v3065_v26, %v3076_v44  ;;  %v3103_v42 = vsel %vm5245_vm11, %v3100_v38, %v3102_v55 }
 0xc34   : > { %v3069_v47 = vpop.f32.mrb[28].mxu1 }
 0xc35   : > { %v3082_v46 = vmul.f32 %v4080_v43, %v3079_v30  ;;  %v3070_v37 = vadd.f32 %v3733_v25, %v3069_v47  ;;  %v3071_v14 = vpop.f32.mrb[29].mxu1  ;;  %v3107_v50 = vadd.f32 %v3099_v6, %v3081_v45  ;;  %v3882_v43 = vld [vmem:[%s5073_s3 + $0x8] sm:$0xff]  }
 0xc36   : > { %v3072_v52 = vpop.f32.mrb[30].mxu1  ;;  %3774 = vmatpush1.bf16.msra.mxu1 %v3882_v43  ;;  %3399 = vmatpush1.bf16.msra.mxu0 %v3882_v43 }
 0xc37   : > { %v3108_v57 = vadd.f32 %v3101_v49, %v3082_v46  ;;  %v3077_v9 = vmul.f32 0.1, %v3070_v37  ;;  %v3073_v58 = vpop.f32.mrb[31].mxu1  ;;  %3766 = vmatprep.subr.bf16.mxu1 %v3898_v0  ;;  %3400 = vmatprep.subr.bf16.mxu0 %v3898_v0 }
 0xc39   : > { %v3110_v19 = vpack.c.bf16 %v3108_v57, %v3107_v50  ;;  %v3080_v59 = vmax.f32 %v3070_v37, %v3077_v9 }
 0xc3b   : > { %v3114_v60 = vrot.slane %v3110_v19, 2  ;;  %v3083_v56 = vmul.f32 %v4084_v53, %v3080_v59  ;;  %v3883_v53 = vld [vmem:[%s5073_s3 + $0x10] sm:$0xff]  }
 0xc3c   : > { %3775 = vmatpush1.bf16.msra.mxu1 %v3883_v53  ;;  %3401 = vmatpush1.bf16.msra.mxu0 %v3883_v53  ;;  %v3887_v19 = vld [vmem:[%s5073_s3 + $0x30] sm:$0xff]  }
 0xc3d   : > { %3120 = vst.msk [vmem:[#allocation2] sm:$0xc0] %vm677_vm2, %v3114_v60  ;;  %v3109_v61 = vadd.f32 %v3103_v42, %v3083_v56  ;;  %3767 = vmatprep.subr.bf16.mxu1 %v3898_v0  ;;  %3402 = vmatprep.subr.bf16.mxu0 %v3898_v0  ;;  %vm5247_vm2 = vmmov %vm5242_vm13  ;;  %vm5257_vm13 = vcmask 392192  }
 0xc3e   : > { %vm5258_vm15 = vmmov %vm5257_vm13 }
 0xc3f   : > { %v3111_v62 = vpack.c.bf16 %v3109_v61, %v3109_v61 }
 0xc40   : > { %3776 = vmatpush1.bf16.msra.mxu1 %v3884_v1  ;;  %3403 = vmatpush1.bf16.msra.mxu0 %v3884_v1 }
 0xc41   : > { %v3115_v51 = vrot.slane %v3111_v62, 2  ;;  %3768 = vmatprep.subr.bf16.mxu1 %v3898_v0  ;;  %3404 = vmatprep.subr.bf16.mxu0 %v3898_v0 }
 0xc43   : > { %v3116_v63 = vsel %vm670_vm3, %v3114_v60, %v3115_v51  ;;  %3122 = vst.msk [vmem:[#allocation2 + $0x10] sm:$0x3] %vm680_vm5, %v3115_v51  ;;  %vm5248_vm3 = vmmov %vm5245_vm11  ;;  %vm5249_vm5 = vcmask 1041408   ;;  %vm5260_vm11 = vcmask 654336  }
 0xc44   : > { %3121 = vst.msk [vmem:[#allocation2 + $0x8] sm:$0xff] %vm250_vm0, %v3116_v63  ;;  %v4968_v12 = vld [vmem:[#allocation2] sm:$0xf8]  ;;  %3777 = vmatpush1.bf16.msra.mxu1 %v3885_v16  ;;  %3405 = vmatpush1.bf16.msra.mxu0 %v3885_v16 }
 0xc45   : > { %v3155_v22 = vrot.slane %v4968_v12, 1  ;;  %v3127_v25 = vld [vmem:[#allocation2] sm:$0xe0]  ;;  %3769 = vmatprep.subr.bf16.mxu1 %v3898_v0  ;;  %3406 = vmatprep.subr.bf16.mxu0 %v3898_v0  ;;  %v3137_v34 = vshll.u32 %v4968_v12, 16  ;;  %v3135_v1 = vshrl.u32 %v4968_v12, 16 }
 0xc46   : > { %v3129_v40 = vld [vmem:[#allocation2] sm:$0xc0]  ;;  %v3164_v45 = vrot.slane %v3127_v25, 3 }
 0xc47   : > { %v3205_v55 = vrot.slane %v3129_v40, 4  ;;  %v3174_v52 = vshrl.u32 %v3129_v40, 16  ;;  %v3139_v57 = vrot.slane %v3137_v34, 1  ;;  %v3177_v58 = vshll.u32 %v3129_v40, 16 }
 0xc48   : > { %3778 = vmatpush1.bf16.msra.mxu1 %v3886_v39  ;;  %3407 = vmatpush1.bf16.msra.mxu0 %v3886_v39 }
 0xc49   : > { %3770 = vmatprep.subr.bf16.mxu1 %v3898_v0  ;;  %3408 = vmatprep.subr.bf16.mxu0 %v3898_v0 }
 0xc4a   : > { %v4958_v3 = vld [vmem:[#allocation2 + $0x10] sm:$0x3] }
 0xc4b   : > { %v3133_v5 = vld [vmem:[#allocation2 + $0x10] sm:$0x3f]  ;;  %v4960_v7 = vld [vmem:[#allocation2 + $0x8] sm:$0xff]  ;;  %v3167_v4 = vrot.slane %v4958_v3, 3  ;;  %v3191_v49 = vshrl.u32 %v4958_v3, 16  ;;  %v3194_v37 = vshll.u32 %v4958_v3, 16 }
 0xc4c   : > { %v4963_v11 = vld [vmem:[#allocation2 + $0x8] sm:$0xfe]  ;;  %v3246_v10 = vrot.slane %v3133_v5, 7  ;;  %v3215_v33 = vrot.slane %v4960_v7, 6  ;;  %v3156_v15 = vrot.slane %v4960_v7, 1  ;;  %v3165_v13 = vrot.slane %v4960_v7, 3  ;;  %3779 = vmatpush1.bf16.msra.mxu1 %v3887_v19  ;;  %3409 = vmatpush1.bf16.msra.mxu0 %v3887_v19 }
 0xc4d   : > { %v3245_v2 = vrot.slane %v4963_v11, 7  ;;  %v3130_v41 = vld [vmem:[#allocation2 + $0x10] sm:$0x7]  ;;  %v3206_v21 = vrot.slane %v4960_v7, 4  ;;  %v4985_v32 = vld [vmem:[#allocation2 + $0x8] sm:$0x7f]  ;;  %3771 = vmatprep.subr.bf16.mxu1 %v3898_v0  ;;  %3410 = vmatprep.subr.bf16.mxu0 %v3898_v0 }
 0xc4e   : > { %3218 = vrot.lane.b32.xlu0 %v3215_v33, %s3899_s7  ;;  %3160 = vrot.lane.b32.xlu1 %v3156_v15, %s3900_s8  ;;  %v3168_v23 = vsel %vm364_vm1, %v3165_v13, %v3167_v4  ;;  %v3208_v27 = vrot.slane %v3130_v41, 4  ;;  %v4982_v17 = vld [vmem:[#allocation2 + $0x10] sm:$0x1f]  ;;  %v3182_v44 = vshrl.u32 %v4960_v7, 16  ;;  %v3142_v30 = vshll.u32 %v4985_v32, 16  ;;  %v3888_v41 = vld [vmem:[%s5073_s3 + $0x38] sm:$0xff]  }
 0xc4f   : > { %v3247_v20 = vsel %vm450_vm8, %v3245_v2, %v3246_v10  ;;  %v3318_v18 = vshrl.u32 %v3245_v2, 16  ;;  %v3321_v24 = vshll.u32 %v3245_v2, 16  ;;  %vm5246_vm8 = vcmask 1046528  }
 0xc50   : > { %v3326_v8 = vshrl.u32 %v3247_v20, 16  ;;  %v3329_v48 = vshll.u32 %v3247_v20, 16  ;;  %v3157_v28 = vsel %vm5246_vm8, %v3155_v22, %v3156_v15  ;;  %v3216_v38 = vrot.slane %v4982_v17, 6  ;;  %3780 = vmatpush1.bf16.msra.mxu1 %v3888_v41  ;;  %3411 = vmatpush1.bf16.msra.mxu0 %v3888_v41  ;;  %vm5261_vm8 = vmmov %vm5259_vm14 }
 0xc51   : > { %v3320_v54 = vrot.slane %v3318_v18, 2  ;;  %v3323_v26 = vrot.slane %v3321_v24, 3  ;;  %v3185_v6 = vshll.u32 %v4960_v7, 16  ;;  %v3209_v46 = vsel %vm5248_vm3, %v3206_v21, %v3208_v27  ;;  %3772 = vmatprep.subr.bf16.mxu1 %v3898_v0  ;;  %3412 = vmatprep.subr.bf16.mxu0 %v3898_v0 }
 0xc52   : > { %v3328_v29 = vrot.slane %v3326_v8, 2  ;;  %v3331_v31 = vrot.slane %v3329_v48, 3  ;;  %3171 = vrot.lane.b32.xlu1 %v3168_v23, %s3901_s11  ;;  %3158 = vrot.lane.b32.xlu0 %v3157_v28, %s3900_s8  ;;  %v3166_v14 = vsel %vm364_vm1, %v3164_v45, %v3165_v13  ;;  %v3217_v50 = vsel %vm5249_vm5, %v3215_v33, %v3216_v38  ;;  %vm5250_vm1 = vmmov %vm5248_vm3  ;;  %v3889_v8 = vld [vmem:[%s5073_s3 + $0x40] sm:$0xff]  }
 0xc53   : > { %v3324_v36 = vor.u32 %v3323_v26, %v3320_v54  ;;  %v3184_v9 = vrot.slane %v3182_v44, 3  ;;  %v3144_v59 = vrot.slane %v3142_v30, 1  ;;  %v3187_v42 = vrot.slane %v3185_v6, 4  ;;  %v3123_v26 = vld [vmem:[#allocation2] sm:$0xfc] }
 0xc54   : > { %v3332_v35 = vor.u32 %v3331_v31, %v3328_v29  ;;  %v3193_v60 = vrot.slane %v3191_v49, 3  ;;  %v3223_v56 = vshrl.u32 %v4963_v11, 16  ;;  %v3196_v61 = vrot.slane %v3194_v37, 4  ;;  %3781 = vmatpush1.bf16.msra.mxu1 %v3889_v8  ;;  %3413 = vmatpush1.bf16.msra.mxu0 %v3889_v8 }
 0xc55   : > { %v3226_v62 = vshll.u32 %v4963_v11, 16  ;;  %v3231_v43 = vshrl.u32 %v4982_v17, 16  ;;  %v3234_v51 = vshll.u32 %v4982_v17, 16  ;;  %v3207_v63 = vsel %vm5250_vm1, %v3205_v55, %v3206_v21 }
 0xc56   : > { %3756 = vmatprep.mubr.msk.bf16.mxu1 %vm250_vm0, %v3332_v35  ;;  %v3333_v47 = vsel %vm5247_vm2, %v3324_v36, %v3332_v35  ;;  %3212 = vrot.lane.b32.xlu1 %v3209_v46, %s3902_s14  ;;  %v3146_v53 = vshrl.u32 %v4985_v32, 16  ;;  %v3176_v3 = vrot.slane %v3174_v52, 3  ;;  %v3179_v5 = vrot.slane %v3177_v58, 4  ;;  %vm5262_vm2 = vmmov %vm5260_vm11 }
 0xc57   : > { %3755 = vmatprep.mubr.msk.bf16.mxu0 %vm250_vm0, %v3333_v47  ;;  %3169 = vrot.lane.b32.xlu0 %v3166_v14, %s3901_s11  ;;  %v3140_v4 = vor.u32 %v3139_v57, %v3135_v1  ;;  %v3188_v11 = vor.u32 %v3187_v42, %v3184_v9  ;;  %v3225_v10 = vrot.slane %v3223_v56, 6  ;;  %v3197_v33 = vor.u32 %v3196_v61, %v3193_v60 }
 0xc58   : > { %v3148_v7 = vor.u32 %v3146_v53, %v3144_v59  ;;  %v3228_v15 = vrot.slane %v3226_v62, 7  ;;  %v3233_v13 = vrot.slane %v3231_v43, 6  ;;  %v3236_v2 = vrot.slane %v3234_v51, 7  ;;  %v3745_v43 = vld [vmem:[%s5074_s4] ss:$0 sm:$0xff] }
 0xc59   : > { %v3145_v12 = vsel %vm5251_vm10, %v3140_v4, %v3144_v59  ;;  %v3180_v20 = vor.u32 %v3179_v5, %v3176_v3  ;;  %v3198_v18 = vsel %vm5252_vm12, %v3188_v11, %v3197_v33  ;;  %vm5263_vm3 = vcmask 785408  }
 0xc5a   : > { %3220 = vrot.lane.b32.xlu1 %v3217_v50, %s3899_s7  ;;  %v3229_v16 = vor.u32 %v3228_v15, %v3225_v10  ;;  %v3237_v22 = vor.u32 %v3236_v2, %v3233_v13  ;;  %vm5265_vm5 = vcmask 916480   ;;  %vm5267_vm10 = vsmask.f32 5376 }
 0xc5b   : > { %3210 = vrot.lane.b32.xlu0 %v3207_v63, %s3902_s14  ;;  %v3189_v48 = vsel %vm5253_vm4, %v3180_v20, %v3188_v11  ;;  %vm5266_vm1 = vmmov %vm5265_vm5  ;;  %vm3444_vm12 = vcmask 97280  }
 0xc5c   : > { %v3238_v24 = vsel %vm5254_vm6, %v3229_v16, %v3237_v22 }
 0xc5e   : > { %3151 = vrot.lane.b32.xlu1 %v3148_v7, %s3903_s17 }
 0xc5f   : > { %3149 = vrot.lane.b32.xlu0 %v3145_v12, %s3903_s17 }
 0xc62   : > { %3201 = vrot.lane.b32.xlu1 %v3198_v18, %s3904_s25 }
 0xc63   : > { %3199 = vrot.lane.b32.xlu0 %v3189_v48, %s3904_s25 }
 0xc66   : > { %3241 = vrot.lane.b32.xlu1 %v3238_v24, %s3905_s26 }
 0xc67   : > { %3239 = vrot.lane.b32.xlu0 %v3229_v16, %s3905_s26 }
 0xcc0   : > { %v3219_v25 = vpop.permute.xlu0 %3218  ;;  %v3161_v23 = vpop.permute.xlu1 %3160 }
 0xcc4   : > { %v3172_v54 = vpop.permute.xlu1 %3171  ;;  %v3159_v21 = vpop.permute.xlu0 %3158 }
 0xcc8   : > { %v3213_v27 = vpop.permute.xlu1 %3212 }
 0xcc9   : > { %v3170_v17 = vpop.permute.xlu0 %3169 }
 0xccc   : > { %v3221_v28 = vpop.permute.xlu1 %3220 }
 0xccd   : > { %v3211_v29 = vpop.permute.xlu0 %3210 }
 0xcd0   : > { %v3152_v31 = vpop.permute.xlu1 %3151 }
 0xcd1   : > { %v3252_v0 = vsel %vm250_vm0, %v4985_v32, %v3152_v31  ;;  %v3150_v34 = vpop.permute.xlu0 %3149 }
 0xcd2   : > { %v3256_v35 = vsel %vm5255_vm7, %v3252_v0, %v3161_v23  ;;  %v3250_v36 = vsel %vm250_vm0, %v3123_v26, %v3150_v34  ;;  %vm5264_vm0 = vmmov %vm5263_vm3 }
 0xcd3   : > { %v3254_v38 = vsel %vm5256_vm9, %v3250_v36, %v3159_v21  ;;  %v3260_v40 = vsel %vm5257_vm13, %v3256_v35, %v3172_v54 }
 0xcd4   : > { %v3202_v44 = vpop.permute.xlu1 %3201  ;;  %v3258_v39 = vsel %vm5258_vm15, %v3254_v38, %v3170_v17 }
 0xcd5   : > { %v3264_v45 = vsel %vm5259_vm14, %v3260_v40, %v3202_v44  ;;  %v3200_v30 = vpop.permute.xlu0 %3199 }
 0xcd6   : > { %v3268_v6 = vsel %vm5260_vm11, %v3264_v45, %v3213_v27  ;;  %v3262_v32 = vsel %vm5261_vm8, %v3258_v39, %v3200_v30 }
 0xcd7   : > { %v3266_v49 = vsel %vm5262_vm2, %v3262_v32, %v3211_v29  ;;  %v3272_v47 = vsel %vm5263_vm3, %v3268_v6, %v3221_v28 }
 0xcd8   : > { %v3242_v46 = vpop.permute.xlu1 %3241  ;;  %v3270_v37 = vsel %vm5264_vm0, %v3266_v49, %v3219_v25 }
 0xcd9   : > { %v3276_v14 = vsel %vm5265_vm5, %v3272_v47, %v3242_v46  ;;  %v3240_v55 = vpop.permute.xlu0 %3239 }
 0xcda   : > { %v3309_v52 = vshrl.u32 %v3276_v14, 16  ;;  %v3312_v50 = vshll.u32 %v3276_v14, 16  ;;  %v3274_v57 = vsel %vm5266_vm1, %v3270_v37, %v3240_v55 }
 0xcdb   : > { %v3302_v9 = vshrl.u32 %v3274_v57, 16  ;;  %v3305_v58 = vshll.u32 %v3274_v57, 16 }
 0xcdc   : > { %v3311_v19 = vrot.slane %v3309_v52, 2  ;;  %v3314_v59 = vrot.slane %v3312_v50, 3 }
 0xcdd   : > { %v3304_v42 = vrot.slane %v3302_v9, 2  ;;  %v3307_v60 = vrot.slane %v3305_v58, 3 }
 0xcde   : > { %v3315_v56 = vor.u32 %v3314_v59, %v3311_v19 }
 0xcdf   : > { %v3308_v61 = vor.u32 %v3307_v60, %v3304_v42 }
 0xce0   : > { %3437 = vmatmul.mubr.bf16.vlgmr.msra.gmra.mrb[32].mxu1 %v3315_v56 }
 0xce1   : > { %v3316_v62 = vsel %vm5267_vm10, %v3308_v61, %v3315_v56 }
 0xce2   : > { %3429 = vmatmul.mubr.bf16.vlgmr.msra.gmra.mrb[32].mxu0 %v3316_v62 }
 0xdb3   : > { %v3438_v51 = vpop.f32.mrb[32].mxu1 }
 0xdb4   : > { %v3439_v63 = vadd.f32 %v3745_v43, %v3438_v51  ;;  %v3440_v53 = vpop.f32.mrb[33].mxu1 }
 0xdb5   : > { %v3430_v1 = vpop.f32.mrb[32].mxu0  ;;  %v3441_v3 = vpop.f32.mrb[34].mxu1 }
 0xdb6   : > { %3447 = vst.msk [vmem:[%s224_s30 + $0x10] sm:$0xff] %vm3444_vm12, %v3439_v63  ;;  %v3431_v5 = vadd.f32 %v3745_v43, %v3430_v1  ;;  %v3432_v7 = vpop.f32.mrb[33].mxu0  ;;  %v3442_v4 = vpop.f32.mrb[35].mxu1 }
 0xdb7   : > { %v3433_v11 = vpop.f32.mrb[34].mxu0 }
 0xdb8   : > { %3445 = vst.msk [vmem:[%s224_s30] sm:$0xff] %vm3444_vm12, %v3431_v5  ;;  %v3434_v10 = vadd.f32 %v3745_v43, %v3433_v11  ;;  %v3435_v33 = vpop.f32.mrb[35].mxu0 }
 0xdba   : > { %3446 = vst.msk [vmem:[%s224_s30 + $0x8] sm:$0xff] %vm3444_vm12, %v3434_v10 }
 0xdbb PF: > { %s15_s18 = sadd.s32 1, %s3896_s18  }
 0xdbc   : > { %p12_p4 = scmp.ge.s32.totalorder %s15_s18, 4  }
 0xdbe   :  { %14 = sbr.rel (!%p12_p4) target bundleno = 1 (0x1), region = 84 }

</bundles_post_ra>
